<compile_context>
chip_gen: v7x
topology: tpu7x:2x2x1
jax: 0.10.0
libtpu: 0.0.40
codegen_flags: <defaults>
</compile_context>

<pallas_src>
import jax
import jax.numpy as jnp
from jax.experimental import pallas as pl
from jax.experimental.pallas import tpu as pltpu


def _round_up(x, m):
    return ((x + m - 1) // m) * m


# ----------------------------- Pallas kernel --------------------------------

def _dual_encoder_kernel(xc_ref, xr_ref, lenc_ref, lenr_ref,
                         wihc_ref, whhc_ref, bihc_ref, bhhc_ref,
                         wihr_ref, whhr_ref, bihr_ref, bhhr_ref,
                         m_ref, out_ref):
    """Fused forward: both GRU encoders (interleaved per timestep) + bilinear.

    xc_ref:   (T, Nc, E)   bf16 time-major context embeddings (lane-padded)
    xr_ref:   (T, Nr, E)   bf16 time-major response embeddings
    len*_ref: (N*, 1)      int32 sequence lengths (padded rows -> 1)
    wih*_ref: (E, 3*H*)    bf16, gate order [r|z|n], each gate lane-aligned
    whh*_ref: (H*, 3*H*)   bf16
    bih*/bhh*: (1, 3*H*)   f32
    m_ref:    (Hc, Hr)     bf16, zero-padded bilinear matrix
    out_ref:  (Nc, Nr)     f32, dense scores f_c @ M @ f_r^T
    """
    T, Nc, E = xc_ref.shape
    Nr = xr_ref.shape[1]
    Hc = whhc_ref.shape[0]
    Hr = whhr_ref.shape[0]

    # Hoisted input projections: one big MXU matmul per encoder for ALL steps.
    gic_all = jnp.dot(xc_ref[...].reshape(T * Nc, E), wihc_ref[...],
                      preferred_element_type=jnp.float32) + bihc_ref[...]
    gir_all = jnp.dot(xr_ref[...].reshape(T * Nr, E), wihr_ref[...],
                      preferred_element_type=jnp.float32) + bihr_ref[...]

    last_c = lenc_ref[...] - 1          # (Nc, 1) int32
    last_r = lenr_ref[...] - 1          # (Nr, 1) int32

    whhc = whhc_ref[...]
    whhr = whhr_ref[...]
    bhhc = bhhc_ref[...]
    bhhr = bhhr_ref[...]

    h_c = jnp.zeros((Nc, Hc), jnp.float32)
    h_r = jnp.zeros((Nr, Hr), jnp.float32)
    f_c = jnp.zeros((Nc, Hc), jnp.float32)
    f_r = jnp.zeros((Nr, Hr), jnp.float32)

    # Static unroll (small T); both encoders' step-t work shares one basic block
    # so the scheduler overlaps the two independent MXU/EUP chains.
    # TODO(synk): for large T switch to lax.fori_loop(..., unroll=2..4) and chunk
    # the hoisted gi_*_all over time; set vmem_limit_bytes for v7x's 64 MiB VMEM.
    for t in range(T):
        gh_c = jnp.dot(h_c.astype(jnp.bfloat16), whhc,
                       preferred_element_type=jnp.float32) + bhhc
        gh_r = jnp.dot(h_r.astype(jnp.bfloat16), whhr,
                       preferred_element_type=jnp.float32) + bhhr
        gi_c = gic_all[t * Nc:(t + 1) * Nc, :]          # aligned static slices
        gi_r = gir_all[t * Nr:(t + 1) * Nr, :]

        r_c = jax.nn.sigmoid(gi_c[:, 0:Hc] + gh_c[:, 0:Hc])
        z_c = jax.nn.sigmoid(gi_c[:, Hc:2 * Hc] + gh_c[:, Hc:2 * Hc])
        n_c = jnp.tanh(gi_c[:, 2 * Hc:3 * Hc] + r_c * gh_c[:, 2 * Hc:3 * Hc])
        h_c = (1.0 - z_c) * n_c + z_c * h_c

        r_r = jax.nn.sigmoid(gi_r[:, 0:Hr] + gh_r[:, 0:Hr])
        z_r = jax.nn.sigmoid(gi_r[:, Hr:2 * Hr] + gh_r[:, Hr:2 * Hr])
        n_r = jnp.tanh(gi_r[:, 2 * Hr:3 * Hr] + r_r * gh_r[:, 2 * Hr:3 * Hr])
        h_r = (1.0 - z_r) * n_r + z_r * h_r

        f_c = jnp.where(last_c == t, h_c, f_c)
        f_r = jnp.where(last_r == t, h_r, f_r)

    # Bilinear as one dense MXU chain (no M=1 batched einsum, no Rpad buffer):
    # (Nc, Hc) @ (Hc, Hr) then contraction of the padded response-hidden dim
    # against ALL response rows at once -> (Nc, Nr).
    cm = jnp.dot(f_c.astype(jnp.bfloat16), m_ref[...],
                 preferred_element_type=jnp.float32)
    scores = jax.lax.dot_general(cm.astype(jnp.bfloat16), f_r.astype(jnp.bfloat16),
                                 (((1,), (1,)), ((), ())),
                                 preferred_element_type=jnp.float32)
    out_ref[...] = scores


def dual_encoder_forward(xc, xr, len_c, len_r,
                         wih_c, whh_c, bih_c, bhh_c,
                         wih_r, whh_r, bih_r, bhh_r, m_pad):
    T, Nc, E = xc.shape
    Nr = xr.shape[1]
    Hc3 = wih_c.shape[1]
    Hr3 = wih_r.shape[1]
    Hc = Hc3 // 3
    Hr = Hr3 // 3

    def full(shape):
        return pl.BlockSpec(shape, lambda i, _s=shape: (0,) * len(_s))

    return pl.pallas_call(
        _dual_encoder_kernel,
        out_shape=jax.ShapeDtypeStruct((Nc, Nr), jnp.float32),
        grid=(1,),
        in_specs=[
            full((T, Nc, E)), full((T, Nr, E)),
            full((Nc, 1)), full((Nr, 1)),
            full((E, Hc3)), full((Hc, Hc3)), full((1, Hc3)), full((1, Hc3)),
            full((E, Hr3)), full((Hr, Hr3)), full((1, Hr3)), full((1, Hr3)),
            full((Hc, Hr)),
        ],
        out_specs=full((Nc, Nr)),
        compiler_params=pltpu.CompilerParams(dimension_semantics=("arbitrary",)),
    )(xc, xr, len_c, len_r, wih_c, whh_c, bih_c, bhh_c,
      wih_r, whh_r, bih_r, bhh_r, m_pad)


# ----------------------------- Parameter packing -----------------------------

def _pack_gru_params(enc, Epad, Hpad):
    """Zero-pad GRU parameters so each [r|z|n] gate block starts on a 128-lane
    boundary; matmul weights cast to bf16 (MXU), biases stay f32."""
    E = enc.wih_t.shape[0]
    H = enc.hidden_size
    wih = jnp.zeros((Epad, 3 * Hpad), jnp.float32)
    whh = jnp.zeros((Hpad, 3 * Hpad), jnp.float32)
    bih = jnp.zeros((1, 3 * Hpad), jnp.float32)
    bhh = jnp.zeros((1, 3 * Hpad), jnp.float32)
    for g in range(3):
        wih = wih.at[:E, g * Hpad:g * Hpad + H].set(enc.wih_t[:, g * H:(g + 1) * H])
        whh = whh.at[:H, g * Hpad:g * Hpad + H].set(enc.whh_t[:, g * H:(g + 1) * H])
        bih = bih.at[0, g * Hpad:g * Hpad + H].set(enc.b_ih[0, g * H:(g + 1) * H])
        bhh = bhh.at[0, g * Hpad:g * Hpad + H].set(enc.b_hh[0, g * H:(g + 1) * H])
    return wih.astype(jnp.bfloat16), whh.astype(jnp.bfloat16), bih, bhh


# ----------------------------- Modules (glue) --------------------------------

class Encoder:
    """Deterministic single-layer unidirectional GRU encoder (parameter holder)."""

    def __init__(self, key, vocab, emb, hidden):
        self.hidden_size = hidden
        self.bidirectional = False
        self.n_layers = 1
        self.rnn_cell_type = 'gru'
        k1, k2, k3, k4, k5 = jax.random.split(key, 5)
        s = 0.1
        self.emb = s * jax.random.normal(k1, (vocab, emb), jnp.float32)
        self.wih_t = s * jax.random.normal(k2, (emb, 3 * hidden), jnp.float32)
        self.whh_t = s * jax.random.normal(k3, (hidden, 3 * hidden), jnp.float32)
        self.b_ih = s * jax.random.normal(k4, (1, 3 * hidden), jnp.float32)
        self.b_hh = s * jax.random.normal(k5, (1, 3 * hidden), jnp.float32)


class DualEncoder:
    """JAX/Pallas port of networks/dual_encoder.py::DualEncoder (use_output=True).

    Note: the reference defines `self.final_layer = nn.Softmax()` but never applies
    it in forward; logits are returned directly, so no softmax here either.
    """

    def __init__(self, key, context, response, use_output=True):
        self.context = context
        self.response = response
        self.use_output = use_output
        c_h = context.hidden_size * (2 if context.bidirectional else 1)
        r_h = response.hidden_size * (2 if response.bidirectional else 1)
        self.M = jax.random.normal(key, (c_h, r_h), jnp.float32)   # torch.randn([c_h, r_h])

        emb_dim = context.emb.shape[1]
        assert response.emb.shape[1] == emb_dim
        self.Epad = _round_up(emb_dim, 128)
        self.Hc_pad = _round_up(c_h, 128)
        self.Hr_pad = _round_up(r_h, 128)

        (self.wih_c, self.whh_c, self.bih_c, self.bhh_c) = _pack_gru_params(
            context, self.Epad, self.Hc_pad)
        (self.wih_r, self.whh_r, self.bih_r, self.bhh_r) = _pack_gru_params(
            response, self.Epad, self.Hr_pad)

        # Lane-padded bf16 embedding tables: jnp.take already yields lane-dense
        # rows, so __call__ needs no float zero-fill / scatter / transpose pass.
        self.emb_c = jnp.zeros((context.emb.shape[0], self.Epad), jnp.bfloat16
                               ).at[:, :emb_dim].set(context.emb.astype(jnp.bfloat16))
        self.emb_r = jnp.zeros((response.emb.shape[0], self.Epad), jnp.bfloat16
                               ).at[:, :emb_dim].set(response.emb.astype(jnp.bfloat16))
        # Zero-padded M nulls all padded hidden lanes in the bilinear.
        self.M_pad = jnp.zeros((self.Hc_pad, self.Hr_pad), jnp.float32
                               ).at[:c_h, :r_h].set(self.M).astype(jnp.bfloat16)

    def __call__(self, context_var, responses_var, context_lengths_var, responses_lengths_var):
        batch, num_resp, seq_len = responses_var.shape
        n_rows = batch * num_resp
        # Per-encoder row padding (context no longer inflated by num_resp).
        Nc = _round_up(max(batch, 8), 8)
        Nr = _round_up(max(n_rows, 8), 8)

        if not self.use_output:
            # TODO(synk): use_output=False path (h_c.view(n_layers, 1, -1) folds batch
            # into the feature dim; only well-defined for batch==1) not reproduced here.
            raise NotImplementedError

        # Cheap int-side row padding of tokens / lengths, then a time-major gather
        # of the lane-padded bf16 embedding tables (padded rows use token 0; their
        # hidden states are bounded garbage and never read downstream).
        ctx_tok = jnp.zeros((Nc, seq_len), jnp.int32).at[:batch].set(
            context_var.astype(jnp.int32))
        resp_tok = jnp.zeros((Nr, seq_len), jnp.int32).at[:n_rows].set(
            responses_var.reshape(-1, seq_len).astype(jnp.int32))
        xc = jnp.take(self.emb_c, ctx_tok.T, axis=0)      # (T, Nc, Epad) bf16
        xr = jnp.take(self.emb_r, resp_tok.T, axis=0)     # (T, Nr, Epad) bf16

        len_c = jnp.ones((Nc, 1), jnp.int32).at[:batch, 0].set(
            context_lengths_var.astype(jnp.int32))
        len_r = jnp.ones((Nr, 1), jnp.int32).at[:n_rows, 0].set(
            responses_lengths_var.reshape(-1).astype(jnp.int32))

        scores_all = dual_encoder_forward(
            xc, xr, len_c, len_r,
            self.wih_c, self.whh_c, self.bih_c, self.bhh_c,
            self.wih_r, self.whh_r, self.bih_r, self.bhh_r,
            self.M_pad)                                    # (Nc, Nr) dense scores

        # logits[b, j] = scores_all[b, b*num_resp + j]  (diagonal-block gather).
        cols = jnp.arange(batch)[:, None] * num_resp + jnp.arange(num_resp)[None, :]
        return scores_all[:batch][jnp.arange(batch)[:, None], cols]


# ----------------------------- Pure-JAX reference ----------------------------

def _gru_ref(enc, tokens, lengths):
    x = jnp.take(enc.emb, tokens, axis=0)                 # (N, T, E)  f32
    N, T, E = x.shape
    H = enc.hidden_size

    def step(h, x_t):
        gi = x_t @ enc.wih_t + enc.b_ih
        gh = h @ enc.whh_t + enc.b_hh
        r = jax.nn.sigmoid(gi[:, :H] + gh[:, :H])
        z = jax.nn.sigmoid(gi[:, H:2 * H] + gh[:, H:2 * H])
        n = jnp.tanh(gi[:, 2 * H:] + r * gh[:, 2 * H:])
        h_new = (1.0 - z) * n + z * h
        return h_new, h_new

    _, hs = jax.lax.scan(step, jnp.zeros((N, H), jnp.float32),
                         jnp.transpose(x, (1, 0, 2)))
    return hs[lengths - 1, jnp.arange(N)]                 # (N, H)


def _dual_encoder_ref(model, ctx, resp, ctx_len, resp_len):
    batch, num_resp, seq_len = resp.shape
    f_c = _gru_ref(model.context, ctx, ctx_len)
    f_r = _gru_ref(model.response, resp.reshape(-1, seq_len), resp_len.reshape(-1))
    f_r = f_r.reshape(batch, num_resp, -1)
    return jnp.einsum('bh,hr,bjr->bj', f_c, model.M, f_r)


# --------------------------------- main ---------------------------------------

if __name__ == "__main__":
    key = jax.random.PRNGKey(0)
    k_ctx, k_resp, k_M, k_tok1, k_tok2, k_len1, k_len2 = jax.random.split(key, 7)

    batch, num_resp, seq_len = 2, 4, 8
    vocab, emb = 50, 16
    c_hidden, r_hidden = 32, 16

    ctx_encoder = Encoder(k_ctx, vocab, emb, c_hidden)
    resp_encoder = Encoder(k_resp, vocab, emb, r_hidden)
    model = DualEncoder(k_M, ctx_encoder, resp_encoder, use_output=True)

    context_var = jax.random.randint(k_tok1, (batch, seq_len), 0, vocab, dtype=jnp.int32)
    responses_var = jax.random.randint(k_tok2, (batch, num_resp, seq_len), 0, vocab, dtype=jnp.int32)
    context_lengths_var = jax.random.randint(k_len1, (batch,), 1, seq_len + 1, dtype=jnp.int32)
    responses_lengths_var = jax.random.randint(k_len2, (batch, num_resp), 1, seq_len + 1, dtype=jnp.int32)

    out = model(context_var, responses_var, context_lengths_var, responses_lengths_var)
    out = jax.block_until_ready(out)
    assert out.shape == (batch, num_resp), out.shape

    ref = jax.block_until_ready(
        _dual_encoder_ref(model, context_var, responses_var,
                          context_lengths_var, responses_lengths_var))
    # bf16 MXU operands with f32 accumulation/gate math: slightly looser tolerance
    # vs the pure-f32 reference (error compounds mildly through the recurrence).
    assert jnp.allclose(out, ref, rtol=2e-2, atol=2e-2), (out, ref)

    print("KERNEL_OK")
</pallas_src>

<mosaic_0001>
module attributes {stable_mosaic.version = 11 : i64} {
  func.func @_dual_encoder_kernel(%arg0: i32, %arg1: memref<8x8x128xbf16, #tpu.memory_space<vmem>>, %arg2: memref<8x8x128xbf16, #tpu.memory_space<vmem>>, %arg3: memref<8x1xi32, #tpu.memory_space<vmem>>, %arg4: memref<8x1xi32, #tpu.memory_space<vmem>>, %arg5: memref<128x384xbf16, #tpu.memory_space<vmem>>, %arg6: memref<128x384xbf16, #tpu.memory_space<vmem>>, %arg7: memref<1x384xf32, #tpu.memory_space<vmem>>, %arg8: memref<1x384xf32, #tpu.memory_space<vmem>>, %arg9: memref<128x384xbf16, #tpu.memory_space<vmem>>, %arg10: memref<128x384xbf16, #tpu.memory_space<vmem>>, %arg11: memref<1x384xf32, #tpu.memory_space<vmem>>, %arg12: memref<1x384xf32, #tpu.memory_space<vmem>>, %arg13: memref<128x128xbf16, #tpu.memory_space<vmem>>, %arg14: memref<8x8xf32, #tpu.memory_space<vmem>>) attributes {dimension_semantics = [#tpu.dimension_semantics<arbitrary>], iteration_bounds = array<i64: 1>, scalar_prefetch = 0 : i64, scratch_operands = 0 : i64, tpu.core_type = #tpu.core_type<tc>, window_params = [{pipeline_mode = #tpu.pipeline_mode<synchronous>, transform_indices = @transform_0, window_bounds = array<i64: 8, 8, 128>}, {pipeline_mode = #tpu.pipeline_mode<synchronous>, transform_indices = @transform_1, window_bounds = array<i64: 8, 8, 128>}, {pipeline_mode = #tpu.pipeline_mode<synchronous>, transform_indices = @transform_2, window_bounds = array<i64: 8, 1>}, {pipeline_mode = #tpu.pipeline_mode<synchronous>, transform_indices = @transform_3, window_bounds = array<i64: 8, 1>}, {pipeline_mode = #tpu.pipeline_mode<synchronous>, transform_indices = @transform_4, window_bounds = array<i64: 128, 384>}, {pipeline_mode = #tpu.pipeline_mode<synchronous>, transform_indices = @transform_5, window_bounds = array<i64: 128, 384>}, {pipeline_mode = #tpu.pipeline_mode<synchronous>, transform_indices = @transform_6, window_bounds = array<i64: 1, 384>}, {pipeline_mode = #tpu.pipeline_mode<synchronous>, transform_indices = @transform_7, window_bounds = array<i64: 1, 384>}, {pipeline_mode = #tpu.pipeline_mode<synchronous>, transform_indices = @transform_8, window_bounds = array<i64: 128, 384>}, {pipeline_mode = #tpu.pipeline_mode<synchronous>, transform_indices = @transform_9, window_bounds = array<i64: 128, 384>}, {pipeline_mode = #tpu.pipeline_mode<synchronous>, transform_indices = @transform_10, window_bounds = array<i64: 1, 384>}, {pipeline_mode = #tpu.pipeline_mode<synchronous>, transform_indices = @transform_11, window_bounds = array<i64: 1, 384>}, {pipeline_mode = #tpu.pipeline_mode<synchronous>, transform_indices = @transform_12, window_bounds = array<i64: 128, 128>}, {pipeline_mode = #tpu.pipeline_mode<synchronous>, transform_indices = @transform_13, window_bounds = array<i64: 8, 8>}]} {
    %c0 = arith.constant 0 : index
    %c0_0 = arith.constant 0 : index
    %c0_1 = arith.constant 0 : index
    %0 = vector.load %arg1[%c0, %c0_0, %c0_1] : memref<8x8x128xbf16, #tpu.memory_space<vmem>>, vector<8x8x128xbf16>
    %1 = vector.shape_cast %0 : vector<8x8x128xbf16> to vector<64x128xbf16>
    %c0_2 = arith.constant 0 : index
    %c0_3 = arith.constant 0 : index
    %2 = vector.load %arg5[%c0_2, %c0_3] : memref<128x384xbf16, #tpu.memory_space<vmem>>, vector<128x384xbf16>
    %cst = arith.constant dense<0.000000e+00> : vector<64x384xf32>
    %3 = tpu.matmul %1, %2, %cst {dimension_numbers = #tpu.dot_dimension_numbers<[1], [0], [0], [1], [0, 0, 1, 1], [], []>} : vector<64x128xbf16>, vector<128x384xbf16>, vector<64x384xf32> -> vector<64x384xf32>
    %c0_4 = arith.constant 0 : index
    %c0_5 = arith.constant 0 : index
    %4 = vector.load %arg7[%c0_4, %c0_5] : memref<1x384xf32, #tpu.memory_space<vmem>>, vector<1x384xf32>
    %5 = vector.broadcast %4 : vector<1x384xf32> to vector<64x384xf32>
    %6 = arith.addf %3, %5 : vector<64x384xf32>
    %c0_6 = arith.constant 0 : index
    %c0_7 = arith.constant 0 : index
    %c0_8 = arith.constant 0 : index
    %7 = vector.load %arg2[%c0_6, %c0_7, %c0_8] : memref<8x8x128xbf16, #tpu.memory_space<vmem>>, vector<8x8x128xbf16>
    %8 = vector.shape_cast %7 : vector<8x8x128xbf16> to vector<64x128xbf16>
    %c0_9 = arith.constant 0 : index
    %c0_10 = arith.constant 0 : index
    %9 = vector.load %arg9[%c0_9, %c0_10] : memref<128x384xbf16, #tpu.memory_space<vmem>>, vector<128x384xbf16>
    %cst_11 = arith.constant dense<0.000000e+00> : vector<64x384xf32>
    %10 = tpu.matmul %8, %9, %cst_11 {dimension_numbers = #tpu.dot_dimension_numbers<[1], [0], [0], [1], [0, 0, 1, 1], [], []>} : vector<64x128xbf16>, vector<128x384xbf16>, vector<64x384xf32> -> vector<64x384xf32>
    %c0_12 = arith.constant 0 : index
    %c0_13 = arith.constant 0 : index
    %11 = vector.load %arg11[%c0_12, %c0_13] : memref<1x384xf32, #tpu.memory_space<vmem>>, vector<1x384xf32>
    %12 = vector.broadcast %11 : vector<1x384xf32> to vector<64x384xf32>
    %13 = arith.addf %10, %12 : vector<64x384xf32>
    %c0_14 = arith.constant 0 : index
    %c0_15 = arith.constant 0 : index
    %14 = vector.load %arg3[%c0_14, %c0_15] : memref<8x1xi32, #tpu.memory_space<vmem>>, vector<8x1xi32>
    %c1_i32 = arith.constant 1 : i32
    %15 = vector.broadcast %c1_i32 : i32 to vector<8x1xi32>
    %16 = arith.subi %14, %15 : vector<8x1xi32>
    %c0_16 = arith.constant 0 : index
    %c0_17 = arith.constant 0 : index
    %17 = vector.load %arg4[%c0_16, %c0_17] : memref<8x1xi32, #tpu.memory_space<vmem>>, vector<8x1xi32>
    %c1_i32_18 = arith.constant 1 : i32
    %18 = vector.broadcast %c1_i32_18 : i32 to vector<8x1xi32>
    %19 = arith.subi %17, %18 : vector<8x1xi32>
    %c0_19 = arith.constant 0 : index
    %c0_20 = arith.constant 0 : index
    %20 = vector.load %arg6[%c0_19, %c0_20] : memref<128x384xbf16, #tpu.memory_space<vmem>>, vector<128x384xbf16>
    %c0_21 = arith.constant 0 : index
    %c0_22 = arith.constant 0 : index
    %21 = vector.load %arg10[%c0_21, %c0_22] : memref<128x384xbf16, #tpu.memory_space<vmem>>, vector<128x384xbf16>
    %c0_23 = arith.constant 0 : index
    %c0_24 = arith.constant 0 : index
    %22 = vector.load %arg8[%c0_23, %c0_24] : memref<1x384xf32, #tpu.memory_space<vmem>>, vector<1x384xf32>
    %c0_25 = arith.constant 0 : index
    %c0_26 = arith.constant 0 : index
    %23 = vector.load %arg12[%c0_25, %c0_26] : memref<1x384xf32, #tpu.memory_space<vmem>>, vector<1x384xf32>
    %cst_27 = arith.constant 0.000000e+00 : f32
    %24 = vector.broadcast %cst_27 : f32 to vector<8x128xf32>
    %cst_28 = arith.constant 0.000000e+00 : f32
    %25 = vector.broadcast %cst_28 : f32 to vector<8x128xf32>
    %cst_29 = arith.constant 0.000000e+00 : f32
    %26 = vector.broadcast %cst_29 : f32 to vector<8x128xf32>
    %cst_30 = arith.constant 0.000000e+00 : f32
    %27 = vector.broadcast %cst_30 : f32 to vector<8x128xf32>
    %28 = arith.truncf %24 : vector<8x128xf32> to vector<8x128xbf16>
    %cst_31 = arith.constant dense<0.000000e+00> : vector<8x384xf32>
    %29 = tpu.matmul %28, %20, %cst_31 {dimension_numbers = #tpu.dot_dimension_numbers<[1], [0], [0], [1], [0, 0, 1, 1], [], []>} : vector<8x128xbf16>, vector<128x384xbf16>, vector<8x384xf32> -> vector<8x384xf32>
    %30 = vector.broadcast %22 : vector<1x384xf32> to vector<8x384xf32>
    %31 = arith.addf %29, %30 : vector<8x384xf32>
    %32 = arith.truncf %25 : vector<8x128xf32> to vector<8x128xbf16>
    %cst_32 = arith.constant dense<0.000000e+00> : vector<8x384xf32>
    %33 = tpu.matmul %32, %21, %cst_32 {dimension_numbers = #tpu.dot_dimension_numbers<[1], [0], [0], [1], [0, 0, 1, 1], [], []>} : vector<8x128xbf16>, vector<128x384xbf16>, vector<8x384xf32> -> vector<8x384xf32>
    %34 = vector.broadcast %23 : vector<1x384xf32> to vector<8x384xf32>
    %35 = arith.addf %33, %34 : vector<8x384xf32>
    %36 = vector.extract_strided_slice %6 {offsets = [0, 0], sizes = [8, 384], strides = [1, 1]} : vector<64x384xf32> to vector<8x384xf32>
    %37 = vector.extract_strided_slice %13 {offsets = [0, 0], sizes = [8, 384], strides = [1, 1]} : vector<64x384xf32> to vector<8x384xf32>
    %38 = vector.extract_strided_slice %36 {offsets = [0, 0], sizes = [8, 128], strides = [1, 1]} : vector<8x384xf32> to vector<8x128xf32>
    %39 = vector.extract_strided_slice %31 {offsets = [0, 0], sizes = [8, 128], strides = [1, 1]} : vector<8x384xf32> to vector<8x128xf32>
    %40 = arith.addf %38, %39 : vector<8x128xf32>
    %41 = arith.negf %40 : vector<8x128xf32>
    %42 = math.exp %41 : vector<8x128xf32>
    %cst_33 = arith.constant 1.000000e+00 : f32
    %43 = vector.broadcast %cst_33 : f32 to vector<8x128xf32>
    %44 = arith.addf %43, %42 : vector<8x128xf32>
    %45 = arith.divf %43, %44 : vector<8x128xf32>
    %46 = vector.extract_strided_slice %36 {offsets = [0, 128], sizes = [8, 128], strides = [1, 1]} : vector<8x384xf32> to vector<8x128xf32>
    %47 = vector.extract_strided_slice %31 {offsets = [0, 128], sizes = [8, 128], strides = [1, 1]} : vector<8x384xf32> to vector<8x128xf32>
    %48 = arith.addf %46, %47 : vector<8x128xf32>
    %49 = arith.negf %48 : vector<8x128xf32>
    %50 = math.exp %49 : vector<8x128xf32>
    %cst_34 = arith.constant 1.000000e+00 : f32
    %51 = vector.broadcast %cst_34 : f32 to vector<8x128xf32>
    %52 = arith.addf %51, %50 : vector<8x128xf32>
    %53 = arith.divf %51, %52 : vector<8x128xf32>
    %54 = vector.extract_strided_slice %36 {offsets = [0, 256], sizes = [8, 128], strides = [1, 1]} : vector<8x384xf32> to vector<8x128xf32>
    %55 = vector.extract_strided_slice %31 {offsets = [0, 256], sizes = [8, 128], strides = [1, 1]} : vector<8x384xf32> to vector<8x128xf32>
    %56 = arith.mulf %45, %55 : vector<8x128xf32>
    %57 = arith.addf %54, %56 : vector<8x128xf32>
    %58 = math.tanh %57 : vector<8x128xf32>
    %cst_35 = arith.constant 1.000000e+00 : f32
    %59 = vector.broadcast %cst_35 : f32 to vector<8x128xf32>
    %60 = arith.subf %59, %53 : vector<8x128xf32>
    %61 = arith.mulf %60, %58 : vector<8x128xf32>
    %62 = arith.mulf %53, %24 : vector<8x128xf32>
    %63 = arith.addf %61, %62 : vector<8x128xf32>
    %64 = vector.extract_strided_slice %37 {offsets = [0, 0], sizes = [8, 128], strides = [1, 1]} : vector<8x384xf32> to vector<8x128xf32>
    %65 = vector.extract_strided_slice %35 {offsets = [0, 0], sizes = [8, 128], strides = [1, 1]} : vector<8x384xf32> to vector<8x128xf32>
    %66 = arith.addf %64, %65 : vector<8x128xf32>
    %67 = arith.negf %66 : vector<8x128xf32>
    %68 = math.exp %67 : vector<8x128xf32>
    %cst_36 = arith.constant 1.000000e+00 : f32
    %69 = vector.broadcast %cst_36 : f32 to vector<8x128xf32>
    %70 = arith.addf %69, %68 : vector<8x128xf32>
    %71 = arith.divf %69, %70 : vector<8x128xf32>
    %72 = vector.extract_strided_slice %37 {offsets = [0, 128], sizes = [8, 128], strides = [1, 1]} : vector<8x384xf32> to vector<8x128xf32>
    %73 = vector.extract_strided_slice %35 {offsets = [0, 128], sizes = [8, 128], strides = [1, 1]} : vector<8x384xf32> to vector<8x128xf32>
    %74 = arith.addf %72, %73 : vector<8x128xf32>
    %75 = arith.negf %74 : vector<8x128xf32>
    %76 = math.exp %75 : vector<8x128xf32>
    %cst_37 = arith.constant 1.000000e+00 : f32
    %77 = vector.broadcast %cst_37 : f32 to vector<8x128xf32>
    %78 = arith.addf %77, %76 : vector<8x128xf32>
    %79 = arith.divf %77, %78 : vector<8x128xf32>
    %80 = vector.extract_strided_slice %37 {offsets = [0, 256], sizes = [8, 128], strides = [1, 1]} : vector<8x384xf32> to vector<8x128xf32>
    %81 = vector.extract_strided_slice %35 {offsets = [0, 256], sizes = [8, 128], strides = [1, 1]} : vector<8x384xf32> to vector<8x128xf32>
    %82 = arith.mulf %71, %81 : vector<8x128xf32>
    %83 = arith.addf %80, %82 : vector<8x128xf32>
    %84 = math.tanh %83 : vector<8x128xf32>
    %cst_38 = arith.constant 1.000000e+00 : f32
    %85 = vector.broadcast %cst_38 : f32 to vector<8x128xf32>
    %86 = arith.subf %85, %79 : vector<8x128xf32>
    %87 = arith.mulf %86, %84 : vector<8x128xf32>
    %88 = arith.mulf %79, %25 : vector<8x128xf32>
    %89 = arith.addf %87, %88 : vector<8x128xf32>
    %c0_i32 = arith.constant 0 : i32
    %90 = vector.broadcast %c0_i32 : i32 to vector<8x1xi32>
    %91 = arith.cmpi eq, %16, %90 : vector<8x1xi32>
    %92 = vector.shape_cast %91 : vector<8x1xi1> to vector<8x1xi1>
    %93 = vector.broadcast %92 : vector<8x1xi1> to vector<8x128xi1>
    %94 = arith.select %93, %63, %26 : vector<8x128xi1>, vector<8x128xf32>
    %c0_i32_39 = arith.constant 0 : i32
    %95 = vector.broadcast %c0_i32_39 : i32 to vector<8x1xi32>
    %96 = arith.cmpi eq, %19, %95 : vector<8x1xi32>
    %97 = vector.shape_cast %96 : vector<8x1xi1> to vector<8x1xi1>
    %98 = vector.broadcast %97 : vector<8x1xi1> to vector<8x128xi1>
    %99 = arith.select %98, %89, %27 : vector<8x128xi1>, vector<8x128xf32>
    %100 = arith.truncf %63 : vector<8x128xf32> to vector<8x128xbf16>
    %cst_40 = arith.constant dense<0.000000e+00> : vector<8x384xf32>
    %101 = tpu.matmul %100, %20, %cst_40 {dimension_numbers = #tpu.dot_dimension_numbers<[1], [0], [0], [1], [0, 0, 1, 1], [], []>} : vector<8x128xbf16>, vector<128x384xbf16>, vector<8x384xf32> -> vector<8x384xf32>
    %102 = vector.broadcast %22 : vector<1x384xf32> to vector<8x384xf32>
    %103 = arith.addf %101, %102 : vector<8x384xf32>
    %104 = arith.truncf %89 : vector<8x128xf32> to vector<8x128xbf16>
    %cst_41 = arith.constant dense<0.000000e+00> : vector<8x384xf32>
    %105 = tpu.matmul %104, %21, %cst_41 {dimension_numbers = #tpu.dot_dimension_numbers<[1], [0], [0], [1], [0, 0, 1, 1], [], []>} : vector<8x128xbf16>, vector<128x384xbf16>, vector<8x384xf32> -> vector<8x384xf32>
    %106 = vector.broadcast %23 : vector<1x384xf32> to vector<8x384xf32>
    %107 = arith.addf %105, %106 : vector<8x384xf32>
    %108 = vector.extract_strided_slice %6 {offsets = [8, 0], sizes = [8, 384], strides = [1, 1]} : vector<64x384xf32> to vector<8x384xf32>
    %109 = vector.extract_strided_slice %13 {offsets = [8, 0], sizes = [8, 384], strides = [1, 1]} : vector<64x384xf32> to vector<8x384xf32>
    %110 = vector.extract_strided_slice %108 {offsets = [0, 0], sizes = [8, 128], strides = [1, 1]} : vector<8x384xf32> to vector<8x128xf32>
    %111 = vector.extract_strided_slice %103 {offsets = [0, 0], sizes = [8, 128], strides = [1, 1]} : vector<8x384xf32> to vector<8x128xf32>
    %112 = arith.addf %110, %111 : vector<8x128xf32>
    %113 = arith.negf %112 : vector<8x128xf32>
    %114 = math.exp %113 : vector<8x128xf32>
    %cst_42 = arith.constant 1.000000e+00 : f32
    %115 = vector.broadcast %cst_42 : f32 to vector<8x128xf32>
    %116 = arith.addf %115, %114 : vector<8x128xf32>
    %117 = arith.divf %115, %116 : vector<8x128xf32>
    %118 = vector.extract_strided_slice %108 {offsets = [0, 128], sizes = [8, 128], strides = [1, 1]} : vector<8x384xf32> to vector<8x128xf32>
    %119 = vector.extract_strided_slice %103 {offsets = [0, 128], sizes = [8, 128], strides = [1, 1]} : vector<8x384xf32> to vector<8x128xf32>
    %120 = arith.addf %118, %119 : vector<8x128xf32>
    %121 = arith.negf %120 : vector<8x128xf32>
    %122 = math.exp %121 : vector<8x128xf32>
    %cst_43 = arith.constant 1.000000e+00 : f32
    %123 = vector.broadcast %cst_43 : f32 to vector<8x128xf32>
    %124 = arith.addf %123, %122 : vector<8x128xf32>
    %125 = arith.divf %123, %124 : vector<8x128xf32>
    %126 = vector.extract_strided_slice %108 {offsets = [0, 256], sizes = [8, 128], strides = [1, 1]} : vector<8x384xf32> to vector<8x128xf32>
    %127 = vector.extract_strided_slice %103 {offsets = [0, 256], sizes = [8, 128], strides = [1, 1]} : vector<8x384xf32> to vector<8x128xf32>
    %128 = arith.mulf %117, %127 : vector<8x128xf32>
    %129 = arith.addf %126, %128 : vector<8x128xf32>
    %130 = math.tanh %129 : vector<8x128xf32>
    %cst_44 = arith.constant 1.000000e+00 : f32
    %131 = vector.broadcast %cst_44 : f32 to vector<8x128xf32>
    %132 = arith.subf %131, %125 : vector<8x128xf32>
    %133 = arith.mulf %132, %130 : vector<8x128xf32>
    %134 = arith.mulf %125, %63 : vector<8x128xf32>
    %135 = arith.addf %133, %134 : vector<8x128xf32>
    %136 = vector.extract_strided_slice %109 {offsets = [0, 0], sizes = [8, 128], strides = [1, 1]} : vector<8x384xf32> to vector<8x128xf32>
    %137 = vector.extract_strided_slice %107 {offsets = [0, 0], sizes = [8, 128], strides = [1, 1]} : vector<8x384xf32> to vector<8x128xf32>
    %138 = arith.addf %136, %137 : vector<8x128xf32>
    %139 = arith.negf %138 : vector<8x128xf32>
    %140 = math.exp %139 : vector<8x128xf32>
    %cst_45 = arith.constant 1.000000e+00 : f32
    %141 = vector.broadcast %cst_45 : f32 to vector<8x128xf32>
    %142 = arith.addf %141, %140 : vector<8x128xf32>
    %143 = arith.divf %141, %142 : vector<8x128xf32>
    %144 = vector.extract_strided_slice %109 {offsets = [0, 128], sizes = [8, 128], strides = [1, 1]} : vector<8x384xf32> to vector<8x128xf32>
    %145 = vector.extract_strided_slice %107 {offsets = [0, 128], sizes = [8, 128], strides = [1, 1]} : vector<8x384xf32> to vector<8x128xf32>
    %146 = arith.addf %144, %145 : vector<8x128xf32>
    %147 = arith.negf %146 : vector<8x128xf32>
    %148 = math.exp %147 : vector<8x128xf32>
    %cst_46 = arith.constant 1.000000e+00 : f32
    %149 = vector.broadcast %cst_46 : f32 to vector<8x128xf32>
    %150 = arith.addf %149, %148 : vector<8x128xf32>
    %151 = arith.divf %149, %150 : vector<8x128xf32>
    %152 = vector.extract_strided_slice %109 {offsets = [0, 256], sizes = [8, 128], strides = [1, 1]} : vector<8x384xf32> to vector<8x128xf32>
    %153 = vector.extract_strided_slice %107 {offsets = [0, 256], sizes = [8, 128], strides = [1, 1]} : vector<8x384xf32> to vector<8x128xf32>
    %154 = arith.mulf %143, %153 : vector<8x128xf32>
    %155 = arith.addf %152, %154 : vector<8x128xf32>
    %156 = math.tanh %155 : vector<8x128xf32>
    %cst_47 = arith.constant 1.000000e+00 : f32
    %157 = vector.broadcast %cst_47 : f32 to vector<8x128xf32>
    %158 = arith.subf %157, %151 : vector<8x128xf32>
    %159 = arith.mulf %158, %156 : vector<8x128xf32>
    %160 = arith.mulf %151, %89 : vector<8x128xf32>
    %161 = arith.addf %159, %160 : vector<8x128xf32>
    %c1_i32_48 = arith.constant 1 : i32
    %162 = vector.broadcast %c1_i32_48 : i32 to vector<8x1xi32>
    %163 = arith.cmpi eq, %16, %162 : vector<8x1xi32>
    %164 = vector.shape_cast %163 : vector<8x1xi1> to vector<8x1xi1>
    %165 = vector.broadcast %164 : vector<8x1xi1> to vector<8x128xi1>
    %166 = arith.select %165, %135, %94 : vector<8x128xi1>, vector<8x128xf32>
    %c1_i32_49 = arith.constant 1 : i32
    %167 = vector.broadcast %c1_i32_49 : i32 to vector<8x1xi32>
    %168 = arith.cmpi eq, %19, %167 : vector<8x1xi32>
    %169 = vector.shape_cast %168 : vector<8x1xi1> to vector<8x1xi1>
    %170 = vector.broadcast %169 : vector<8x1xi1> to vector<8x128xi1>
    %171 = arith.select %170, %161, %99 : vector<8x128xi1>, vector<8x128xf32>
    %172 = arith.truncf %135 : vector<8x128xf32> to vector<8x128xbf16>
    %cst_50 = arith.constant dense<0.000000e+00> : vector<8x384xf32>
    %173 = tpu.matmul %172, %20, %cst_50 {dimension_numbers = #tpu.dot_dimension_numbers<[1], [0], [0], [1], [0, 0, 1, 1], [], []>} : vector<8x128xbf16>, vector<128x384xbf16>, vector<8x384xf32> -> vector<8x384xf32>
    %174 = vector.broadcast %22 : vector<1x384xf32> to vector<8x384xf32>
    %175 = arith.addf %173, %174 : vector<8x384xf32>
    %176 = arith.truncf %161 : vector<8x128xf32> to vector<8x128xbf16>
    %cst_51 = arith.constant dense<0.000000e+00> : vector<8x384xf32>
    %177 = tpu.matmul %176, %21, %cst_51 {dimension_numbers = #tpu.dot_dimension_numbers<[1], [0], [0], [1], [0, 0, 1, 1], [], []>} : vector<8x128xbf16>, vector<128x384xbf16>, vector<8x384xf32> -> vector<8x384xf32>
    %178 = vector.broadcast %23 : vector<1x384xf32> to vector<8x384xf32>
    %179 = arith.addf %177, %178 : vector<8x384xf32>
    %180 = vector.extract_strided_slice %6 {offsets = [16, 0], sizes = [8, 384], strides = [1, 1]} : vector<64x384xf32> to vector<8x384xf32>
    %181 = vector.extract_strided_slice %13 {offsets = [16, 0], sizes = [8, 384], strides = [1, 1]} : vector<64x384xf32> to vector<8x384xf32>
    %182 = vector.extract_strided_slice %180 {offsets = [0, 0], sizes = [8, 128], strides = [1, 1]} : vector<8x384xf32> to vector<8x128xf32>
    %183 = vector.extract_strided_slice %175 {offsets = [0, 0], sizes = [8, 128], strides = [1, 1]} : vector<8x384xf32> to vector<8x128xf32>
    %184 = arith.addf %182, %183 : vector<8x128xf32>
    %185 = arith.negf %184 : vector<8x128xf32>
    %186 = math.exp %185 : vector<8x128xf32>
    %cst_52 = arith.constant 1.000000e+00 : f32
    %187 = vector.broadcast %cst_52 : f32 to vector<8x128xf32>
    %188 = arith.addf %187, %186 : vector<8x128xf32>
    %189 = arith.divf %187, %188 : vector<8x128xf32>
    %190 = vector.extract_strided_slice %180 {offsets = [0, 128], sizes = [8, 128], strides = [1, 1]} : vector<8x384xf32> to vector<8x128xf32>
    %191 = vector.extract_strided_slice %175 {offsets = [0, 128], sizes = [8, 128], strides = [1, 1]} : vector<8x384xf32> to vector<8x128xf32>
    %192 = arith.addf %190, %191 : vector<8x128xf32>
    %193 = arith.negf %192 : vector<8x128xf32>
    %194 = math.exp %193 : vector<8x128xf32>
    %cst_53 = arith.constant 1.000000e+00 : f32
    %195 = vector.broadcast %cst_53 : f32 to vector<8x128xf32>
    %196 = arith.addf %195, %194 : vector<8x128xf32>
    %197 = arith.divf %195, %196 : vector<8x128xf32>
    %198 = vector.extract_strided_slice %180 {offsets = [0, 256], sizes = [8, 128], strides = [1, 1]} : vector<8x384xf32> to vector<8x128xf32>
    %199 = vector.extract_strided_slice %175 {offsets = [0, 256], sizes = [8, 128], strides = [1, 1]} : vector<8x384xf32> to vector<8x128xf32>
    %200 = arith.mulf %189, %199 : vector<8x128xf32>
    %201 = arith.addf %198, %200 : vector<8x128xf32>
    %202 = math.tanh %201 : vector<8x128xf32>
    %cst_54 = arith.constant 1.000000e+00 : f32
    %203 = vector.broadcast %cst_54 : f32 to vector<8x128xf32>
    %204 = arith.subf %203, %197 : vector<8x128xf32>
    %205 = arith.mulf %204, %202 : vector<8x128xf32>
    %206 = arith.mulf %197, %135 : vector<8x128xf32>
    %207 = arith.addf %205, %206 : vector<8x128xf32>
    %208 = vector.extract_strided_slice %181 {offsets = [0, 0], sizes = [8, 128], strides = [1, 1]} : vector<8x384xf32> to vector<8x128xf32>
    %209 = vector.extract_strided_slice %179 {offsets = [0, 0], sizes = [8, 128], strides = [1, 1]} : vector<8x384xf32> to vector<8x128xf32>
    %210 = arith.addf %208, %209 : vector<8x128xf32>
    %211 = arith.negf %210 : vector<8x128xf32>
    %212 = math.exp %211 : vector<8x128xf32>
    %cst_55 = arith.constant 1.000000e+00 : f32
    %213 = vector.broadcast %cst_55 : f32 to vector<8x128xf32>
    %214 = arith.addf %213, %212 : vector<8x128xf32>
    %215 = arith.divf %213, %214 : vector<8x128xf32>
    %216 = vector.extract_strided_slice %181 {offsets = [0, 128], sizes = [8, 128], strides = [1, 1]} : vector<8x384xf32> to vector<8x128xf32>
    %217 = vector.extract_strided_slice %179 {offsets = [0, 128], sizes = [8, 128], strides = [1, 1]} : vector<8x384xf32> to vector<8x128xf32>
    %218 = arith.addf %216, %217 : vector<8x128xf32>
    %219 = arith.negf %218 : vector<8x128xf32>
    %220 = math.exp %219 : vector<8x128xf32>
    %cst_56 = arith.constant 1.000000e+00 : f32
    %221 = vector.broadcast %cst_56 : f32 to vector<8x128xf32>
    %222 = arith.addf %221, %220 : vector<8x128xf32>
    %223 = arith.divf %221, %222 : vector<8x128xf32>
    %224 = vector.extract_strided_slice %181 {offsets = [0, 256], sizes = [8, 128], strides = [1, 1]} : vector<8x384xf32> to vector<8x128xf32>
    %225 = vector.extract_strided_slice %179 {offsets = [0, 256], sizes = [8, 128], strides = [1, 1]} : vector<8x384xf32> to vector<8x128xf32>
    %226 = arith.mulf %215, %225 : vector<8x128xf32>
    %227 = arith.addf %224, %226 : vector<8x128xf32>
    %228 = math.tanh %227 : vector<8x128xf32>
    %cst_57 = arith.constant 1.000000e+00 : f32
    %229 = vector.broadcast %cst_57 : f32 to vector<8x128xf32>
    %230 = arith.subf %229, %223 : vector<8x128xf32>
    %231 = arith.mulf %230, %228 : vector<8x128xf32>
    %232 = arith.mulf %223, %161 : vector<8x128xf32>
    %233 = arith.addf %231, %232 : vector<8x128xf32>
    %c2_i32 = arith.constant 2 : i32
    %234 = vector.broadcast %c2_i32 : i32 to vector<8x1xi32>
    %235 = arith.cmpi eq, %16, %234 : vector<8x1xi32>
    %236 = vector.shape_cast %235 : vector<8x1xi1> to vector<8x1xi1>
    %237 = vector.broadcast %236 : vector<8x1xi1> to vector<8x128xi1>
    %238 = arith.select %237, %207, %166 : vector<8x128xi1>, vector<8x128xf32>
    %c2_i32_58 = arith.constant 2 : i32
    %239 = vector.broadcast %c2_i32_58 : i32 to vector<8x1xi32>
    %240 = arith.cmpi eq, %19, %239 : vector<8x1xi32>
    %241 = vector.shape_cast %240 : vector<8x1xi1> to vector<8x1xi1>
    %242 = vector.broadcast %241 : vector<8x1xi1> to vector<8x128xi1>
    %243 = arith.select %242, %233, %171 : vector<8x128xi1>, vector<8x128xf32>
    %244 = arith.truncf %207 : vector<8x128xf32> to vector<8x128xbf16>
    %cst_59 = arith.constant dense<0.000000e+00> : vector<8x384xf32>
    %245 = tpu.matmul %244, %20, %cst_59 {dimension_numbers = #tpu.dot_dimension_numbers<[1], [0], [0], [1], [0, 0, 1, 1], [], []>} : vector<8x128xbf16>, vector<128x384xbf16>, vector<8x384xf32> -> vector<8x384xf32>
    %246 = vector.broadcast %22 : vector<1x384xf32> to vector<8x384xf32>
    %247 = arith.addf %245, %246 : vector<8x384xf32>
    %248 = arith.truncf %233 : vector<8x128xf32> to vector<8x128xbf16>
    %cst_60 = arith.constant dense<0.000000e+00> : vector<8x384xf32>
    %249 = tpu.matmul %248, %21, %cst_60 {dimension_numbers = #tpu.dot_dimension_numbers<[1], [0], [0], [1], [0, 0, 1, 1], [], []>} : vector<8x128xbf16>, vector<128x384xbf16>, vector<8x384xf32> -> vector<8x384xf32>
    %250 = vector.broadcast %23 : vector<1x384xf32> to vector<8x384xf32>
    %251 = arith.addf %249, %250 : vector<8x384xf32>
    %252 = vector.extract_strided_slice %6 {offsets = [24, 0], sizes = [8, 384], strides = [1, 1]} : vector<64x384xf32> to vector<8x384xf32>
    %253 = vector.extract_strided_slice %13 {offsets = [24, 0], sizes = [8, 384], strides = [1, 1]} : vector<64x384xf32> to vector<8x384xf32>
    %254 = vector.extract_strided_slice %252 {offsets = [0, 0], sizes = [8, 128], strides = [1, 1]} : vector<8x384xf32> to vector<8x128xf32>
    %255 = vector.extract_strided_slice %247 {offsets = [0, 0], sizes = [8, 128], strides = [1, 1]} : vector<8x384xf32> to vector<8x128xf32>
    %256 = arith.addf %254, %255 : vector<8x128xf32>
    %257 = arith.negf %256 : vector<8x128xf32>
    %258 = math.exp %257 : vector<8x128xf32>
    %cst_61 = arith.constant 1.000000e+00 : f32
    %259 = vector.broadcast %cst_61 : f32 to vector<8x128xf32>
    %260 = arith.addf %259, %258 : vector<8x128xf32>
    %261 = arith.divf %259, %260 : vector<8x128xf32>
    %262 = vector.extract_strided_slice %252 {offsets = [0, 128], sizes = [8, 128], strides = [1, 1]} : vector<8x384xf32> to vector<8x128xf32>
    %263 = vector.extract_strided_slice %247 {offsets = [0, 128], sizes = [8, 128], strides = [1, 1]} : vector<8x384xf32> to vector<8x128xf32>
    %264 = arith.addf %262, %263 : vector<8x128xf32>
    %265 = arith.negf %264 : vector<8x128xf32>
    %266 = math.exp %265 : vector<8x128xf32>
    %cst_62 = arith.constant 1.000000e+00 : f32
    %267 = vector.broadcast %cst_62 : f32 to vector<8x128xf32>
    %268 = arith.addf %267, %266 : vector<8x128xf32>
    %269 = arith.divf %267, %268 : vector<8x128xf32>
    %270 = vector.extract_strided_slice %252 {offsets = [0, 256], sizes = [8, 128], strides = [1, 1]} : vector<8x384xf32> to vector<8x128xf32>
    %271 = vector.extract_strided_slice %247 {offsets = [0, 256], sizes = [8, 128], strides = [1, 1]} : vector<8x384xf32> to vector<8x128xf32>
    %272 = arith.mulf %261, %271 : vector<8x128xf32>
    %273 = arith.addf %270, %272 : vector<8x128xf32>
    %274 = math.tanh %273 : vector<8x128xf32>
    %cst_63 = arith.constant 1.000000e+00 : f32
    %275 = vector.broadcast %cst_63 : f32 to vector<8x128xf32>
    %276 = arith.subf %275, %269 : vector<8x128xf32>
    %277 = arith.mulf %276, %274 : vector<8x128xf32>
    %278 = arith.mulf %269, %207 : vector<8x128xf32>
    %279 = arith.addf %277, %278 : vector<8x128xf32>
    %280 = vector.extract_strided_slice %253 {offsets = [0, 0], sizes = [8, 128], strides = [1, 1]} : vector<8x384xf32> to vector<8x128xf32>
    %281 = vector.extract_strided_slice %251 {offsets = [0, 0], sizes = [8, 128], strides = [1, 1]} : vector<8x384xf32> to vector<8x128xf32>
    %282 = arith.addf %280, %281 : vector<8x128xf32>
    %283 = arith.negf %282 : vector<8x128xf32>
    %284 = math.exp %283 : vector<8x128xf32>
    %cst_64 = arith.constant 1.000000e+00 : f32
    %285 = vector.broadcast %cst_64 : f32 to vector<8x128xf32>
    %286 = arith.addf %285, %284 : vector<8x128xf32>
    %287 = arith.divf %285, %286 : vector<8x128xf32>
    %288 = vector.extract_strided_slice %253 {offsets = [0, 128], sizes = [8, 128], strides = [1, 1]} : vector<8x384xf32> to vector<8x128xf32>
    %289 = vector.extract_strided_slice %251 {offsets = [0, 128], sizes = [8, 128], strides = [1, 1]} : vector<8x384xf32> to vector<8x128xf32>
    %290 = arith.addf %288, %289 : vector<8x128xf32>
    %291 = arith.negf %290 : vector<8x128xf32>
    %292 = math.exp %291 : vector<8x128xf32>
    %cst_65 = arith.constant 1.000000e+00 : f32
    %293 = vector.broadcast %cst_65 : f32 to vector<8x128xf32>
    %294 = arith.addf %293, %292 : vector<8x128xf32>
    %295 = arith.divf %293, %294 : vector<8x128xf32>
    %296 = vector.extract_strided_slice %253 {offsets = [0, 256], sizes = [8, 128], strides = [1, 1]} : vector<8x384xf32> to vector<8x128xf32>
    %297 = vector.extract_strided_slice %251 {offsets = [0, 256], sizes = [8, 128], strides = [1, 1]} : vector<8x384xf32> to vector<8x128xf32>
    %298 = arith.mulf %287, %297 : vector<8x128xf32>
    %299 = arith.addf %296, %298 : vector<8x128xf32>
    %300 = math.tanh %299 : vector<8x128xf32>
    %cst_66 = arith.constant 1.000000e+00 : f32
    %301 = vector.broadcast %cst_66 : f32 to vector<8x128xf32>
    %302 = arith.subf %301, %295 : vector<8x128xf32>
    %303 = arith.mulf %302, %300 : vector<8x128xf32>
    %304 = arith.mulf %295, %233 : vector<8x128xf32>
    %305 = arith.addf %303, %304 : vector<8x128xf32>
    %c3_i32 = arith.constant 3 : i32
    %306 = vector.broadcast %c3_i32 : i32 to vector<8x1xi32>
    %307 = arith.cmpi eq, %16, %306 : vector<8x1xi32>
    %308 = vector.shape_cast %307 : vector<8x1xi1> to vector<8x1xi1>
    %309 = vector.broadcast %308 : vector<8x1xi1> to vector<8x128xi1>
    %310 = arith.select %309, %279, %238 : vector<8x128xi1>, vector<8x128xf32>
    %c3_i32_67 = arith.constant 3 : i32
    %311 = vector.broadcast %c3_i32_67 : i32 to vector<8x1xi32>
    %312 = arith.cmpi eq, %19, %311 : vector<8x1xi32>
    %313 = vector.shape_cast %312 : vector<8x1xi1> to vector<8x1xi1>
    %314 = vector.broadcast %313 : vector<8x1xi1> to vector<8x128xi1>
    %315 = arith.select %314, %305, %243 : vector<8x128xi1>, vector<8x128xf32>
    %316 = arith.truncf %279 : vector<8x128xf32> to vector<8x128xbf16>
    %cst_68 = arith.constant dense<0.000000e+00> : vector<8x384xf32>
    %317 = tpu.matmul %316, %20, %cst_68 {dimension_numbers = #tpu.dot_dimension_numbers<[1], [0], [0], [1], [0, 0, 1, 1], [], []>} : vector<8x128xbf16>, vector<128x384xbf16>, vector<8x384xf32> -> vector<8x384xf32>
    %318 = vector.broadcast %22 : vector<1x384xf32> to vector<8x384xf32>
    %319 = arith.addf %317, %318 : vector<8x384xf32>
    %320 = arith.truncf %305 : vector<8x128xf32> to vector<8x128xbf16>
    %cst_69 = arith.constant dense<0.000000e+00> : vector<8x384xf32>
    %321 = tpu.matmul %320, %21, %cst_69 {dimension_numbers = #tpu.dot_dimension_numbers<[1], [0], [0], [1], [0, 0, 1, 1], [], []>} : vector<8x128xbf16>, vector<128x384xbf16>, vector<8x384xf32> -> vector<8x384xf32>
    %322 = vector.broadcast %23 : vector<1x384xf32> to vector<8x384xf32>
    %323 = arith.addf %321, %322 : vector<8x384xf32>
    %324 = vector.extract_strided_slice %6 {offsets = [32, 0], sizes = [8, 384], strides = [1, 1]} : vector<64x384xf32> to vector<8x384xf32>
    %325 = vector.extract_strided_slice %13 {offsets = [32, 0], sizes = [8, 384], strides = [1, 1]} : vector<64x384xf32> to vector<8x384xf32>
    %326 = vector.extract_strided_slice %324 {offsets = [0, 0], sizes = [8, 128], strides = [1, 1]} : vector<8x384xf32> to vector<8x128xf32>
    %327 = vector.extract_strided_slice %319 {offsets = [0, 0], sizes = [8, 128], strides = [1, 1]} : vector<8x384xf32> to vector<8x128xf32>
    %328 = arith.addf %326, %327 : vector<8x128xf32>
    %329 = arith.negf %328 : vector<8x128xf32>
    %330 = math.exp %329 : vector<8x128xf32>
    %cst_70 = arith.constant 1.000000e+00 : f32
    %331 = vector.broadcast %cst_70 : f32 to vector<8x128xf32>
    %332 = arith.addf %331, %330 : vector<8x128xf32>
    %333 = arith.divf %331, %332 : vector<8x128xf32>
    %334 = vector.extract_strided_slice %324 {offsets = [0, 128], sizes = [8, 128], strides = [1, 1]} : vector<8x384xf32> to vector<8x128xf32>
    %335 = vector.extract_strided_slice %319 {offsets = [0, 128], sizes = [8, 128], strides = [1, 1]} : vector<8x384xf32> to vector<8x128xf32>
    %336 = arith.addf %334, %335 : vector<8x128xf32>
    %337 = arith.negf %336 : vector<8x128xf32>
    %338 = math.exp %337 : vector<8x128xf32>
    %cst_71 = arith.constant 1.000000e+00 : f32
    %339 = vector.broadcast %cst_71 : f32 to vector<8x128xf32>
    %340 = arith.addf %339, %338 : vector<8x128xf32>
    %341 = arith.divf %339, %340 : vector<8x128xf32>
    %342 = vector.extract_strided_slice %324 {offsets = [0, 256], sizes = [8, 128], strides = [1, 1]} : vector<8x384xf32> to vector<8x128xf32>
    %343 = vector.extract_strided_slice %319 {offsets = [0, 256], sizes = [8, 128], strides = [1, 1]} : vector<8x384xf32> to vector<8x128xf32>
    %344 = arith.mulf %333, %343 : vector<8x128xf32>
    %345 = arith.addf %342, %344 : vector<8x128xf32>
    %346 = math.tanh %345 : vector<8x128xf32>
    %cst_72 = arith.constant 1.000000e+00 : f32
    %347 = vector.broadcast %cst_72 : f32 to vector<8x128xf32>
    %348 = arith.subf %347, %341 : vector<8x128xf32>
    %349 = arith.mulf %348, %346 : vector<8x128xf32>
    %350 = arith.mulf %341, %279 : vector<8x128xf32>
    %351 = arith.addf %349, %350 : vector<8x128xf32>
    %352 = vector.extract_strided_slice %325 {offsets = [0, 0], sizes = [8, 128], strides = [1, 1]} : vector<8x384xf32> to vector<8x128xf32>
    %353 = vector.extract_strided_slice %323 {offsets = [0, 0], sizes = [8, 128], strides = [1, 1]} : vector<8x384xf32> to vector<8x128xf32>
    %354 = arith.addf %352, %353 : vector<8x128xf32>
    %355 = arith.negf %354 : vector<8x128xf32>
    %356 = math.exp %355 : vector<8x128xf32>
    %cst_73 = arith.constant 1.000000e+00 : f32
    %357 = vector.broadcast %cst_73 : f32 to vector<8x128xf32>
    %358 = arith.addf %357, %356 : vector<8x128xf32>
    %359 = arith.divf %357, %358 : vector<8x128xf32>
    %360 = vector.extract_strided_slice %325 {offsets = [0, 128], sizes = [8, 128], strides = [1, 1]} : vector<8x384xf32> to vector<8x128xf32>
    %361 = vector.extract_strided_slice %323 {offsets = [0, 128], sizes = [8, 128], strides = [1, 1]} : vector<8x384xf32> to vector<8x128xf32>
    %362 = arith.addf %360, %361 : vector<8x128xf32>
    %363 = arith.negf %362 : vector<8x128xf32>
    %364 = math.exp %363 : vector<8x128xf32>
    %cst_74 = arith.constant 1.000000e+00 : f32
    %365 = vector.broadcast %cst_74 : f32 to vector<8x128xf32>
    %366 = arith.addf %365, %364 : vector<8x128xf32>
    %367 = arith.divf %365, %366 : vector<8x128xf32>
    %368 = vector.extract_strided_slice %325 {offsets = [0, 256], sizes = [8, 128], strides = [1, 1]} : vector<8x384xf32> to vector<8x128xf32>
    %369 = vector.extract_strided_slice %323 {offsets = [0, 256], sizes = [8, 128], strides = [1, 1]} : vector<8x384xf32> to vector<8x128xf32>
    %370 = arith.mulf %359, %369 : vector<8x128xf32>
    %371 = arith.addf %368, %370 : vector<8x128xf32>
    %372 = math.tanh %371 : vector<8x128xf32>
    %cst_75 = arith.constant 1.000000e+00 : f32
    %373 = vector.broadcast %cst_75 : f32 to vector<8x128xf32>
    %374 = arith.subf %373, %367 : vector<8x128xf32>
    %375 = arith.mulf %374, %372 : vector<8x128xf32>
    %376 = arith.mulf %367, %305 : vector<8x128xf32>
    %377 = arith.addf %375, %376 : vector<8x128xf32>
    %c4_i32 = arith.constant 4 : i32
    %378 = vector.broadcast %c4_i32 : i32 to vector<8x1xi32>
    %379 = arith.cmpi eq, %16, %378 : vector<8x1xi32>
    %380 = vector.shape_cast %379 : vector<8x1xi1> to vector<8x1xi1>
    %381 = vector.broadcast %380 : vector<8x1xi1> to vector<8x128xi1>
    %382 = arith.select %381, %351, %310 : vector<8x128xi1>, vector<8x128xf32>
    %c4_i32_76 = arith.constant 4 : i32
    %383 = vector.broadcast %c4_i32_76 : i32 to vector<8x1xi32>
    %384 = arith.cmpi eq, %19, %383 : vector<8x1xi32>
    %385 = vector.shape_cast %384 : vector<8x1xi1> to vector<8x1xi1>
    %386 = vector.broadcast %385 : vector<8x1xi1> to vector<8x128xi1>
    %387 = arith.select %386, %377, %315 : vector<8x128xi1>, vector<8x128xf32>
    %388 = arith.truncf %351 : vector<8x128xf32> to vector<8x128xbf16>
    %cst_77 = arith.constant dense<0.000000e+00> : vector<8x384xf32>
    %389 = tpu.matmul %388, %20, %cst_77 {dimension_numbers = #tpu.dot_dimension_numbers<[1], [0], [0], [1], [0, 0, 1, 1], [], []>} : vector<8x128xbf16>, vector<128x384xbf16>, vector<8x384xf32> -> vector<8x384xf32>
    %390 = vector.broadcast %22 : vector<1x384xf32> to vector<8x384xf32>
    %391 = arith.addf %389, %390 : vector<8x384xf32>
    %392 = arith.truncf %377 : vector<8x128xf32> to vector<8x128xbf16>
    %cst_78 = arith.constant dense<0.000000e+00> : vector<8x384xf32>
    %393 = tpu.matmul %392, %21, %cst_78 {dimension_numbers = #tpu.dot_dimension_numbers<[1], [0], [0], [1], [0, 0, 1, 1], [], []>} : vector<8x128xbf16>, vector<128x384xbf16>, vector<8x384xf32> -> vector<8x384xf32>
    %394 = vector.broadcast %23 : vector<1x384xf32> to vector<8x384xf32>
    %395 = arith.addf %393, %394 : vector<8x384xf32>
    %396 = vector.extract_strided_slice %6 {offsets = [40, 0], sizes = [8, 384], strides = [1, 1]} : vector<64x384xf32> to vector<8x384xf32>
    %397 = vector.extract_strided_slice %13 {offsets = [40, 0], sizes = [8, 384], strides = [1, 1]} : vector<64x384xf32> to vector<8x384xf32>
    %398 = vector.extract_strided_slice %396 {offsets = [0, 0], sizes = [8, 128], strides = [1, 1]} : vector<8x384xf32> to vector<8x128xf32>
    %399 = vector.extract_strided_slice %391 {offsets = [0, 0], sizes = [8, 128], strides = [1, 1]} : vector<8x384xf32> to vector<8x128xf32>
    %400 = arith.addf %398, %399 : vector<8x128xf32>
    %401 = arith.negf %400 : vector<8x128xf32>
    %402 = math.exp %401 : vector<8x128xf32>
    %cst_79 = arith.constant 1.000000e+00 : f32
    %403 = vector.broadcast %cst_79 : f32 to vector<8x128xf32>
    %404 = arith.addf %403, %402 : vector<8x128xf32>
    %405 = arith.divf %403, %404 : vector<8x128xf32>
    %406 = vector.extract_strided_slice %396 {offsets = [0, 128], sizes = [8, 128], strides = [1, 1]} : vector<8x384xf32> to vector<8x128xf32>
    %407 = vector.extract_strided_slice %391 {offsets = [0, 128], sizes = [8, 128], strides = [1, 1]} : vector<8x384xf32> to vector<8x128xf32>
    %408 = arith.addf %406, %407 : vector<8x128xf32>
    %409 = arith.negf %408 : vector<8x128xf32>
    %410 = math.exp %409 : vector<8x128xf32>
    %cst_80 = arith.constant 1.000000e+00 : f32
    %411 = vector.broadcast %cst_80 : f32 to vector<8x128xf32>
    %412 = arith.addf %411, %410 : vector<8x128xf32>
    %413 = arith.divf %411, %412 : vector<8x128xf32>
    %414 = vector.extract_strided_slice %396 {offsets = [0, 256], sizes = [8, 128], strides = [1, 1]} : vector<8x384xf32> to vector<8x128xf32>
    %415 = vector.extract_strided_slice %391 {offsets = [0, 256], sizes = [8, 128], strides = [1, 1]} : vector<8x384xf32> to vector<8x128xf32>
    %416 = arith.mulf %405, %415 : vector<8x128xf32>
    %417 = arith.addf %414, %416 : vector<8x128xf32>
    %418 = math.tanh %417 : vector<8x128xf32>
    %cst_81 = arith.constant 1.000000e+00 : f32
    %419 = vector.broadcast %cst_81 : f32 to vector<8x128xf32>
    %420 = arith.subf %419, %413 : vector<8x128xf32>
    %421 = arith.mulf %420, %418 : vector<8x128xf32>
    %422 = arith.mulf %413, %351 : vector<8x128xf32>
    %423 = arith.addf %421, %422 : vector<8x128xf32>
    %424 = vector.extract_strided_slice %397 {offsets = [0, 0], sizes = [8, 128], strides = [1, 1]} : vector<8x384xf32> to vector<8x128xf32>
    %425 = vector.extract_strided_slice %395 {offsets = [0, 0], sizes = [8, 128], strides = [1, 1]} : vector<8x384xf32> to vector<8x128xf32>
    %426 = arith.addf %424, %425 : vector<8x128xf32>
    %427 = arith.negf %426 : vector<8x128xf32>
    %428 = math.exp %427 : vector<8x128xf32>
    %cst_82 = arith.constant 1.000000e+00 : f32
    %429 = vector.broadcast %cst_82 : f32 to vector<8x128xf32>
    %430 = arith.addf %429, %428 : vector<8x128xf32>
    %431 = arith.divf %429, %430 : vector<8x128xf32>
    %432 = vector.extract_strided_slice %397 {offsets = [0, 128], sizes = [8, 128], strides = [1, 1]} : vector<8x384xf32> to vector<8x128xf32>
    %433 = vector.extract_strided_slice %395 {offsets = [0, 128], sizes = [8, 128], strides = [1, 1]} : vector<8x384xf32> to vector<8x128xf32>
    %434 = arith.addf %432, %433 : vector<8x128xf32>
    %435 = arith.negf %434 : vector<8x128xf32>
    %436 = math.exp %435 : vector<8x128xf32>
    %cst_83 = arith.constant 1.000000e+00 : f32
    %437 = vector.broadcast %cst_83 : f32 to vector<8x128xf32>
    %438 = arith.addf %437, %436 : vector<8x128xf32>
    %439 = arith.divf %437, %438 : vector<8x128xf32>
    %440 = vector.extract_strided_slice %397 {offsets = [0, 256], sizes = [8, 128], strides = [1, 1]} : vector<8x384xf32> to vector<8x128xf32>
    %441 = vector.extract_strided_slice %395 {offsets = [0, 256], sizes = [8, 128], strides = [1, 1]} : vector<8x384xf32> to vector<8x128xf32>
    %442 = arith.mulf %431, %441 : vector<8x128xf32>
    %443 = arith.addf %440, %442 : vector<8x128xf32>
    %444 = math.tanh %443 : vector<8x128xf32>
    %cst_84 = arith.constant 1.000000e+00 : f32
    %445 = vector.broadcast %cst_84 : f32 to vector<8x128xf32>
    %446 = arith.subf %445, %439 : vector<8x128xf32>
    %447 = arith.mulf %446, %444 : vector<8x128xf32>
    %448 = arith.mulf %439, %377 : vector<8x128xf32>
    %449 = arith.addf %447, %448 : vector<8x128xf32>
    %c5_i32 = arith.constant 5 : i32
    %450 = vector.broadcast %c5_i32 : i32 to vector<8x1xi32>
    %451 = arith.cmpi eq, %16, %450 : vector<8x1xi32>
    %452 = vector.shape_cast %451 : vector<8x1xi1> to vector<8x1xi1>
    %453 = vector.broadcast %452 : vector<8x1xi1> to vector<8x128xi1>
    %454 = arith.select %453, %423, %382 : vector<8x128xi1>, vector<8x128xf32>
    %c5_i32_85 = arith.constant 5 : i32
    %455 = vector.broadcast %c5_i32_85 : i32 to vector<8x1xi32>
    %456 = arith.cmpi eq, %19, %455 : vector<8x1xi32>
    %457 = vector.shape_cast %456 : vector<8x1xi1> to vector<8x1xi1>
    %458 = vector.broadcast %457 : vector<8x1xi1> to vector<8x128xi1>
    %459 = arith.select %458, %449, %387 : vector<8x128xi1>, vector<8x128xf32>
    %460 = arith.truncf %423 : vector<8x128xf32> to vector<8x128xbf16>
    %cst_86 = arith.constant dense<0.000000e+00> : vector<8x384xf32>
    %461 = tpu.matmul %460, %20, %cst_86 {dimension_numbers = #tpu.dot_dimension_numbers<[1], [0], [0], [1], [0, 0, 1, 1], [], []>} : vector<8x128xbf16>, vector<128x384xbf16>, vector<8x384xf32> -> vector<8x384xf32>
    %462 = vector.broadcast %22 : vector<1x384xf32> to vector<8x384xf32>
    %463 = arith.addf %461, %462 : vector<8x384xf32>
    %464 = arith.truncf %449 : vector<8x128xf32> to vector<8x128xbf16>
    %cst_87 = arith.constant dense<0.000000e+00> : vector<8x384xf32>
    %465 = tpu.matmul %464, %21, %cst_87 {dimension_numbers = #tpu.dot_dimension_numbers<[1], [0], [0], [1], [0, 0, 1, 1], [], []>} : vector<8x128xbf16>, vector<128x384xbf16>, vector<8x384xf32> -> vector<8x384xf32>
    %466 = vector.broadcast %23 : vector<1x384xf32> to vector<8x384xf32>
    %467 = arith.addf %465, %466 : vector<8x384xf32>
    %468 = vector.extract_strided_slice %6 {offsets = [48, 0], sizes = [8, 384], strides = [1, 1]} : vector<64x384xf32> to vector<8x384xf32>
    %469 = vector.extract_strided_slice %13 {offsets = [48, 0], sizes = [8, 384], strides = [1, 1]} : vector<64x384xf32> to vector<8x384xf32>
    %470 = vector.extract_strided_slice %468 {offsets = [0, 0], sizes = [8, 128], strides = [1, 1]} : vector<8x384xf32> to vector<8x128xf32>
    %471 = vector.extract_strided_slice %463 {offsets = [0, 0], sizes = [8, 128], strides = [1, 1]} : vector<8x384xf32> to vector<8x128xf32>
    %472 = arith.addf %470, %471 : vector<8x128xf32>
    %473 = arith.negf %472 : vector<8x128xf32>
    %474 = math.exp %473 : vector<8x128xf32>
    %cst_88 = arith.constant 1.000000e+00 : f32
    %475 = vector.broadcast %cst_88 : f32 to vector<8x128xf32>
    %476 = arith.addf %475, %474 : vector<8x128xf32>
    %477 = arith.divf %475, %476 : vector<8x128xf32>
    %478 = vector.extract_strided_slice %468 {offsets = [0, 128], sizes = [8, 128], strides = [1, 1]} : vector<8x384xf32> to vector<8x128xf32>
    %479 = vector.extract_strided_slice %463 {offsets = [0, 128], sizes = [8, 128], strides = [1, 1]} : vector<8x384xf32> to vector<8x128xf32>
    %480 = arith.addf %478, %479 : vector<8x128xf32>
    %481 = arith.negf %480 : vector<8x128xf32>
    %482 = math.exp %481 : vector<8x128xf32>
    %cst_89 = arith.constant 1.000000e+00 : f32
    %483 = vector.broadcast %cst_89 : f32 to vector<8x128xf32>
    %484 = arith.addf %483, %482 : vector<8x128xf32>
    %485 = arith.divf %483, %484 : vector<8x128xf32>
    %486 = vector.extract_strided_slice %468 {offsets = [0, 256], sizes = [8, 128], strides = [1, 1]} : vector<8x384xf32> to vector<8x128xf32>
    %487 = vector.extract_strided_slice %463 {offsets = [0, 256], sizes = [8, 128], strides = [1, 1]} : vector<8x384xf32> to vector<8x128xf32>
    %488 = arith.mulf %477, %487 : vector<8x128xf32>
    %489 = arith.addf %486, %488 : vector<8x128xf32>
    %490 = math.tanh %489 : vector<8x128xf32>
    %cst_90 = arith.constant 1.000000e+00 : f32
    %491 = vector.broadcast %cst_90 : f32 to vector<8x128xf32>
    %492 = arith.subf %491, %485 : vector<8x128xf32>
    %493 = arith.mulf %492, %490 : vector<8x128xf32>
    %494 = arith.mulf %485, %423 : vector<8x128xf32>
    %495 = arith.addf %493, %494 : vector<8x128xf32>
    %496 = vector.extract_strided_slice %469 {offsets = [0, 0], sizes = [8, 128], strides = [1, 1]} : vector<8x384xf32> to vector<8x128xf32>
    %497 = vector.extract_strided_slice %467 {offsets = [0, 0], sizes = [8, 128], strides = [1, 1]} : vector<8x384xf32> to vector<8x128xf32>
    %498 = arith.addf %496, %497 : vector<8x128xf32>
    %499 = arith.negf %498 : vector<8x128xf32>
    %500 = math.exp %499 : vector<8x128xf32>
    %cst_91 = arith.constant 1.000000e+00 : f32
    %501 = vector.broadcast %cst_91 : f32 to vector<8x128xf32>
    %502 = arith.addf %501, %500 : vector<8x128xf32>
    %503 = arith.divf %501, %502 : vector<8x128xf32>
    %504 = vector.extract_strided_slice %469 {offsets = [0, 128], sizes = [8, 128], strides = [1, 1]} : vector<8x384xf32> to vector<8x128xf32>
    %505 = vector.extract_strided_slice %467 {offsets = [0, 128], sizes = [8, 128], strides = [1, 1]} : vector<8x384xf32> to vector<8x128xf32>
    %506 = arith.addf %504, %505 : vector<8x128xf32>
    %507 = arith.negf %506 : vector<8x128xf32>
    %508 = math.exp %507 : vector<8x128xf32>
    %cst_92 = arith.constant 1.000000e+00 : f32
    %509 = vector.broadcast %cst_92 : f32 to vector<8x128xf32>
    %510 = arith.addf %509, %508 : vector<8x128xf32>
    %511 = arith.divf %509, %510 : vector<8x128xf32>
    %512 = vector.extract_strided_slice %469 {offsets = [0, 256], sizes = [8, 128], strides = [1, 1]} : vector<8x384xf32> to vector<8x128xf32>
    %513 = vector.extract_strided_slice %467 {offsets = [0, 256], sizes = [8, 128], strides = [1, 1]} : vector<8x384xf32> to vector<8x128xf32>
    %514 = arith.mulf %503, %513 : vector<8x128xf32>
    %515 = arith.addf %512, %514 : vector<8x128xf32>
    %516 = math.tanh %515 : vector<8x128xf32>
    %cst_93 = arith.constant 1.000000e+00 : f32
    %517 = vector.broadcast %cst_93 : f32 to vector<8x128xf32>
    %518 = arith.subf %517, %511 : vector<8x128xf32>
    %519 = arith.mulf %518, %516 : vector<8x128xf32>
    %520 = arith.mulf %511, %449 : vector<8x128xf32>
    %521 = arith.addf %519, %520 : vector<8x128xf32>
    %c6_i32 = arith.constant 6 : i32
    %522 = vector.broadcast %c6_i32 : i32 to vector<8x1xi32>
    %523 = arith.cmpi eq, %16, %522 : vector<8x1xi32>
    %524 = vector.shape_cast %523 : vector<8x1xi1> to vector<8x1xi1>
    %525 = vector.broadcast %524 : vector<8x1xi1> to vector<8x128xi1>
    %526 = arith.select %525, %495, %454 : vector<8x128xi1>, vector<8x128xf32>
    %c6_i32_94 = arith.constant 6 : i32
    %527 = vector.broadcast %c6_i32_94 : i32 to vector<8x1xi32>
    %528 = arith.cmpi eq, %19, %527 : vector<8x1xi32>
    %529 = vector.shape_cast %528 : vector<8x1xi1> to vector<8x1xi1>
    %530 = vector.broadcast %529 : vector<8x1xi1> to vector<8x128xi1>
    %531 = arith.select %530, %521, %459 : vector<8x128xi1>, vector<8x128xf32>
    %532 = arith.truncf %495 : vector<8x128xf32> to vector<8x128xbf16>
    %cst_95 = arith.constant dense<0.000000e+00> : vector<8x384xf32>
    %533 = tpu.matmul %532, %20, %cst_95 {dimension_numbers = #tpu.dot_dimension_numbers<[1], [0], [0], [1], [0, 0, 1, 1], [], []>} : vector<8x128xbf16>, vector<128x384xbf16>, vector<8x384xf32> -> vector<8x384xf32>
    %534 = vector.broadcast %22 : vector<1x384xf32> to vector<8x384xf32>
    %535 = arith.addf %533, %534 : vector<8x384xf32>
    %536 = arith.truncf %521 : vector<8x128xf32> to vector<8x128xbf16>
    %cst_96 = arith.constant dense<0.000000e+00> : vector<8x384xf32>
    %537 = tpu.matmul %536, %21, %cst_96 {dimension_numbers = #tpu.dot_dimension_numbers<[1], [0], [0], [1], [0, 0, 1, 1], [], []>} : vector<8x128xbf16>, vector<128x384xbf16>, vector<8x384xf32> -> vector<8x384xf32>
    %538 = vector.broadcast %23 : vector<1x384xf32> to vector<8x384xf32>
    %539 = arith.addf %537, %538 : vector<8x384xf32>
    %540 = vector.extract_strided_slice %6 {offsets = [56, 0], sizes = [8, 384], strides = [1, 1]} : vector<64x384xf32> to vector<8x384xf32>
    %541 = vector.extract_strided_slice %13 {offsets = [56, 0], sizes = [8, 384], strides = [1, 1]} : vector<64x384xf32> to vector<8x384xf32>
    %542 = vector.extract_strided_slice %540 {offsets = [0, 0], sizes = [8, 128], strides = [1, 1]} : vector<8x384xf32> to vector<8x128xf32>
    %543 = vector.extract_strided_slice %535 {offsets = [0, 0], sizes = [8, 128], strides = [1, 1]} : vector<8x384xf32> to vector<8x128xf32>
    %544 = arith.addf %542, %543 : vector<8x128xf32>
    %545 = arith.negf %544 : vector<8x128xf32>
    %546 = math.exp %545 : vector<8x128xf32>
    %cst_97 = arith.constant 1.000000e+00 : f32
    %547 = vector.broadcast %cst_97 : f32 to vector<8x128xf32>
    %548 = arith.addf %547, %546 : vector<8x128xf32>
    %549 = arith.divf %547, %548 : vector<8x128xf32>
    %550 = vector.extract_strided_slice %540 {offsets = [0, 128], sizes = [8, 128], strides = [1, 1]} : vector<8x384xf32> to vector<8x128xf32>
    %551 = vector.extract_strided_slice %535 {offsets = [0, 128], sizes = [8, 128], strides = [1, 1]} : vector<8x384xf32> to vector<8x128xf32>
    %552 = arith.addf %550, %551 : vector<8x128xf32>
    %553 = arith.negf %552 : vector<8x128xf32>
    %554 = math.exp %553 : vector<8x128xf32>
    %cst_98 = arith.constant 1.000000e+00 : f32
    %555 = vector.broadcast %cst_98 : f32 to vector<8x128xf32>
    %556 = arith.addf %555, %554 : vector<8x128xf32>
    %557 = arith.divf %555, %556 : vector<8x128xf32>
    %558 = vector.extract_strided_slice %540 {offsets = [0, 256], sizes = [8, 128], strides = [1, 1]} : vector<8x384xf32> to vector<8x128xf32>
    %559 = vector.extract_strided_slice %535 {offsets = [0, 256], sizes = [8, 128], strides = [1, 1]} : vector<8x384xf32> to vector<8x128xf32>
    %560 = arith.mulf %549, %559 : vector<8x128xf32>
    %561 = arith.addf %558, %560 : vector<8x128xf32>
    %562 = math.tanh %561 : vector<8x128xf32>
    %cst_99 = arith.constant 1.000000e+00 : f32
    %563 = vector.broadcast %cst_99 : f32 to vector<8x128xf32>
    %564 = arith.subf %563, %557 : vector<8x128xf32>
    %565 = arith.mulf %564, %562 : vector<8x128xf32>
    %566 = arith.mulf %557, %495 : vector<8x128xf32>
    %567 = arith.addf %565, %566 : vector<8x128xf32>
    %568 = vector.extract_strided_slice %541 {offsets = [0, 0], sizes = [8, 128], strides = [1, 1]} : vector<8x384xf32> to vector<8x128xf32>
    %569 = vector.extract_strided_slice %539 {offsets = [0, 0], sizes = [8, 128], strides = [1, 1]} : vector<8x384xf32> to vector<8x128xf32>
    %570 = arith.addf %568, %569 : vector<8x128xf32>
    %571 = arith.negf %570 : vector<8x128xf32>
    %572 = math.exp %571 : vector<8x128xf32>
    %cst_100 = arith.constant 1.000000e+00 : f32
    %573 = vector.broadcast %cst_100 : f32 to vector<8x128xf32>
    %574 = arith.addf %573, %572 : vector<8x128xf32>
    %575 = arith.divf %573, %574 : vector<8x128xf32>
    %576 = vector.extract_strided_slice %541 {offsets = [0, 128], sizes = [8, 128], strides = [1, 1]} : vector<8x384xf32> to vector<8x128xf32>
    %577 = vector.extract_strided_slice %539 {offsets = [0, 128], sizes = [8, 128], strides = [1, 1]} : vector<8x384xf32> to vector<8x128xf32>
    %578 = arith.addf %576, %577 : vector<8x128xf32>
    %579 = arith.negf %578 : vector<8x128xf32>
    %580 = math.exp %579 : vector<8x128xf32>
    %cst_101 = arith.constant 1.000000e+00 : f32
    %581 = vector.broadcast %cst_101 : f32 to vector<8x128xf32>
    %582 = arith.addf %581, %580 : vector<8x128xf32>
    %583 = arith.divf %581, %582 : vector<8x128xf32>
    %584 = vector.extract_strided_slice %541 {offsets = [0, 256], sizes = [8, 128], strides = [1, 1]} : vector<8x384xf32> to vector<8x128xf32>
    %585 = vector.extract_strided_slice %539 {offsets = [0, 256], sizes = [8, 128], strides = [1, 1]} : vector<8x384xf32> to vector<8x128xf32>
    %586 = arith.mulf %575, %585 : vector<8x128xf32>
    %587 = arith.addf %584, %586 : vector<8x128xf32>
    %588 = math.tanh %587 : vector<8x128xf32>
    %cst_102 = arith.constant 1.000000e+00 : f32
    %589 = vector.broadcast %cst_102 : f32 to vector<8x128xf32>
    %590 = arith.subf %589, %583 : vector<8x128xf32>
    %591 = arith.mulf %590, %588 : vector<8x128xf32>
    %592 = arith.mulf %583, %521 : vector<8x128xf32>
    %593 = arith.addf %591, %592 : vector<8x128xf32>
    %c7_i32 = arith.constant 7 : i32
    %594 = vector.broadcast %c7_i32 : i32 to vector<8x1xi32>
    %595 = arith.cmpi eq, %16, %594 : vector<8x1xi32>
    %596 = vector.shape_cast %595 : vector<8x1xi1> to vector<8x1xi1>
    %597 = vector.broadcast %596 : vector<8x1xi1> to vector<8x128xi1>
    %598 = arith.select %597, %567, %526 : vector<8x128xi1>, vector<8x128xf32>
    %c7_i32_103 = arith.constant 7 : i32
    %599 = vector.broadcast %c7_i32_103 : i32 to vector<8x1xi32>
    %600 = arith.cmpi eq, %19, %599 : vector<8x1xi32>
    %601 = vector.shape_cast %600 : vector<8x1xi1> to vector<8x1xi1>
    %602 = vector.broadcast %601 : vector<8x1xi1> to vector<8x128xi1>
    %603 = arith.select %602, %593, %531 : vector<8x128xi1>, vector<8x128xf32>
    %604 = arith.truncf %598 : vector<8x128xf32> to vector<8x128xbf16>
    %c0_104 = arith.constant 0 : index
    %c0_105 = arith.constant 0 : index
    %605 = vector.load %arg13[%c0_104, %c0_105] : memref<128x128xbf16, #tpu.memory_space<vmem>>, vector<128x128xbf16>
    %cst_106 = arith.constant dense<0.000000e+00> : vector<8x128xf32>
    %606 = tpu.matmul %604, %605, %cst_106 {dimension_numbers = #tpu.dot_dimension_numbers<[1], [0], [0], [1], [0, 0, 1, 1], [], []>} : vector<8x128xbf16>, vector<128x128xbf16>, vector<8x128xf32> -> vector<8x128xf32>
    %607 = arith.truncf %606 : vector<8x128xf32> to vector<8x128xbf16>
    %608 = arith.truncf %603 : vector<8x128xf32> to vector<8x128xbf16>
    %cst_107 = arith.constant dense<0.000000e+00> : vector<8x8xf32>
    %609 = tpu.matmul %607, %608, %cst_107 {dimension_numbers = #tpu.dot_dimension_numbers<[1], [1], [0], [0], [0, 0, 1, 0], [], []>} : vector<8x128xbf16>, vector<8x128xbf16>, vector<8x8xf32> -> vector<8x8xf32>
    %c0_108 = arith.constant 0 : index
    %c0_109 = arith.constant 0 : index
    %610 = vector.load %arg14[%c0_108, %c0_109] : memref<8x8xf32, #tpu.memory_space<vmem>>, vector<8x8xf32>
    tpu.vector_store %arg14[%c0_108, %c0_109], %609 {strides = array<i32>} : memref<8x8xf32, #tpu.memory_space<vmem>>, vector<8x8xf32>,
    return
  }
  func.func @transform_0(%arg0: i32) -> (i32, i32, i32) {
    %c0_i32 = arith.constant 0 : i32
    %c0_i32_0 = arith.constant 0 : i32
    %c0_i32_1 = arith.constant 0 : i32
    %c0_i32_2 = arith.constant 0 : i32
    return %c0_i32, %c0_i32_0, %c0_i32_1 : i32, i32, i32
  }
  func.func @transform_1(%arg0: i32) -> (i32, i32, i32) {
    %c0_i32 = arith.constant 0 : i32
    %c0_i32_0 = arith.constant 0 : i32
    %c0_i32_1 = arith.constant 0 : i32
    %c0_i32_2 = arith.constant 0 : i32
    return %c0_i32, %c0_i32_0, %c0_i32_1 : i32, i32, i32
  }
  func.func @transform_2(%arg0: i32) -> (i32, i32) {
    %c0_i32 = arith.constant 0 : i32
    %c0_i32_0 = arith.constant 0 : i32
    %c0_i32_1 = arith.constant 0 : i32
    return %c0_i32, %c0_i32_0 : i32, i32
  }
  func.func @transform_3(%arg0: i32) -> (i32, i32) {
    %c0_i32 = arith.constant 0 : i32
    %c0_i32_0 = arith.constant 0 : i32
    %c0_i32_1 = arith.constant 0 : i32
    return %c0_i32, %c0_i32_0 : i32, i32
  }
  func.func @transform_4(%arg0: i32) -> (i32, i32) {
    %c0_i32 = arith.constant 0 : i32
    %c0_i32_0 = arith.constant 0 : i32
    %c0_i32_1 = arith.constant 0 : i32
    return %c0_i32, %c0_i32_0 : i32, i32
  }
  func.func @transform_5(%arg0: i32) -> (i32, i32) {
    %c0_i32 = arith.constant 0 : i32
    %c0_i32_0 = arith.constant 0 : i32
    %c0_i32_1 = arith.constant 0 : i32
    return %c0_i32, %c0_i32_0 : i32, i32
  }
  func.func @transform_6(%arg0: i32) -> (i32, i32) {
    %c0_i32 = arith.constant 0 : i32
    %c0_i32_0 = arith.constant 0 : i32
    %c0_i32_1 = arith.constant 0 : i32
    return %c0_i32, %c0_i32_0 : i32, i32
  }
  func.func @transform_7(%arg0: i32) -> (i32, i32) {
    %c0_i32 = arith.constant 0 : i32
    %c0_i32_0 = arith.constant 0 : i32
    %c0_i32_1 = arith.constant 0 : i32
    return %c0_i32, %c0_i32_0 : i32, i32
  }
  func.func @transform_8(%arg0: i32) -> (i32, i32) {
    %c0_i32 = arith.constant 0 : i32
    %c0_i32_0 = arith.constant 0 : i32
    %c0_i32_1 = arith.constant 0 : i32
    return %c0_i32, %c0_i32_0 : i32, i32
  }
  func.func @transform_9(%arg0: i32) -> (i32, i32) {
    %c0_i32 = arith.constant 0 : i32
    %c0_i32_0 = arith.constant 0 : i32
    %c0_i32_1 = arith.constant 0 : i32
    return %c0_i32, %c0_i32_0 : i32, i32
  }
  func.func @transform_10(%arg0: i32) -> (i32, i32) {
    %c0_i32 = arith.constant 0 : i32
    %c0_i32_0 = arith.constant 0 : i32
    %c0_i32_1 = arith.constant 0 : i32
    return %c0_i32, %c0_i32_0 : i32, i32
  }
  func.func @transform_11(%arg0: i32) -> (i32, i32) {
    %c0_i32 = arith.constant 0 : i32
    %c0_i32_0 = arith.constant 0 : i32
    %c0_i32_1 = arith.constant 0 : i32
    return %c0_i32, %c0_i32_0 : i32, i32
  }
  func.func @transform_12(%arg0: i32) -> (i32, i32) {
    %c0_i32 = arith.constant 0 : i32
    %c0_i32_0 = arith.constant 0 : i32
    %c0_i32_1 = arith.constant 0 : i32
    return %c0_i32, %c0_i32_0 : i32, i32
  }
  func.func @transform_13(%arg0: i32) -> (i32, i32) {
    %c0_i32 = arith.constant 0 : i32
    %c0_i32_0 = arith.constant 0 : i32
    %c0_i32_1 = arith.constant 0 : i32
    return %c0_i32, %c0_i32_0 : i32, i32
  }
}

</mosaic_0001>

<bundles_post_ra>
// kernel: tpu_custom_call.1
= control target key start
LH: loop header
LB: loop body
LE: loop exit
PB: predicated region body
PF: predicated region fallthrough
CT: control target
= control target key end

     0   :  { %18 = vsyncpa [#allocation3], 0  ;;  %s5793_s0 = inlined_call_operand.hbm [shape: bf16[8,8,128], index: 0, kind: input, shape index: {}]   ;;  %s5794_s1 = inlined_call_operand.hbm [shape: bf16[8,8,128], index: 1, kind: input, shape index: {}]   ;;  %s5795_s2 = inlined_call_operand.vmem [shape: s32[8,1], index: 2, kind: input, shape index: {}]   ;;  %s5796_s3 = inlined_call_operand.vmem [shape: s32[8,1], index: 3, kind: input, shape index: {}]   ;;  %s5797_s4 = inlined_call_operand.hbm [shape: bf16[128,384], index: 4, kind: input, shape index: {}]   ;;  %s5798_s5 = inlined_call_operand.hbm [shape: bf16[128,384], index: 5, kind: input, shape index: {}]   ;;  %s5799_s6 = inlined_call_operand.vmem [shape: f32[1,384], index: 6, kind: input, shape index: {}]   ;;  %s5800_s7 = inlined_call_operand.vmem [shape: f32[1,384], index: 7, kind: input, shape index: {}]   ;;  %s5801_s8 = inlined_call_operand.hbm [shape: bf16[128,384], index: 8, kind: input, shape index: {}]   ;;  %s5802_s9 = inlined_call_operand.hbm [shape: bf16[128,384], index: 9, kind: input, shape index: {}]   ;;  %s5803_s10 = inlined_call_operand.vmem [shape: f32[1,384], index: 10, kind: input, shape index: {}]   ;;  %s5804_s11 = inlined_call_operand.vmem [shape: f32[1,384], index: 11, kind: input, shape index: {}]   ;;  %s5805_s12 = inlined_call_operand.hbm [shape: bf16[128,128], index: 12, kind: input, shape index: {}]   ;;  %s5806_s13 = inlined_call_operand.hbm [shape: f32[8,8], index: 13, kind: output, shape index: {}]  }
   0x1   :  { %19 = vsyncpa [#allocation6], 0 }
   0x2   :  { %20 = vsyncpa [#allocation9], 0 }
   0x3   :  { %21 = vsyncpa [#allocation12], 0 }
   0x4   :  { %22 = vsyncpa [#allocation4], 0  ;;  %s4440_s25 = smov [#allocation5]   ;;  %s4254_s29 = scalar_lea.hbm %s5794_s1, 512 }
   0x5   :  { %s40_s26 = sshll.u32 %s4440_s25, 4  ;;  %p4255_p0 = scmp.ne.s32.totalorder %s5794_s1, %s4254_s29  ;;  %s41_s26 = int_to_ptr.vmem [resolvable:$true] %s40_s26 }
   0x6   :  { %p4258_p1 = scmp.lt.u32.totalorder %s4254_s29, %s5794_s1 }
   0x8   :  { %p4260_p2 = pnand %p4258_p1, %p4255_p0 }
   0xa   :  { %4263 = shalt.err (!%p4260_p2)
}
   0xb   :  { %s4264_s17 = scalar_lea.vmem %s41_s26, 512  ;;  %p4269_p4 = scmp.lt.s32.totalorder %s41_s26, %s41_s26 }
   0xc   :  { %p4265_p3 = scmp.ne.s32.totalorder %s41_s26, %s4264_s17  ;;  %p4270_p5 = scmp.lt.s32.totalorder %s4264_s17, %s4264_s17 }
   0xe   :  { %p4271_p6 = por %p4270_p5, %p4269_p4 }
  0x10   :  { %p4272_p7 = pnand %p4271_p6, %p4265_p3 }
  0x12   :  { %4275 = shalt.err (!%p4272_p7)
}
  0x13   :  { %s4441_s18 = smov 64   ;;  %s4442_s19 = smov 4  }
  0x14   :  { %46 = dma.hbm_to_vmem [thread:$0]  %s5794_s1, 512, %s41_s26, [#allocation6], %s4441_s18, %s4441_s18, %s4442_s19  }
  0x15   :  { %s4443_s22 = smov [#allocation8]   ;;  %s4444_s24 = smov [#allocation11]  }
  0x16   :  { %s68_s23 = sshll.u32 %s4443_s22, 4  ;;  %s96_s25 = sshll.u32 %s4444_s24, 4  ;;  %s69_s23 = int_to_ptr.vmem [resolvable:$true] %s68_s23  ;;  %s97_s25 = int_to_ptr.vmem [resolvable:$true] %s96_s25 }
  0x17   :  { %s4276_s29 = scalar_lea.hbm %s5798_s5, 3072 }
  0x18   :  { %p4277_p8 = scmp.ne.s32.totalorder %s5798_s5, %s4276_s29  ;;  %p4280_p9 = scmp.lt.u32.totalorder %s4276_s29, %s5798_s5 }
  0x1a   :  { %p4282_p10 = pnand %p4280_p9, %p4277_p8 }
  0x1c   :  { %4285 = shalt.err (!%p4282_p10)
}
  0x1d   :  { %s4286_s1 = scalar_lea.vmem %s69_s23, 3072  ;;  %p4291_p12 = scmp.lt.s32.totalorder %s69_s23, %s69_s23 }
  0x1e   :  { %p4287_p11 = scmp.ne.s32.totalorder %s69_s23, %s4286_s1  ;;  %p4292_p13 = scmp.lt.s32.totalorder %s4286_s1, %s4286_s1 }
  0x20   :  { %p4293_p0 = por %p4292_p13, %p4291_p12 }
  0x22   :  { %p4294_p1 = pnand %p4293_p0, %p4287_p11 }
  0x24   :  { %4297 = shalt.err (!%p4294_p1)
}
  0x25   :  { %s4445_s26 = smov 192   ;;  %s4446_s17 = smov 12  }
  0x26   :  { %74 = dma.hbm_to_vmem [thread:$0]  %s5798_s5, 3072, %s69_s23, [#allocation9], %s4445_s26, %s4445_s26, %s4446_s17  }
  0x27   :  { %s4298_s27 = scalar_lea.hbm %s5802_s9, 3072 }
  0x28   :  { %p4299_p2 = scmp.ne.s32.totalorder %s5802_s9, %s4298_s27  ;;  %p4302_p3 = scmp.lt.u32.totalorder %s4298_s27, %s5802_s9 }
  0x2a   :  { %p4304_p4 = pnand %p4302_p3, %p4299_p2 }
  0x2c   :  { %4307 = shalt.err (!%p4304_p4)
}
  0x2d   :  { %s4308_s15 = scalar_lea.vmem %s97_s25, 3072  ;;  %p4313_p6 = scmp.lt.s32.totalorder %s97_s25, %s97_s25 }
  0x2e   :  { %p4309_p5 = scmp.ne.s32.totalorder %s97_s25, %s4308_s15  ;;  %p4314_p7 = scmp.lt.s32.totalorder %s4308_s15, %s4308_s15 }
  0x30   :  { %p4315_p8 = por %p4314_p7, %p4313_p6 }
  0x32   :  { %p4316_p9 = pnand %p4315_p8, %p4309_p5 }
  0x34   :  { %4319 = shalt.err (!%p4316_p9)
}
  0x35   :  { %102 = dma.hbm_to_vmem [thread:$0]  %s5802_s9, 3072, %s97_s25, [#allocation12], %s4445_s26, %s4445_s26, %s4446_s17  }
  0x36   :  { %s4447_s16 = smov [#allocation2]   ;;  %s4448_s20 = smov [#allocation7]  }
  0x37   :  { %s28_s1 = sshll.u32 %s4447_s16, 4  ;;  %s56_s21 = sshll.u32 %s4448_s20, 4  ;;  %s29_s1 = int_to_ptr.vmem [resolvable:$true] %s28_s1  ;;  %s57_s21 = int_to_ptr.vmem [resolvable:$true] %s56_s21 }
  0x38   :  { %s4320_s27 = scalar_lea.hbm %s5793_s0, 512 }
  0x39   :  { %p4321_p10 = scmp.ne.s32.totalorder %s5793_s0, %s4320_s27  ;;  %p4324_p11 = scmp.lt.u32.totalorder %s4320_s27, %s5793_s0 }
  0x3b   :  { %p4326_p12 = pnand %p4324_p11, %p4321_p10 }
  0x3d   :  { %4329 = shalt.err (!%p4326_p12)
}
  0x3e   :  { %s4330_s9 = scalar_lea.vmem %s29_s1, 512  ;;  %p4335_p0 = scmp.lt.s32.totalorder %s29_s1, %s29_s1 }
  0x3f   :  { %p4331_p13 = scmp.ne.s32.totalorder %s29_s1, %s4330_s9  ;;  %p4336_p1 = scmp.lt.s32.totalorder %s4330_s9, %s4330_s9 }
  0x41   :  { %p4337_p2 = por %p4336_p1, %p4335_p0 }
  0x43   :  { %p4338_p3 = pnand %p4337_p2, %p4331_p13 }
  0x45   :  { %4341 = shalt.err (!%p4338_p3)
}
  0x46   :  { %34 = dma.hbm_to_vmem [thread:$0]  %s5793_s0, 512, %s29_s1, [#allocation3], %s4441_s18, %s4441_s18, %s4442_s19  }
  0x47   :  { %s4342_s16 = scalar_lea.hbm %s5797_s4, 3072 }
  0x48   :  { %p4343_p4 = scmp.ne.s32.totalorder %s5797_s4, %s4342_s16  ;;  %p4346_p5 = scmp.lt.u32.totalorder %s4342_s16, %s5797_s4 }
  0x4a   :  { %p4348_p6 = pnand %p4346_p5, %p4343_p4 }
  0x4c   :  { %4351 = shalt.err (!%p4348_p6)
}
  0x4d   :  { %s4352_s28 = scalar_lea.vmem %s57_s21, 3072  ;;  %p4357_p8 = scmp.lt.s32.totalorder %s57_s21, %s57_s21 }
  0x4e   :  { %p4353_p7 = scmp.ne.s32.totalorder %s57_s21, %s4352_s28  ;;  %p4358_p9 = scmp.lt.s32.totalorder %s4352_s28, %s4352_s28 }
  0x50   :  { %p4359_p10 = por %p4358_p9, %p4357_p8 }
  0x52   :  { %p4360_p11 = pnand %p4359_p10, %p4353_p7 }
  0x54   :  { %4363 = shalt.err (!%p4360_p11)
}
  0x55   :  { %62 = dma.hbm_to_vmem [thread:$0]  %s5797_s4, 3072, %s57_s21, [#allocation6], %s4445_s26, %s4445_s26, %s4446_s17  }
  0x56   :  { %s4449_s29 = smov [#allocation10]   ;;  %s4450_s14 = smov [#allocation13]  }
  0x57   :  { %s84_s30 = sshll.u32 %s4449_s29, 4  ;;  %s112_s9 = sshll.u32 %s4450_s14, 4  ;;  %s85_s30 = int_to_ptr.vmem [resolvable:$true] %s84_s30  ;;  %s113_s9 = int_to_ptr.vmem [resolvable:$true] %s112_s9 }
  0x58   :  { %s4364_s5 = scalar_lea.hbm %s5801_s8, 3072 }
  0x59   :  { %p4365_p12 = scmp.ne.s32.totalorder %s5801_s8, %s4364_s5  ;;  %p4368_p13 = scmp.lt.u32.totalorder %s4364_s5, %s5801_s8 }
  0x5b   :  { %p4370_p0 = pnand %p4368_p13, %p4365_p12 }
  0x5d   :  { %4373 = shalt.err (!%p4370_p0)
}
  0x5e   :  { %s4374_s4 = scalar_lea.vmem %s85_s30, 3072  ;;  %p4379_p2 = scmp.lt.s32.totalorder %s85_s30, %s85_s30 }
  0x5f   :  { %p4375_p1 = scmp.ne.s32.totalorder %s85_s30, %s4374_s4  ;;  %p4380_p3 = scmp.lt.s32.totalorder %s4374_s4, %s4374_s4 }
  0x61   :  { %p4381_p4 = por %p4380_p3, %p4379_p2 }
  0x63   :  { %p4382_p5 = pnand %p4381_p4, %p4375_p1 }
  0x65   :  { %4385 = shalt.err (!%p4382_p5)
}
  0x66   :  { %90 = dma.hbm_to_vmem [thread:$0]  %s5801_s8, 3072, %s85_s30, [#allocation9], %s4445_s26, %s4445_s26, %s4446_s17  }
  0x67   :  { %s4386_s0 = scalar_lea.hbm %s5805_s12, 1024 }
  0x68   :  { %p4387_p6 = scmp.ne.s32.totalorder %s5805_s12, %s4386_s0  ;;  %p4390_p7 = scmp.lt.u32.totalorder %s4386_s0, %s5805_s12 }
  0x6a   :  { %p4392_p8 = pnand %p4390_p7, %p4387_p6 }
  0x6c   :  { %4395 = shalt.err (!%p4392_p8)
}
  0x6d   :  { %s4396_s15 = scalar_lea.vmem %s113_s9, 1024  ;;  %p4401_p10 = scmp.lt.s32.totalorder %s113_s9, %s113_s9 }
  0x6e   :  { %p4397_p9 = scmp.ne.s32.totalorder %s113_s9, %s4396_s15  ;;  %p4402_p11 = scmp.lt.s32.totalorder %s4396_s15, %s4396_s15 }
  0x70   :  { %p4403_p12 = por %p4402_p11, %p4401_p10 }
  0x72   :  { %p4404_p13 = pnand %p4403_p12, %p4397_p9 }
  0x74   :  { %4407 = shalt.err (!%p4404_p13)
}
  0x75   :  { %118 = dma.hbm_to_vmem [thread:$0]  %s5805_s12, 1024, %s113_s9, [#allocation12], %s4441_s18, %s4441_s18, %s4442_s19  }
  0x76   :  { %4430 = dma.done.wait [#allocation3], 512  }
  0x77   :  { %4431 = vsyncadd [#allocation3], 4294966784 }
  0x78   :  { %4432 = dma.done.wait [#allocation6], 3584  }
  0x79   :  { %4433 = vsyncadd [#allocation6], 4294963712 }
  0x7a   :  { %4434 = dma.done.wait [#allocation9], 6144  }
  0x7b   :  { %4435 = vsyncadd [#allocation9], 4294961152 }
  0x7c   :  { %4436 = dma.done.wait [#allocation12], 4096  }
  0x7d   :  { %4437 = vsyncadd [#allocation12], 4294963200  ;;  %v5809_v0 = vmov 0   ;;  %v3854_v1 = vld [vmem:[#allocation7 + $0x4] ss:$12 sps:$4 sm:$0xff]   ;;  %v3889_v31 = vld [vmem:[#allocation2 + $0x8] sm:$0xff]  }
  0x7e   :  { %382 = vmatprep.mubr.bf16.mxu0 %v5809_v0  ;;  %3852 = vset.pattern.permute.xlu0 %v5809_v0  ;;  %v3856_v2 = vld [vmem:[#allocation7] ss:$12 sps:$4 sm:$0xff]   ;;  %v3857_v3 = vld [vmem:[#allocation7 + $0x1c] ss:$12 sps:$4 sm:$0xff]   ;;  %v3859_v4 = vld [vmem:[#allocation7 + $0x18] ss:$12 sps:$4 sm:$0xff]  }
  0x7f   :  { %3853 = vset.pattern.permute.xlu1 %v5809_v0  ;;  %350 = vmatprep.subr.bf16.mxu0 %v3854_v1  ;;  %v3860_v5 = vld [vmem:[#allocation7 + $0x34] ss:$12 sps:$4 sm:$0xff]   ;;  %v3862_v6 = vld [vmem:[#allocation7 + $0x30] ss:$12 sps:$4 sm:$0xff]   ;;  %v3863_v7 = vld [vmem:[#allocation7 + $0x4c] ss:$12 sps:$4 sm:$0xff]  }
  0x80   :  { %351 = vmatpush1.bf16.msra.mxu0 %v3856_v2  ;;  %v3875_v8 = vld [vmem:[#allocation7 + $0x8] ss:$12 sps:$4 sm:$0xff]   ;;  %v3866_v10 = vld [vmem:[#allocation7 + $0x64] ss:$12 sps:$4 sm:$0xff]   ;;  %v3879_v11 = vld [vmem:[#allocation7 + $0x20] ss:$12 sps:$4 sm:$0xff]  }
  0x81   :  { %352 = vmatprep.subr.bf16.mxu0 %v3857_v3  ;;  %v3865_v9 = vld [vmem:[#allocation7 + $0x48] ss:$12 sps:$4 sm:$0xff]   ;;  %3443 = vmatprep.subr.bf16.mxu1 %v3875_v8  ;;  %v3880_v12 = vld [vmem:[#allocation2] sm:$0xff]   ;;  %v3888_v16 = vld [vmem:[#allocation7 + $0x50] ss:$12 sps:$4 sm:$0xff]   ;;  %v5807_v1 = vmov 0.0  }
  0x82   :  { %3444 = vmatpush3.bf16.msra.mxu1 %v3875_v8  ;;  %v3868_v13 = vld [vmem:[#allocation7 + $0x60] ss:$12 sps:$4 sm:$0xff]   ;;  %v3884_v14 = vld [vmem:[#allocation7 + $0x38] ss:$12 sps:$4 sm:$0xff]   ;;  %3459 = vmatprep.mubr.bf16.mxu1 %v3880_v12  ;;  %v3869_v15 = vld [vmem:[#allocation7 + $0x7c] ss:$12 sps:$4 sm:$0xff]  }
  0x83   :  { %3445 = vmatprep.subr.bf16.mxu1 %v3879_v11  ;;  %v3871_v17 = vld [vmem:[#allocation7 + $0x78] ss:$12 sps:$4 sm:$0xff]   ;;  %v3872_v18 = vld [vmem:[#allocation7 + $0x94] ss:$12 sps:$4 sm:$0xff]   ;;  %v3874_v20 = vld [vmem:[#allocation7 + $0x90] ss:$12 sps:$4 sm:$0xff]  }
  0x84   :  { %353 = vmatpush1.bf16.msra.mxu0 %v3859_v4  ;;  %v3893_v19 = vld [vmem:[#allocation7 + $0x68] ss:$12 sps:$4 sm:$0xff]   ;;  %v3876_v21 = vld [vmem:[#allocation7 + $0xac] ss:$12 sps:$4 sm:$0xff]   ;;  %v3883_v24 = vld [vmem:[#allocation10 + $0x4] ss:$12 sps:$4 sm:$0xff]  }
  0x85   :  { %354 = vmatprep.subr.bf16.mxu0 %v3860_v5  ;;  %v3897_v22 = vld [vmem:[#allocation7 + $0x80] ss:$12 sps:$4 sm:$0xff]   ;;  %v3878_v23 = vld [vmem:[#allocation7 + $0xa8] ss:$12 sps:$4 sm:$0xff]   ;;  %v3902_v25 = vld [vmem:[#allocation7 + $0x98] ss:$12 sps:$4 sm:$0xff]  }
  0x86   :  { %3446 = vmatpush3.bf16.msra.mxu1 %v3879_v11  ;;  %v3881_v26 = vld [vmem:[#allocation10] ss:$12 sps:$4 sm:$0xff]   ;;  %v3887_v27 = vld [vmem:[#allocation10 + $0x1c] ss:$12 sps:$4 sm:$0xff]   ;;  %v3885_v29 = vld [vmem:[#allocation10 + $0x18] ss:$12 sps:$4 sm:$0xff]  }
  0x87   :  { %3447 = vmatprep.subr.bf16.mxu1 %v3884_v14  ;;  %v3906_v28 = vld [vmem:[#allocation7 + $0xb0] ss:$12 sps:$4 sm:$0xff]   ;;  %v3892_v30 = vld [vmem:[#allocation10 + $0x34] ss:$12 sps:$4 sm:$0xff]   ;;  %v3896_v34 = vld [vmem:[#allocation10 + $0x4c] ss:$12 sps:$4 sm:$0xff]  }
  0x88   :  { %355 = vmatpush1.bf16.msra.mxu0 %v3862_v6  ;;  %v3911_v32 = vld [vmem:[#allocation10 + $0x8] ss:$12 sps:$4 sm:$0xff]   ;;  %v3890_v33 = vld [vmem:[#allocation10 + $0x30] ss:$12 sps:$4 sm:$0xff]   ;;  %v3915_v36 = vld [vmem:[#allocation10 + $0x20] ss:$12 sps:$4 sm:$0xff]  }
  0x89   :  { %356 = vmatprep.subr.bf16.mxu0 %v3863_v7  ;;  %v3894_v35 = vld [vmem:[#allocation10 + $0x48] ss:$12 sps:$4 sm:$0xff]   ;;  %v3901_v38 = vld [vmem:[#allocation10 + $0x64] ss:$12 sps:$4 sm:$0xff]   ;;  %v3899_v40 = vld [vmem:[#allocation10 + $0x60] ss:$12 sps:$4 sm:$0xff]  }
  0x8a   :  { %3448 = vmatpush3.bf16.msra.mxu1 %v3884_v14  ;;  %v3898_v37 = vld [vmem:[#allocation2 + $0x10] sm:$0xff]   ;;  %v3920_v39 = vld [vmem:[#allocation10 + $0x38] ss:$12 sps:$4 sm:$0xff]   ;;  %v3905_v41 = vld [vmem:[#allocation10 + $0x7c] ss:$12 sps:$4 sm:$0xff]   ;;  %vm4453_vm0 = vmmov 0  }
  0x8b   :  { %3449 = vmatprep.subr.bf16.mxu1 %v3888_v16  ;;  %v3903_v42 = vld [vmem:[#allocation10 + $0x78] ss:$12 sps:$4 sm:$0xff]   ;;  %v3924_v44 = vld [vmem:[#allocation10 + $0x50] ss:$12 sps:$4 sm:$0xff]   ;;  %v3910_v46 = vld [vmem:[#allocation10 + $0x94] ss:$12 sps:$4 sm:$0xff]  }
  0x8c   :  { %357 = vmatpush1.bf16.msra.mxu0 %v3865_v9  ;;  %v3907_v43 = vld [vmem:[#allocation2 + $0x18] sm:$0xff]   ;;  %v3916_v45 = vld [vmem:[#allocation5] sm:$0xff]   ;;  %v3929_v47 = vld [vmem:[#allocation10 + $0x68] ss:$12 sps:$4 sm:$0xff]  }
  0x8d   :  { %358 = vmatprep.subr.bf16.mxu0 %v3866_v10  ;;  %v3908_v48 = vld [vmem:[#allocation10 + $0x90] ss:$12 sps:$4 sm:$0xff]   ;;  %v3914_v49 = vld [vmem:[#allocation10 + $0xac] ss:$12 sps:$4 sm:$0xff]   ;;  %v3912_v51 = vld [vmem:[#allocation10 + $0xa8] ss:$12 sps:$4 sm:$0xff]  }
  0x8e   :  { %3450 = vmatpush3.bf16.msra.mxu1 %v3888_v16  ;;  %v3933_v50 = vld [vmem:[#allocation10 + $0x80] ss:$12 sps:$4 sm:$0xff]   ;;  %v4637_v52 = vld [vmem:[#allocation8 + $0x4] ss:$12 sps:$4 sm:$0xff]   ;;  %v4642_v55 = vld [vmem:[#allocation8 + $0x1c] ss:$12 sps:$4 sm:$0xff]  }
  0x8f   :  { %3451 = vmatprep.subr.bf16.mxu1 %v3893_v19  ;;  %v3938_v53 = vld [vmem:[#allocation10 + $0x98] ss:$12 sps:$4 sm:$0xff]   ;;  %v4639_v54 = vld [vmem:[#allocation8] ss:$12 sps:$4 sm:$0xff]   ;;  %v3942_v56 = vld [vmem:[#allocation10 + $0xb0] ss:$12 sps:$4 sm:$0xff]  }
  0x90   :  { %359 = vmatpush1.bf16.msra.mxu0 %v3868_v13  ;;  %v4645_v57 = vld [vmem:[#allocation8 + $0x18] ss:$12 sps:$4 sm:$0xff]   ;;  %v4649_v58 = vld [vmem:[#allocation8 + $0x34] ss:$12 sps:$4 sm:$0xff]   ;;  %v3925_v59 = vld [vmem:[#allocation5 + $0x8] sm:$0xff]  }
  0x91   :  { %360 = vmatprep.subr.bf16.mxu0 %v3869_v15  ;;  %5868 = vst [vmem:[#allocation20_spill] sm:$0xff] %v4649_v58  ;;  %v4652_v60 = vld [vmem:[#allocation8 + $0x30] ss:$12 sps:$4 sm:$0xff]   ;;  %v4655_v61 = vld [vmem:[#allocation8 + $0x4c] ss:$12 sps:$4 sm:$0xff]   ;;  %v835_v11 = vld [vmem:[%s5795_s2] sm:$0xff] }
  0x92   :  { %3452 = vmatpush3.bf16.msra.mxu1 %v3893_v19  ;;  %5869 = vst [vmem:[#allocation21_spill] sm:$0xff] %v4652_v60  ;;  %5870 = vst [vmem:[#allocation22_spill] sm:$0xff] %v4655_v61  ;;  %v4657_v62 = vld [vmem:[#allocation8 + $0x8] ss:$12 sps:$4 sm:$0xff]   ;;  %v4665_v3 = vld [vmem:[#allocation8 + $0x64] ss:$12 sps:$4 sm:$0xff]  }
  0x93   :  { %3453 = vmatprep.subr.bf16.mxu1 %v3897_v22  ;;  %v4659_v63 = vld [vmem:[#allocation8 + $0x48] ss:$12 sps:$4 sm:$0xff]   ;;  %5872 = vst [vmem:[#allocation24_spill] sm:$0xff] %v4665_v3  ;;  %v4668_v4 = vld [vmem:[#allocation8 + $0x20] ss:$12 sps:$4 sm:$0xff]   ;;  %v3943_v7 = vld [vmem:[#allocation5 + $0x18] sm:$0xff]  }
  0x94   :  { %361 = vmatpush1.bf16.msra.mxu0 %v3871_v17  ;;  %5871 = vst [vmem:[#allocation23_spill] sm:$0xff] %v4659_v63  ;;  %v3934_v2 = vld [vmem:[#allocation5 + $0x10] sm:$0xff]   ;;  %v4670_v5 = vld [vmem:[#allocation8 + $0x60] ss:$12 sps:$4 sm:$0xff]   ;;  %v4674_v6 = vld [vmem:[#allocation8 + $0x7c] ss:$12 sps:$4 sm:$0xff]  }
  0x95   :  { %362 = vmatprep.subr.bf16.mxu0 %v3872_v18  ;;  %5873 = vst [vmem:[#allocation25_spill] sm:$0xff] %v4670_v5  ;;  %5874 = vst [vmem:[#allocation26_spill] sm:$0xff] %v4674_v6  ;;  %v4677_v8 = vld [vmem:[#allocation8 + $0x78] ss:$12 sps:$4 sm:$0xff]   ;;  %v4682_v10 = vld [vmem:[#allocation8 + $0x94] ss:$12 sps:$4 sm:$0xff]  }
  0x96   :  { %3454 = vmatpush3.bf16.msra.mxu1 %v3897_v22  ;;  %5875 = vst [vmem:[#allocation27_spill] sm:$0xff] %v4677_v8  ;;  %v4680_v9 = vld [vmem:[#allocation8 + $0x38] ss:$12 sps:$4 sm:$0xff]   ;;  %5877 = vst [vmem:[#allocation29_spill] sm:$0xff] %v4682_v10  ;;  %v4692_v13 = vadd.s32 4294967295, %v835_v11 }
  0x97   :  { %3455 = vmatprep.subr.bf16.mxu1 %v3902_v25  ;;  %5876 = vst [vmem:[#allocation28_spill] sm:$0xff] %v4680_v9  ;;  %v4695_v14 = vld [vmem:[#allocation8 + $0x90] ss:$12 sps:$4 sm:$0xff]   ;;  %v4701_v15 = vld [vmem:[#allocation8 + $0xac] ss:$12 sps:$4 sm:$0xff]  }
  0x98   :  { %363 = vmatpush1.bf16.msra.mxu0 %v3874_v20  ;;  %5879 = vst [vmem:[#allocation31_spill] sm:$0xff] %v4695_v14  ;;  %vm1397_vm1 = vcmp.eq.s32.totalorder %v4692_v13, 0  ;;  %5880 = vst [vmem:[#allocation32_spill] sm:$0xff] %v4701_v15  ;;  %v4708_v17 = vld [vmem:[#allocation8 + $0x68] ss:$12 sps:$4 sm:$0xff]   ;;  %vm1617_vm2 = vcmp.eq.s32.totalorder %v4692_v13, 1 }
  0x99   :  { %364 = vmatprep.subr.bf16.mxu0 %v3876_v21  ;;  %v1398_v16 = vsel %vm1397_vm1, 1, %v5809_v0  ;;  %5881 = vst [vmem:[#allocation33_spill] sm:$0xff] %v4708_v17  ;;  %v4712_v18 = vld [vmem:[#allocation8 + $0xa8] ss:$12 sps:$4 sm:$0xff]   ;;  %v4716_v19 = vld [vmem:[#allocation11 + $0x4] ss:$12 sps:$4 sm:$0xff]  }
  0x9a   :  { %3456 = vmatpush3.bf16.msra.mxu1 %v3902_v25  ;;  %1400 = vperm.xlu0 %3852, %v1398_v16   ;;  %5882 = vst [vmem:[#allocation34_spill] sm:$0xff] %v4712_v18  ;;  %5883 = vst [vmem:[#allocation35_spill] sm:$0xff] %v4716_v19  ;;  %v4719_v20 = vld [vmem:[#allocation8 + $0x80] ss:$12 sps:$4 sm:$0xff]   ;;  %v4726_v22 = vld [vmem:[#allocation11 + $0x1c] ss:$12 sps:$4 sm:$0xff]  }
  0x9b   :  { %3457 = vmatprep.subr.bf16.mxu1 %v3906_v28  ;;  %5884 = vst [vmem:[#allocation36_spill] sm:$0xff] %v4719_v20  ;;  %v4723_v21 = vld [vmem:[#allocation11] ss:$12 sps:$4 sm:$0xff]   ;;  %vm2277_vm3 = vcmp.eq.s32.totalorder %v4692_v13, 4  ;;  %vm2717_vm4 = vcmp.eq.s32.totalorder %v4692_v13, 6  ;;  %vm1837_vm6 = vcmp.eq.s32.totalorder %v4692_v13, 2 }
  0x9c   :  { %365 = vmatpush1.bf16.msra.mxu0 %v3878_v23  ;;  %v4729_v23 = vld [vmem:[#allocation8 + $0x98] ss:$12 sps:$4 sm:$0xff]   ;;  %v4738_v25 = vld [vmem:[#allocation11 + $0x34] ss:$12 sps:$4 sm:$0xff]   ;;  %vm2057_vm7 = vcmp.eq.s32.totalorder %v4692_v13, 3  ;;  %vm2497_vm8 = vcmp.eq.s32.totalorder %v4692_v13, 5 }
  0x9d   :  { %697 = vmatprep.subr.bf16.mxu0 %v3883_v24  ;;  %5885 = vst [vmem:[#allocation37_spill] sm:$0xff] %v4729_v23  ;;  %v4734_v24 = vld [vmem:[#allocation11 + $0x18] ss:$12 sps:$4 sm:$0xff]   ;;  %vm2937_vm9 = vcmp.eq.s32.totalorder %v4692_v13, 7 }
  0x9e   :  { %3458 = vmatpush3.bf16.msra.mxu1 %v3906_v28  ;;  %v4748_v28 = vld [vmem:[#allocation11 + $0x4c] ss:$12 sps:$4 sm:$0xff]  }
  0x9f   :  { %383 = vmatmul.mubr.bf16.vlgmr.msra.gmra.mrb[0].mxu0 %v3880_v12  ;;  %3467 = vmatprep.subr.bf16.mxu1 %v3911_v32  ;;  %v4690_v12 = vld [vmem:[#allocation8 + $0x50] ss:$12 sps:$4 sm:$0xff]  }
  0xa0   :  { %698 = vmatpush1.bf16.msra.mxu0 %v3881_v26  ;;  %392 = vmatprep.mubr.bf16.mxu0 %v5809_v0  ;;  %5878 = vst [vmem:[#allocation30_spill] sm:$0xff] %v4690_v12  ;;  %v4741_v26 = vld [vmem:[#allocation8 + $0xb0] ss:$12 sps:$4 sm:$0xff]  }
  0xa1   :  { %699 = vmatprep.subr.bf16.mxu0 %v3887_v27  ;;  %3460 = vmatmul.mubr.bf16.vlgmr.msra.gmra.mrb[0].mxu1 %v3889_v31  ;;  %5886 = vst [vmem:[#allocation38_spill] sm:$0xff] %v4741_v26  ;;  %v4745_v27 = vld [vmem:[#allocation11 + $0x30] ss:$12 sps:$4 sm:$0xff]  }
  0xa2   :  { %3468 = vmatpush3.bf16.msra.mxu1 %v3911_v32  ;;  %3463 = vmatprep.mubr.bf16.mxu1 %v3898_v37  ;;  %v4762_v32 = vld [vmem:[#allocation11 + $0x20] ss:$12 sps:$4 sm:$0xff]  }
  0xa3   :  { %3469 = vmatprep.subr.bf16.mxu1 %v3915_v36 }
  0xa4   :  { %700 = vmatpush1.bf16.msra.mxu0 %v3885_v29  ;;  %v4751_v29 = vld [vmem:[#allocation11 + $0x8] ss:$12 sps:$4 sm:$0xff]  }
  0xa5   :  { %701 = vmatprep.subr.bf16.mxu0 %v3892_v30  ;;  %v4755_v30 = vld [vmem:[#allocation11 + $0x48] ss:$12 sps:$4 sm:$0xff]  }
  0xa6   :  { %3470 = vmatpush3.bf16.msra.mxu1 %v3915_v36  ;;  %v4778_v36 = vld [vmem:[#allocation11 + $0x78] ss:$12 sps:$4 sm:$0xff]  }
  0xa7   :  { %393 = vmatmul.mubr.bf16.gmra.mrb[4].mxu0 %v3889_v31  ;;  %3471 = vmatprep.subr.bf16.mxu1 %v3920_v39  ;;  %v4758_v31 = vld [vmem:[#allocation11 + $0x64] ss:$12 sps:$4 sm:$0xff]  }
  0xa8   :  { %702 = vmatpush1.bf16.msra.mxu0 %v3890_v33  ;;  %402 = vmatprep.mubr.bf16.mxu0 %v5809_v0  ;;  %v4768_v33 = vld [vmem:[#allocation11 + $0x60] ss:$12 sps:$4 sm:$0xff]  }
  0xa9   :  { %703 = vmatprep.subr.bf16.mxu0 %v3896_v34  ;;  %3464 = vmatmul.mubr.bf16.gmra.mrb[4].mxu1 %v3907_v43  ;;  %v4771_v34 = vld [vmem:[#allocation11 + $0x7c] ss:$12 sps:$4 sm:$0xff]  }
  0xaa   :  { %3472 = vmatpush3.bf16.msra.mxu1 %v3920_v39  ;;  %3483 = vmatprep.mubr.bf16.mxu1 %v3916_v45  ;;  %v4788_v39 = vld [vmem:[#allocation11 + $0x90] ss:$12 sps:$4 sm:$0xff]  }
  0xab   :  { %3473 = vmatprep.subr.bf16.mxu1 %v3924_v44 }
  0xac   :  { %704 = vmatpush1.bf16.msra.mxu0 %v3894_v35  ;;  %v4774_v35 = vld [vmem:[#allocation11 + $0x38] ss:$12 sps:$4 sm:$0xff]  }
  0xad   :  { %705 = vmatprep.subr.bf16.mxu0 %v3901_v38  ;;  %v4784_v38 = vld [vmem:[#allocation11 + $0x50] ss:$12 sps:$4 sm:$0xff]  }
  0xae   :  { %3474 = vmatpush3.bf16.msra.mxu1 %v3924_v44  ;;  %v4805_v44 = vld [vmem:[#allocation11 + $0x80] ss:$12 sps:$4 sm:$0xff]  }
  0xaf   :  { %403 = vmatmul.mubr.bf16.gmra.mrb[8].mxu0 %v3898_v37  ;;  %3475 = vmatprep.subr.bf16.mxu1 %v3929_v47  ;;  %v4781_v37 = vld [vmem:[#allocation11 + $0x94] ss:$12 sps:$4 sm:$0xff]  }
  0xb0   :  { %706 = vmatpush1.bf16.msra.mxu0 %v3899_v40  ;;  %412 = vmatprep.mubr.bf16.mxu0 %v5809_v0  ;;  %v4791_v40 = vld [vmem:[#allocation11 + $0xac] ss:$12 sps:$4 sm:$0xff]  }
  0xb1   :  { %707 = vmatprep.subr.bf16.mxu0 %v3905_v41  ;;  %v4795_v41 = vld [vmem:[#allocation11 + $0x68] ss:$12 sps:$4 sm:$0xff]  }
  0xb2   :  { %3476 = vmatpush3.bf16.msra.mxu1 %v3929_v47  ;;  %v2718_v47 = vsel %vm2717_vm4, 1, %v5809_v0 }
  0xb3   :  { %3477 = vmatprep.subr.bf16.mxu1 %v3933_v50 }
  0xb4   :  { %708 = vmatpush1.bf16.msra.mxu0 %v3903_v42  ;;  %v1618_v42 = vsel %vm1617_vm2, 1, %v5809_v0 }
  0xb5   :  { %709 = vmatprep.subr.bf16.mxu0 %v3910_v46  ;;  %1620 = vperm.xlu0 %3852, %v1618_v42   ;;  %v4813_v46 = vld [vmem:[#allocation11 + $0x98] ss:$12 sps:$4 sm:$0xff]  }
  0xb6   :  { %3478 = vmatpush3.bf16.msra.mxu1 %v3933_v50  ;;  %v4828_v50 = vld [vmem:[#allocation11 + $0xb0] ss:$12 sps:$4 sm:$0xff]  }
  0xb7   :  { %413 = vmatmul.mubr.bf16.gmra.mrb[12].mxu0 %v3907_v43  ;;  %3479 = vmatprep.subr.bf16.mxu1 %v3938_v53  ;;  %v4800_v43 = vld [vmem:[#allocation11 + $0xa8] ss:$12 sps:$4 sm:$0xff]  }
  0xb8   :  { %710 = vmatpush1.bf16.msra.mxu0 %v3908_v48  ;;  %729 = vmatprep.mubr.bf16.mxu0 %v5809_v0  ;;  %v837_v48 = vld [vmem:[%s5796_s3] sm:$0xff] }
  0xb9   :  { %711 = vmatprep.subr.bf16.mxu0 %v3914_v49  ;;  %v4821_v49 = vadd.s32 4294967295, %v837_v48 }
  0xba   :  { %3480 = vmatpush3.bf16.msra.mxu1 %v3938_v53  ;;  %v183_v53 = vlaneseq }
  0xbb   :  { %3481 = vmatprep.subr.bf16.mxu1 %v3942_v56  ;;  %5887 = vst [vmem:[#allocation39_spill] sm:$0xff] %v4821_v49  ;;  %vm1404_vm5 = vcmp.eq.s32.totalorder %v4821_v49, 0  ;;  %vm1624_vm10 = vcmp.eq.s32.totalorder %v4821_v49, 1 }
  0xbc   :  { %712 = vmatpush1.bf16.msra.mxu0 %v3912_v51  ;;  %v1405_v51 = vsel %vm1404_vm5, 1, %v5809_v0 }
  0xbd   :  { %1049 = vmatprep.subr.bf16.mxu0 %v4637_v52 }
  0xbe   :  { %3482 = vmatpush3.bf16.msra.mxu1 %v3942_v56  ;;  %v184_v56 = vshrl.u32 %v183_v53, 7 }
  0xbf   :  { %730 = vmatmul.mubr.bf16.vlgmr.msra.gmra.mrb[16].mxu0 %v3916_v45  ;;  %3491 = vmatprep.subr.bf16.mxu1 %v5807_v1  ;;  %v2278_v45 = vsel %vm2277_vm3, 1, %v5809_v0 }
  0xc0   :  { %1050 = vmatpush1.bf16.msra.mxu0 %v4639_v54  ;;  %739 = vmatprep.mubr.bf16.mxu0 %v5809_v0  ;;  %v4887_v53 = vsub.s32 2, %v184_v56 }
  0xc1   :  { %1051 = vmatprep.subr.bf16.mxu0 %v4642_v55  ;;  %3484 = vmatmul.mubr.bf16.vlgmr.msra.gmra.mrb[8].mxu1 %v3925_v59 }
  0xc2   :  { %3492 = vmatpush3.bf16.msra.mxu1 %v4657_v62  ;;  %3487 = vmatprep.mubr.bf16.mxu1 %v3934_v2 }
  0xc3   :  { %3493 = vmatprep.subr.bf16.mxu1 %v5807_v1  ;;  %2280 = vperm.xlu0 %3852, %v2278_v45  }
  0xc4   :  { %1052 = vmatpush1.bf16.msra.mxu0 %v4645_v57 }
  0xc5   :  { %1053 = vmatprep.subr.bf16.mxu0 %v4649_v58 }
  0xc6   :  { %3494 = vmatpush3.bf16.msra.mxu1 %v4668_v4 }
  0xc7   :  { %740 = vmatmul.mubr.bf16.gmra.mrb[20].mxu0 %v3925_v59  ;;  %3495 = vmatprep.subr.bf16.mxu1 %v5807_v1  ;;  %v4867_v59 = vsub.s32 0, %v184_v56 }
  0xc8   :  { %1054 = vmatpush1.bf16.msra.mxu0 %v4652_v60  ;;  %749 = vmatprep.mubr.bf16.mxu0 %v5809_v0 }
  0xc9   :  { %1055 = vmatprep.subr.bf16.mxu0 %v4655_v61  ;;  %3488 = vmatmul.mubr.bf16.gmra.mrb[12].mxu1 %v3943_v7 }
  0xca   :  { %3496 = vmatpush3.bf16.msra.mxu1 %v4680_v9  ;;  %3507 = vmatprep.mubr.msk.bf16.mxu1 %vm4453_vm0, %v5807_v1 }
  0xcb   :  { %3497 = vmatprep.subr.bf16.mxu1 %v5807_v1  ;;  %2720 = vperm.xlu0 %3852, %v2718_v47  }
  0xcc   :  { %1056 = vmatpush1.bf16.msra.mxu0 %v4659_v63 }
  0xcd   :  { %1057 = vmatprep.subr.bf16.mxu0 %v4665_v3 }
  0xce   :  { %3498 = vmatpush3.bf16.msra.mxu1 %v4690_v12 }
  0xcf   :  { %750 = vmatmul.mubr.bf16.gmra.mrb[24].mxu0 %v3934_v2  ;;  %3499 = vmatprep.subr.bf16.mxu1 %v5807_v1  ;;  %v181_v2 = vld [vmem:[%s5799_s6] sm:$0x7] }
  0xd0   :  { %1058 = vmatpush1.bf16.msra.mxu0 %v4670_v5  ;;  %759 = vmatprep.mubr.bf16.mxu0 %v5809_v0  ;;  %v4877_v16 = vrot.slane %v181_v2, %v4867_v59 }
  0xd1   :  { %1059 = vmatprep.subr.bf16.mxu0 %v4674_v6  ;;  %1407 = vperm.xlu0 %3852, %v1405_v51  }
  0xd2   :  { %3500 = vmatpush3.bf16.msra.mxu1 %v4708_v17 }
  0xd3   :  { %3501 = vmatprep.subr.bf16.mxu1 %v5807_v1 }
  0xd4   :  { %1060 = vmatpush1.bf16.msra.mxu0 %v4677_v8 }
  0xd5   :  { %1061 = vmatprep.subr.bf16.mxu0 %v4682_v10 }
  0xd6   :  { %3502 = vmatpush3.bf16.msra.mxu1 %v4719_v20 }
  0xd7   :  { %760 = vmatmul.mubr.bf16.gmra.mrb[28].mxu0 %v3943_v7  ;;  %3503 = vmatprep.subr.bf16.mxu1 %v5807_v1  ;;  %v4872_v7 = vsub.s32 1, %v184_v56 }
  0xd8   :  { %1062 = vmatpush1.bf16.msra.mxu0 %v4695_v14  ;;  %1081 = vmatprep.mubr.bf16.mxu0 %v5809_v0 }
  0xd9   :  { %1063 = vmatprep.subr.bf16.mxu0 %v4701_v15  ;;  %v4882_v45 = vrot.slane %v181_v2, %v4872_v7 }
  0xda   :  { %3504 = vmatpush3.bf16.msra.mxu1 %v4729_v23 }
  0xdb   :  { %3505 = vmatprep.subr.bf16.mxu1 %v5807_v1 }
  0xdc   :  { %1064 = vmatpush1.bf16.msra.mxu0 %v4712_v18 }
  0xdd   :  { %1274 = vmatprep.subr.bf16.mxu0 %v4716_v19 }
  0xde   :  { %3506 = vmatpush3.bf16.msra.mxu1 %v4741_v26 }
  0xdf   :  { %1082 = vmatmul.mubr.bf16.vlgmr.msra.gmra.mrb[32].mxu0 %v5809_v0  ;;  %3511 = vmatprep.subr.bf16.mxu1 %v5807_v1 }
  0xe0   :  { %1275 = vmatpush1.bf16.msra.mxu0 %v4723_v21  ;;  %1306 = vmatprep.mubr.bf16.mxu0 %v5809_v0 }
  0xe1   :  { %1276 = vmatprep.subr.bf16.mxu0 %v4726_v22  ;;  %3508 = vmatmul.mubr.bf16.vlgmr.msra.gmra.mrb[16].mxu1 %v5809_v0 }
  0xe2   :  { %3512 = vmatpush3.bf16.msra.mxu1 %v4751_v29  ;;  %3527 = vmatprep.mubr.msk.bf16.mxu1 %vm4453_vm0, %v5807_v1 }
  0xe3   :  { %3513 = vmatprep.subr.bf16.mxu1 %v5807_v1 }
  0xe4   :  { %1277 = vmatpush1.bf16.msra.mxu0 %v4734_v24 }
  0xe5   :  { %1278 = vmatprep.subr.bf16.mxu0 %v4738_v25 }
  0xe6   :  { %3514 = vmatpush3.bf16.msra.mxu1 %v4762_v32 }
  0xe7   :  { %3515 = vmatprep.subr.bf16.mxu1 %v5807_v1 }
  0xe8   :  { %1279 = vmatpush1.bf16.msra.mxu0 %v4745_v27 }
  0xe9   :  { %1280 = vmatprep.subr.bf16.mxu0 %v4748_v28 }
  0xea   :  { %3516 = vmatpush3.bf16.msra.mxu1 %v4774_v35 }
  0xeb   :  { %3517 = vmatprep.subr.bf16.mxu1 %v5807_v1 }
  0xec   :  { %1281 = vmatpush1.bf16.msra.mxu0 %v4755_v30 }
  0xed   :  { %1282 = vmatprep.subr.bf16.mxu0 %v4758_v31 }
  0xee   :  { %3518 = vmatpush3.bf16.msra.mxu1 %v4784_v38 }
  0xef   :  { %3519 = vmatprep.subr.bf16.mxu1 %v5807_v1 }
  0xf0   :  { %1283 = vmatpush1.bf16.msra.mxu0 %v4768_v33 }
  0xf1   :  { %1284 = vmatprep.subr.bf16.mxu0 %v4771_v34 }
  0xf2   :  { %3520 = vmatpush3.bf16.msra.mxu1 %v4795_v41 }
  0xf3   :  { %3521 = vmatprep.subr.bf16.mxu1 %v5807_v1 }
  0xf4   :  { %1285 = vmatpush1.bf16.msra.mxu0 %v4778_v36 }
  0xf5   :  { %1286 = vmatprep.subr.bf16.mxu0 %v4781_v37 }
  0xf6   :  { %3522 = vmatpush3.bf16.msra.mxu1 %v4805_v44 }
  0xf7   :  { %3523 = vmatprep.subr.bf16.mxu1 %v5807_v1 }
  0xf8   :  { %1287 = vmatpush1.bf16.msra.mxu0 %v4788_v39 }
  0xf9   :  { %1288 = vmatprep.subr.bf16.mxu0 %v4791_v40 }
  0xfa   :  { %3524 = vmatpush3.bf16.msra.mxu1 %v4813_v46 }
  0xfb   :  { %3525 = vmatprep.subr.bf16.mxu1 %v5807_v1 }
  0xfc   :  { %1289 = vmatpush1.bf16.msra.mxu0 %v4800_v43 }
  0xfd   :  { %1412 = vmatprep.subr.bf16.mxu0 %v4637_v52 }
  0xfe   :  { %3526 = vmatpush3.bf16.msra.mxu1 %v4828_v50 }
  0xff   :  { %1307 = vmatmul.mubr.bf16.vlgmr.msra.gmra.mrb[36].mxu0 %v5809_v0  ;;  %3531 = vmatprep.subr.bf16.mxu1 %v5807_v1 }
 0x100   :  { %1413 = vmatpush1.bf16.msra.mxu0 %v4639_v54  ;;  %1444 = vmatprep.mubr.bf16.mxu0 %v5809_v0 }
 0x101   :  { %1414 = vmatprep.subr.bf16.mxu0 %v4642_v55  ;;  %3528 = vmatmul.mubr.bf16.vlgmr.msra.gmra.mrb[20].mxu1 %v5809_v0  ;;  %v4893_v0 = vrot.slane %v181_v2, %v4887_v53 }
 0x102   :  { %3532 = vmatpush3.bf16.msra.mxu1 %v4657_v62  ;;  %3547 = vmatprep.mubr.msk.bf16.mxu1 %vm4453_vm0, %v5807_v1 }
 0x103   :  { %3533 = vmatprep.subr.bf16.mxu1 %v5807_v1 }
 0x104   :  { %1415 = vmatpush1.bf16.msra.mxu0 %v4645_v57 }
 0x105   :  { %1416 = vmatprep.subr.bf16.mxu0 %v4649_v58 }
 0x106   :  { %3534 = vmatpush3.bf16.msra.mxu1 %v4668_v4 }
 0x107   :  { %3535 = vmatprep.subr.bf16.mxu1 %v5807_v1 }
 0x108   :  { %1417 = vmatpush1.bf16.msra.mxu0 %v4652_v60 }
 0x109   :  { %1418 = vmatprep.subr.bf16.mxu0 %v4655_v61 }
 0x10a   :  { %3536 = vmatpush3.bf16.msra.mxu1 %v4680_v9 }
 0x10b   :  { %3537 = vmatprep.subr.bf16.mxu1 %v5807_v1 }
 0x10c   :  { %1419 = vmatpush1.bf16.msra.mxu0 %v4659_v63 }
 0x10d   :  { %1420 = vmatprep.subr.bf16.mxu0 %v4665_v3 }
 0x10e   :  { %3538 = vmatpush3.bf16.msra.mxu1 %v4690_v12 }
 0x10f   :  { %3539 = vmatprep.subr.bf16.mxu1 %v5807_v1 }
 0x110   :  { %1421 = vmatpush1.bf16.msra.mxu0 %v4670_v5 }
 0x111   :  { %1422 = vmatprep.subr.bf16.mxu0 %v4674_v6 }
 0x112   :  { %3540 = vmatpush3.bf16.msra.mxu1 %v4708_v17 }
 0x113   :  { %3541 = vmatprep.subr.bf16.mxu1 %v5807_v1 }
 0x114   :  { %1423 = vmatpush1.bf16.msra.mxu0 %v4677_v8 }
 0x115   :  { %1424 = vmatprep.subr.bf16.mxu0 %v4682_v10 }
 0x116   :  { %3542 = vmatpush3.bf16.msra.mxu1 %v4719_v20 }
 0x117   :  { %3543 = vmatprep.subr.bf16.mxu1 %v5807_v1 }
 0x118   :  { %1425 = vmatpush1.bf16.msra.mxu0 %v4695_v14 }
 0x119   :  { %1426 = vmatprep.subr.bf16.mxu0 %v4701_v15 }
 0x11a   :  { %3544 = vmatpush3.bf16.msra.mxu1 %v4729_v23 }
 0x11b   :  { %3545 = vmatprep.subr.bf16.mxu1 %v5807_v1 }
 0x11c   :  { %1427 = vmatpush1.bf16.msra.mxu0 %v4712_v18 }
 0x11d   :  { %1494 = vmatprep.subr.bf16.mxu0 %v4716_v19 }
 0x11e   :  { %3546 = vmatpush3.bf16.msra.mxu1 %v4741_v26 }
 0x11f   :  { %3551 = vmatprep.subr.bf16.mxu1 %v5807_v1 }
 0x172   :  { %v4874_v11 = vpop.f32.mrb[0].mxu0 }
 0x173   :  { %v4879_v42 = vpop.f32.mrb[1].mxu0 }
 0x174   :  { %v388_v47 = vpop.f32.mrb[2].mxu0 }
 0x175   :  { %v4885_v48 = vadd.f32 %v388_v47, %v4877_v16  ;;  %v390_v51 = vpop.f32.mrb[3].mxu0  ;;  %v3461_v47 = vpop.f32.mrb[0].mxu1 }
 0x176   :  { %v4890_v1 = vadd.f32 %v390_v51, %v4882_v45  ;;  %v4905_v51 = vadd.f32 %v3461_v47, %v4893_v0 }
 0x177   :  { %5888 = vst [vmem:[#allocation40_spill] sm:$0xff] %v4885_v48 }
 0x178   :  { %5889 = vst [vmem:[#allocation41_spill] sm:$0xff] %v4890_v1  ;;  %5893 = vst [vmem:[#allocation45_spill] sm:$0xff] %v4905_v51  ;;  %v4907_v1 = vpop.f32.mrb[1].mxu1 }
 0x17a   :  { %v394_v19 = vpop.f32.mrb[4].mxu0 }
 0x17b   :  { %v4896_v26 = vadd.f32 %v394_v19, %v4877_v16  ;;  %v396_v18 = vpop.f32.mrb[5].mxu0  ;;  %v3462_v19 = vpop.f32.mrb[2].mxu1 }
 0x17c   :  { %v4899_v15 = vadd.f32 %v396_v18, %v4882_v45  ;;  %v398_v23 = vpop.f32.mrb[6].mxu0  ;;  %v460_v18 = vpop.f32.mrb[3].mxu1 }
 0x17d   :  { %5890 = vst [vmem:[#allocation42_spill] sm:$0xff] %v4896_v26  ;;  %v4902_v48 = vadd.f32 %v398_v23, %v4877_v16  ;;  %v400_v56 = vpop.f32.mrb[7].mxu0  ;;  %v4913_v26 = vadd.f32 %v3462_v19, %v4893_v0  ;;  %v3465_v10 = vpop.f32.mrb[4].mxu1 }
 0x17e   :  { %5891 = vst [vmem:[#allocation43_spill] sm:$0xff] %v4899_v15  ;;  %v4910_v2 = vadd.f32 %v400_v56, %v4882_v45  ;;  %v4916_v15 = vadd.f32 %v460_v18, %v4893_v0  ;;  %v4928_v19 = vadd.f32 %v3465_v10, %v4893_v0 }
 0x17f   :  { %5892 = vst [vmem:[#allocation44_spill] sm:$0xff] %v4902_v48  ;;  %5895 = vst [vmem:[#allocation47_spill] sm:$0xff] %v4913_v26  ;;  %v473_v26 = vpop.f32.mrb[5].mxu1 }
 0x180   :  { %5894 = vst [vmem:[#allocation46_spill] sm:$0xff] %v4910_v2  ;;  %5896 = vst [vmem:[#allocation48_spill] sm:$0xff] %v4916_v15 }
 0x181   :  { %5900 = vst [vmem:[#allocation52_spill] sm:$0xff] %v4928_v19 }
 0x182   :  { %v404_v14 = vpop.f32.mrb[8].mxu0 }
 0x183   :  { %v4919_v23 = vadd.f32 %v404_v14, %v4877_v16  ;;  %v406_v48 = vpop.f32.mrb[9].mxu0  ;;  %v4934_v14 = vadd.f32 %v473_v26, %v4893_v0 }
 0x184   :  { %v4922_v47 = vadd.f32 %v406_v48, %v4882_v45  ;;  %v408_v51 = vpop.f32.mrb[10].mxu0 }
 0x185   :  { %5897 = vst [vmem:[#allocation49_spill] sm:$0xff] %v4919_v23  ;;  %v4925_v56 = vadd.f32 %v408_v51, %v4877_v16  ;;  %v410_v2 = vpop.f32.mrb[11].mxu0  ;;  %5902 = vst [vmem:[#allocation54_spill] sm:$0xff] %v4934_v14  ;;  %v3466_v23 = vpop.f32.mrb[6].mxu1 }
 0x186   :  { %5898 = vst [vmem:[#allocation50_spill] sm:$0xff] %v4922_v47  ;;  %v4931_v18 = vadd.f32 %v410_v2, %v4882_v45  ;;  %v4939_v48 = vadd.f32 %v3466_v23, %v4893_v0  ;;  %v476_v51 = vpop.f32.mrb[7].mxu1 }
 0x187   :  { %5899 = vst [vmem:[#allocation51_spill] sm:$0xff] %v4925_v56  ;;  %v5904_v56 = vmov 0   ;;  %v4943_v10 = vadd.f32 %v476_v51, %v4893_v0 }
 0x188   :  { %5901 = vst [vmem:[#allocation53_spill] sm:$0xff] %v4931_v18  ;;  %5903 = vst [vmem:[#allocation55_spill] sm:$0xff] %v4939_v48  ;;  %v1838_v47 = vsel %vm1837_vm6, 1, %v5904_v56  ;;  %v2058_v2 = vsel %vm2057_vm7, 1, %v5904_v56 }
 0x189   :  { %5905 = vst [vmem:[#allocation56_spill] sm:$0xff] %v4943_v10  ;;  %1840 = vperm.xlu1 %3853, %v1838_v47   ;;  %v2498_v47 = vsel %vm2497_vm8, 1, %v5904_v56 }
 0x18a   :  { %v414_v19 = vpop.f32.mrb[12].mxu0 }
 0x18b   :  { %v4948_v26 = vadd.f32 %v414_v19, %v4877_v16  ;;  %v416_v18 = vpop.f32.mrb[13].mxu0  ;;  %v528_v19 = vld [vmem:[%s5803_s10] sm:$0x7] }
 0x18c   :  { %v4951_v14 = vadd.f32 %v416_v18, %v4882_v45  ;;  %v418_v23 = vpop.f32.mrb[14].mxu0  ;;  %v2938_v18 = vsel %vm2937_vm9, 1, %v5904_v56  ;;  %v4984_v15 = vrot.slane %v528_v19, %v4887_v53 }
 0x18d   :  { %5906 = vst [vmem:[#allocation57_spill] sm:$0xff] %v4948_v26  ;;  %2060 = vperm.xlu1 %3853, %v2058_v2   ;;  %v4954_v48 = vadd.f32 %v418_v23, %v4877_v16  ;;  %v420_v51 = vpop.f32.mrb[15].mxu0  ;;  %v4969_v2 = vrot.slane %v528_v19, %v4867_v59 }
 0x18e   :  { %5907 = vst [vmem:[#allocation58_spill] sm:$0xff] %v4951_v14  ;;  %v4958_v10 = vadd.f32 %v420_v51, %v4882_v45  ;;  %v4974_v51 = vrot.slane %v528_v19, %v4872_v7 }
 0x18f   :  { %5908 = vst [vmem:[#allocation59_spill] sm:$0xff] %v4954_v48  ;;  %v1625_v48 = vsel %vm1624_vm10, 1, %v5904_v56 }
 0x190   :  { %5909 = vst [vmem:[#allocation60_spill] sm:$0xff] %v4958_v10 }
 0x191   :  { %2500 = vperm.xlu1 %3853, %v2498_v47  }
 0x192   :  { %v4965_v14 = vpop.f32.mrb[16].mxu0 }
 0x193   :  { %v4971_v23 = vpop.f32.mrb[17].mxu0 }
 0x194   :  { %v735_v13 = vpop.f32.mrb[18].mxu0 }
 0x195   :  { %2940 = vperm.xlu1 %3853, %v2938_v18   ;;  %v4977_v10 = vadd.f32 %v735_v13, %v4969_v2  ;;  %v737_v47 = vpop.f32.mrb[19].mxu0 }
 0x196   :  { %v4981_v26 = vadd.f32 %v737_v47, %v4974_v51 }
 0x197   :  { %5910 = vst [vmem:[#allocation61_spill] sm:$0xff] %v4977_v10  ;;  %v3485_v10 = vpop.f32.mrb[8].mxu1 }
 0x198   :  { %5911 = vst [vmem:[#allocation62_spill] sm:$0xff] %v4981_v26  ;;  %v4996_v47 = vadd.f32 %v3485_v10, %v4984_v15 }
 0x199   :  { %1627 = vperm.xlu1 %3853, %v1625_v48   ;;  %v4998_v48 = vpop.f32.mrb[9].mxu1 }
 0x19a   :  { %v741_v49 = vpop.f32.mrb[20].mxu0  ;;  %5915 = vst [vmem:[#allocation66_spill] sm:$0xff] %v4996_v47 }
 0x19b   :  { %v4987_v20 = vadd.f32 %v741_v49, %v4969_v2  ;;  %v743_v8 = vpop.f32.mrb[21].mxu0  ;;  %v3486_v49 = vpop.f32.mrb[10].mxu1 }
 0x19c   :  { %v4990_v18 = vadd.f32 %v743_v8, %v4974_v51  ;;  %v745_v13 = vpop.f32.mrb[22].mxu0  ;;  %v807_v8 = vpop.f32.mrb[11].mxu1 }
 0x19d   :  { %5912 = vst [vmem:[#allocation63_spill] sm:$0xff] %v4987_v20  ;;  %v4993_v6 = vadd.f32 %v745_v13, %v4969_v2  ;;  %v747_v17 = vpop.f32.mrb[23].mxu0  ;;  %v5004_v20 = vadd.f32 %v3486_v49, %v4984_v15  ;;  %v3489_v5 = vpop.f32.mrb[12].mxu1 }
 0x19e   :  { %5913 = vst [vmem:[#allocation64_spill] sm:$0xff] %v4990_v18  ;;  %v5001_v19 = vadd.f32 %v747_v17, %v4974_v51  ;;  %v5007_v18 = vadd.f32 %v807_v8, %v4984_v15  ;;  %v5019_v49 = vadd.f32 %v3489_v5, %v4984_v15 }
 0x19f   :  { %5914 = vst [vmem:[#allocation65_spill] sm:$0xff] %v4993_v6  ;;  %5917 = vst [vmem:[#allocation68_spill] sm:$0xff] %v5004_v20  ;;  %v820_v20 = vpop.f32.mrb[13].mxu1 }
 0x1a0   :  { %5916 = vst [vmem:[#allocation67_spill] sm:$0xff] %v5001_v19  ;;  %5918 = vst [vmem:[#allocation69_spill] sm:$0xff] %v5007_v18 }
 0x1a1   :  { %5922 = vst [vmem:[#allocation73_spill] sm:$0xff] %v5019_v49 }
 0x1a2   :  { %v751_v26 = vpop.f32.mrb[24].mxu0 }
 0x1a3   :  { %v5010_v13 = vadd.f32 %v751_v26, %v4969_v2  ;;  %v753_v6 = vpop.f32.mrb[25].mxu0  ;;  %v5025_v26 = vadd.f32 %v820_v20, %v4984_v15  ;;  %v903_v20 = vld [vmem:[%s5800_s7] sm:$0x7] }
 0x1a4   :  { %v5013_v10 = vadd.f32 %v753_v6, %v4974_v51  ;;  %v755_v47 = vpop.f32.mrb[26].mxu0 }
 0x1a5   :  { %5919 = vst [vmem:[#allocation70_spill] sm:$0xff] %v5010_v13  ;;  %v5016_v17 = vadd.f32 %v755_v47, %v4969_v2  ;;  %v757_v19 = vpop.f32.mrb[27].mxu0  ;;  %5924 = vst [vmem:[#allocation75_spill] sm:$0xff] %v5025_v26  ;;  %v3490_v13 = vpop.f32.mrb[14].mxu1 }
 0x1a6   :  { %5920 = vst [vmem:[#allocation71_spill] sm:$0xff] %v5013_v10  ;;  %v5022_v8 = vadd.f32 %v757_v19, %v4974_v51  ;;  %v5028_v6 = vadd.f32 %v3490_v13, %v4984_v15  ;;  %v823_v10 = vpop.f32.mrb[15].mxu1 }
 0x1a7   :  { %5921 = vst [vmem:[#allocation72_spill] sm:$0xff] %v5016_v17  ;;  %v5031_v18 = vadd.f32 %v823_v10, %v4984_v15 }
 0x1a8   :  { %5923 = vst [vmem:[#allocation74_spill] sm:$0xff] %v5022_v8  ;;  %5925 = vst [vmem:[#allocation76_spill] sm:$0xff] %v5028_v6 }
 0x1a9   :  { %5926 = vst [vmem:[#allocation77_spill] sm:$0xff] %v5031_v18  ;;  %v5049_v18 = vrot.slane %v903_v20, %v4867_v59 }
 0x1aa   :  { %v761_v47 = vpop.f32.mrb[28].mxu0 }
 0x1ab   :  { %v5034_v17 = vadd.f32 %v761_v47, %v4969_v2  ;;  %v763_v5 = vpop.f32.mrb[29].mxu0  ;;  %5931 = vst [vmem:[#allocation82_spill] sm:$0xff] %v5049_v18  ;;  %v5052_v47 = vrot.slane %v903_v20, %v4872_v7 }
 0x1ac   :  { %v5037_v49 = vadd.f32 %v763_v5, %v4974_v51  ;;  %v765_v19 = vpop.f32.mrb[30].mxu0 }
 0x1ad   :  { %5927 = vst [vmem:[#allocation78_spill] sm:$0xff] %v5034_v17  ;;  %v5043_v13 = vadd.f32 %v765_v19, %v4969_v2  ;;  %v767_v6 = vpop.f32.mrb[31].mxu0  ;;  %v387_v19 = vadd.f32 %v4879_v42, %v4882_v45  ;;  %v904_v45 = vld [vmem:[%s5804_s11] sm:$0x7]  ;;  %s4454_s11 = smov [#allocation14]  }
 0x1ae   :  { %5928 = vst [vmem:[#allocation79_spill] sm:$0xff] %v5037_v49  ;;  %v5046_v10 = vadd.f32 %v767_v6, %v4974_v51  ;;  %v385_v49 = vadd.f32 %v4874_v11, %v4877_v16  ;;  %s3106_s23 = sshll.u32 %s4454_s11, 4  ;;  %s3107_s23 = int_to_ptr.vmem [resolvable:$true] %s3106_s23 }
 0x1af   :  { %5929 = vst [vmem:[#allocation80_spill] sm:$0xff] %v5043_v13  ;;  %s4408_s16 = scalar_lea.vmem %s3107_s23, 128  ;;  %p4413_p1 = scmp.lt.s32.totalorder %s3107_s23, %s3107_s23 }
 0x1b0   :  { %5930 = vst [vmem:[#allocation81_spill] sm:$0xff] %v5046_v10  ;;  %p4409_p0 = scmp.ne.s32.totalorder %s3107_s23, %s4408_s16  ;;  %p4414_p2 = scmp.lt.s32.totalorder %s4408_s16, %s4408_s16 }
 0x1b2   :  { %v1083_v5 = vpop.f32.mrb[32].mxu0  ;;  %p4415_p3 = por %p4414_p2, %p4413_p1 }
 0x1b3   :  { %v1084_v17 = vadd.f32 %v1083_v5, %v5049_v18  ;;  %v1085_v8 = vpop.f32.mrb[33].mxu0  ;;  %v5061_v5 = vrot.slane %v903_v20, %v4887_v53 }
 0x1b4   :  { %v1086_v13 = vadd.f32 %v1085_v8, %v5052_v47  ;;  %v1087_v6 = vpop.f32.mrb[34].mxu0  ;;  %v1124_v61 = vpop.f32.mrb[16].mxu1  ;;  %v732_v8 = vadd.f32 %v4965_v14, %v4969_v2  ;;  %p4416_p4 = pnand %p4415_p3, %p4409_p0 }
 0x1b5   :  { %v1355_v10 = vadd.f32 %v1084_v17, %v385_v49  ;;  %v1088_v26 = vpop.f32.mrb[35].mxu0  ;;  %v3509_v9 = vpop.f32.mrb[17].mxu1  ;;  %5932 = vst [vmem:[#allocation83_spill] sm:$0xff] %v5061_v5 }
 0x1b6   :  { %v1362_v3 = vadd.f32 %v1086_v13, %v387_v19  ;;  %v1127_v60 = vpop.f32.mrb[18].mxu1 }
 0x1b7   :  { %v3224_v12 = vmul.f32 -1.442695, %v1355_v10  ;;  %v3510_v58 = vpop.f32.mrb[19].mxu1 }
 0x1b8   :  { %v3225_v63 = vmul.f32 -1.442695, %v1362_v3  ;;  %v5068_v3 = vrot.slane %v904_v45, %v4867_v59  ;;  %v5071_v58 = vrot.slane %v904_v45, %v4872_v7  ;;  %v734_v59 = vadd.f32 %v4971_v23, %v4974_v51 }
 0x1b9   :  { %3998 = vpow2.f32 %v3224_v12  ;;  %v1125_v12 = vadd.f32 %v1124_v61, %v5061_v5 }
 0x1ba   :  { %4000 = vpow2.f32 %v3225_v63  ;;  %v458_v63 = vadd.f32 %v4907_v1, %v4893_v0 }
 0x1c3   :  { %v3999_v11 = vpop.eup %3998 }
 0x1c4   :  { %v1359_v16 = vadd.f32 1.0, %v3999_v11  ;;  %v4001_v42 = vpop.eup %4000 }
 0x1c5   :  { %v1366_v17 = vadd.f32 1.0, %v4001_v42 }
 0x1c6   :  { %4002 = vrcp.f32 %v1359_v16 }
 0x1c7   :  { %4004 = vrcp.f32 %v1366_v17 }
 0x1d0   :  { %v4003_v60 = vpop.eup %4002 }
 0x1d1   :  { %v1369_v9 = vmul.f32 %v4003_v60, %v1125_v12  ;;  %v4005_v6 = vpop.eup %4004 }
 0x1d2   :  { %v1308_v49 = vpop.f32.mrb[36].mxu0  ;;  %v1372_v2 = vsub.f32 1.0, %v4005_v6  ;;  %v1374_v23 = vmul.f32 0.0, %v4005_v6 }
 0x1d3   :  { %v1370_v26 = vadd.f32 %v1369_v9, %v458_v63  ;;  %v1309_v20 = vadd.f32 %v1308_v49, %v5068_v3  ;;  %v1310_v61 = vpop.f32.mrb[37].mxu0 }
 0x1d4   :  { %v1311_v13 = vadd.f32 %v1310_v61, %v5071_v58  ;;  %v1312_v7 = vpop.f32.mrb[38].mxu0  ;;  %v1349_v16 = vpop.f32.mrb[20].mxu1 }
 0x1d5   :  { %4006 = vtanh.f32 %v1370_v26  ;;  %v1376_v10 = vadd.f32 %v1309_v20, %v732_v8  ;;  %v1313_v19 = vpop.f32.mrb[39].mxu0  ;;  %v3529_v14 = vpop.f32.mrb[21].mxu1  ;;  %v5934_v8 = vmov 0.0   ;;  %v5090_v26 = vrot.slane %v904_v45, %v4887_v53 }
 0x1d6   :  { %v1383_v0 = vadd.f32 %v1311_v13, %v734_v59  ;;  %v1352_v42 = vpop.f32.mrb[22].mxu1  ;;  %v805_v45 = vadd.f32 %v4998_v48, %v4984_v15  ;;  %v5942_v14 = vld [vmem:[#allocation24_spill] sm:$0xff] }
 0x1d7   :  { %v3226_v1 = vmul.f32 -1.442695, %v1376_v10  ;;  %v3530_v12 = vpop.f32.mrb[23].mxu1  ;;  %v1350_v59 = vadd.f32 %v1349_v16, %v5090_v26  ;;  %v5941_v16 = vld [vmem:[#allocation30_spill] sm:$0xff]  ;;  %v5946_v42 = vld [vmem:[#allocation27_spill] sm:$0xff] }
 0x1d8   :  { %v3227_v11 = vmul.f32 -1.442695, %v1383_v0  ;;  %v5948_v12 = vld [vmem:[#allocation29_spill] sm:$0xff] }
 0x1d9   :  { %4008 = vpow2.f32 %v3226_v1 }
 0x1da   :  { %4010 = vpow2.f32 %v3227_v11  ;;  %v5940_v11 = vld [vmem:[#allocation23_spill] sm:$0xff] }
 0x1df   :  { %v4007_v17 = vpop.eup %4006 }
 0x1e0   :  { %v1373_v60 = vmul.f32 %v4007_v17, %v1372_v2  ;;  %v5945_v2 = vld [vmem:[#allocation26_spill] sm:$0xff]  ;;  %v5947_v17 = vld [vmem:[#allocation36_spill] sm:$0xff] }
 0x1e2   :  { %v5081_v51 = vadd.f32 %v1374_v23, %v1373_v60  ;;  %v5949_v60 = vld [vmem:[#allocation31_spill] sm:$0xff]  ;;  %v5950_v23 = vld [vmem:[#allocation37_spill] sm:$0xff] }
 0x1e3   :  { %v4009_v63 = vpop.eup %4008 }
 0x1e4   :  { %5933 = vst [vmem:[#allocation84_spill] sm:$0xff] %v5081_v51  ;;  %v1380_v9 = vadd.f32 1.0, %v4009_v63  ;;  %v1411_v49 = vpack.c.bf16 %v5081_v51, %v5081_v51  ;;  %v4011_v20 = vpop.eup %4010  ;;  %v5951_v63 = vld [vmem:[#allocation32_spill] sm:$0xff] }
 0x1e5   :  { %v1387_v61 = vadd.f32 1.0, %v4011_v20  ;;  %v5954_v20 = vld [vmem:[#allocation35_spill] sm:$0xff] }
 0x1e6   :  { %4012 = vrcp.f32 %v1380_v9  ;;  %1445 = vmatmul.mubr.bf16.vlgmr.msra.gmra.mrb[40].mxu0 %v1411_v49  ;;  %3548 = vmatmul.mubr.bf16.vlgmr.msra.gmra.mrb[24].mxu1 %v1411_v49  ;;  %v5952_v9 = vld [vmem:[#allocation34_spill] sm:$0xff] }
 0x1e7   :  { %1495 = vmatpush1.bf16.msra.mxu0 %v4723_v21  ;;  %3552 = vmatpush3.bf16.msra.mxu1 %v4751_v29  ;;  %4014 = vrcp.f32 %v1387_v61  ;;  %v5953_v49 = vld [vmem:[#allocation38_spill] sm:$0xff]  ;;  %v5955_v61 = vld [vmem:[#allocation39_spill] sm:$0xff] }
 0x1e8   :  { %1496 = vmatprep.subr.bf16.mxu0 %v4726_v22  ;;  %3553 = vmatprep.subr.bf16.mxu1 %v5934_v8  ;;  %vm1844_vm11 = vcmp.eq.s32.totalorder %v5955_v61, 2  ;;  %vm2064_vm12 = vcmp.eq.s32.totalorder %v5955_v61, 3  ;;  %vm2284_vm13 = vcmp.eq.s32.totalorder %v5955_v61, 4 }
 0x1e9   :  { %1526 = vmatprep.mubr.bf16.mxu0 %v5904_v56  ;;  %3567 = vmatprep.mubr.msk.bf16.mxu1 %vm4453_vm0, %v5934_v8 }
 0x1eb   :  { %1497 = vmatpush1.bf16.msra.mxu0 %v4734_v24  ;;  %3554 = vmatpush3.bf16.msra.mxu1 %v4762_v32 }
 0x1ec   :  { %1498 = vmatprep.subr.bf16.mxu0 %v4738_v25  ;;  %3555 = vmatprep.subr.bf16.mxu1 %v5934_v8 }
 0x1ef   :  { %1499 = vmatpush1.bf16.msra.mxu0 %v4745_v27  ;;  %3556 = vmatpush3.bf16.msra.mxu1 %v4774_v35 }
 0x1f0   :  { %v4013_v53 = vpop.eup %4012  ;;  %1500 = vmatprep.subr.bf16.mxu0 %v4748_v28  ;;  %3557 = vmatprep.subr.bf16.mxu1 %v5934_v8 }
 0x1f1   :  { %v1390_v13 = vmul.f32 %v4013_v53, %v1350_v59  ;;  %v4015_v15 = vpop.eup %4014  ;;  %v1845_v59 = vsel %vm1844_vm11, 1, %v5904_v56 }
 0x1f2   :  { %v1393_v48 = vsub.f32 1.0, %v4015_v15  ;;  %v1395_v0 = vmul.f32 0.0, %v4015_v15  ;;  %1847 = vperm.xlu0 %3852, %v1845_v59  }
 0x1f3   :  { %v1391_v7 = vadd.f32 %v1390_v13, %v805_v45  ;;  %1501 = vmatpush1.bf16.msra.mxu0 %v4755_v30  ;;  %3558 = vmatpush3.bf16.msra.mxu1 %v4784_v38 }
 0x1f4   :  { %1502 = vmatprep.subr.bf16.mxu0 %v4758_v31  ;;  %3559 = vmatprep.subr.bf16.mxu1 %v5934_v8 }
 0x1f5   :  { %4016 = vtanh.f32 %v1391_v7 }
 0x1f7   :  { %1503 = vmatpush1.bf16.msra.mxu0 %v4768_v33  ;;  %3560 = vmatpush3.bf16.msra.mxu1 %v4795_v41 }
 0x1f8   :  { %1504 = vmatprep.subr.bf16.mxu0 %v4771_v34  ;;  %3561 = vmatprep.subr.bf16.mxu1 %v5934_v8 }
 0x1fb   :  { %1505 = vmatpush1.bf16.msra.mxu0 %v4778_v36  ;;  %3562 = vmatpush3.bf16.msra.mxu1 %v4805_v44 }
 0x1fc   :  { %1506 = vmatprep.subr.bf16.mxu0 %v4781_v37  ;;  %3563 = vmatprep.subr.bf16.mxu1 %v5934_v8 }
 0x1ff   :  { %v4017_v10 = vpop.eup %4016  ;;  %1507 = vmatpush1.bf16.msra.mxu0 %v4788_v39  ;;  %3564 = vmatpush3.bf16.msra.mxu1 %v4813_v46 }
 0x200   :  { %v1394_v19 = vmul.f32 %v4017_v10, %v1393_v48  ;;  %1508 = vmatprep.subr.bf16.mxu0 %v4791_v40  ;;  %3565 = vmatprep.subr.bf16.mxu1 %v5934_v8 }
 0x202   :  { %v5122_v1 = vadd.f32 %v1395_v0, %v1394_v19  ;;  %v5956_v0 = vld [vmem:[#allocation40_spill] sm:$0xff] }
 0x203   :  { %1509 = vmatpush1.bf16.msra.mxu0 %v4800_v43  ;;  %3566 = vmatpush3.bf16.msra.mxu1 %v4828_v50 }
 0x204   :  { %5935 = vst [vmem:[#allocation85_spill] sm:$0xff] %v5122_v1  ;;  %v1493_v6 = vpack.c.bf16 %v5122_v1, %v5122_v1  ;;  %1632 = vmatprep.subr.bf16.mxu0 %v4637_v52  ;;  %3571 = vmatprep.subr.bf16.mxu1 %v5934_v8  ;;  %v5936_v52 = vld [vmem:[#allocation20_spill] sm:$0xff] }
 0x206   :  { %1527 = vmatmul.mubr.bf16.vlgmr.msra.gmra.mrb[44].mxu0 %v1493_v6  ;;  %3568 = vmatmul.mubr.bf16.vlgmr.msra.gmra.mrb[28].mxu1 %v1493_v6 }
 0x207   :  { %1633 = vmatpush1.bf16.msra.mxu0 %v4639_v54  ;;  %3572 = vmatpush3.bf16.msra.mxu1 %v4657_v62  ;;  %v5937_v54 = vld [vmem:[#allocation21_spill] sm:$0xff]  ;;  %v5938_v62 = vld [vmem:[#allocation28_spill] sm:$0xff] }
 0x208   :  { %1634 = vmatprep.subr.bf16.mxu0 %v4642_v55  ;;  %3573 = vmatprep.subr.bf16.mxu1 %v5934_v8  ;;  %v5939_v55 = vld [vmem:[#allocation22_spill] sm:$0xff] }
 0x209   :  { %1664 = vmatprep.mubr.bf16.mxu0 %v5904_v56  ;;  %3587 = vmatprep.mubr.msk.bf16.mxu1 %vm4453_vm0, %v5934_v8 }
 0x20b   :  { %1635 = vmatpush1.bf16.msra.mxu0 %v4645_v57  ;;  %3574 = vmatpush3.bf16.msra.mxu1 %v4668_v4  ;;  %v5943_v57 = vld [vmem:[#allocation25_spill] sm:$0xff] }
 0x20c   :  { %1636 = vmatprep.subr.bf16.mxu0 %v5936_v52  ;;  %3575 = vmatprep.subr.bf16.mxu1 %v5934_v8  ;;  %v5944_v4 = vld [vmem:[#allocation33_spill] sm:$0xff] }
 0x20f   :  { %1637 = vmatpush1.bf16.msra.mxu0 %v5937_v54  ;;  %3576 = vmatpush3.bf16.msra.mxu1 %v5938_v62  ;;  %v5957_v62 = vld [vmem:[#allocation41_spill] sm:$0xff] }
 0x210   :  { %1638 = vmatprep.subr.bf16.mxu0 %v5939_v55  ;;  %3577 = vmatprep.subr.bf16.mxu1 %v5934_v8 }
 0x213   :  { %1639 = vmatpush1.bf16.msra.mxu0 %v5940_v11  ;;  %3578 = vmatpush3.bf16.msra.mxu1 %v5941_v16 }
 0x214   :  { %1640 = vmatprep.subr.bf16.mxu0 %v5942_v14  ;;  %3579 = vmatprep.subr.bf16.mxu1 %v5934_v8 }
 0x217   :  { %1641 = vmatpush1.bf16.msra.mxu0 %v5943_v57  ;;  %3580 = vmatpush3.bf16.msra.mxu1 %v5944_v4 }
 0x218   :  { %1642 = vmatprep.subr.bf16.mxu0 %v5945_v2  ;;  %3581 = vmatprep.subr.bf16.mxu1 %v5934_v8 }
 0x21b   :  { %1643 = vmatpush1.bf16.msra.mxu0 %v5946_v42  ;;  %3582 = vmatpush3.bf16.msra.mxu1 %v5947_v17 }
 0x21c   :  { %1644 = vmatprep.subr.bf16.mxu0 %v5948_v12  ;;  %3583 = vmatprep.subr.bf16.mxu1 %v5934_v8 }
 0x21f   :  { %1645 = vmatpush1.bf16.msra.mxu0 %v5949_v60  ;;  %3584 = vmatpush3.bf16.msra.mxu1 %v5950_v23 }
 0x220   :  { %1646 = vmatprep.subr.bf16.mxu0 %v5951_v63  ;;  %3585 = vmatprep.subr.bf16.mxu1 %v5934_v8  ;;  %v5958_v63 = vld [vmem:[#allocation48_spill] sm:$0xff] }
 0x223   :  { %1647 = vmatpush1.bf16.msra.mxu0 %v5952_v9  ;;  %3586 = vmatpush3.bf16.msra.mxu1 %v5953_v49 }
 0x224   :  { %1714 = vmatprep.subr.bf16.mxu0 %v5954_v20  ;;  %3591 = vmatprep.subr.bf16.mxu1 %v5934_v8 }
 0x2b9   :  { %v1446_v53 = vpop.f32.mrb[40].mxu0  ;;  %v1487_v45 = vpop.f32.mrb[24].mxu1 }
 0x2ba   :  { %v1447_v13 = vadd.f32 %v1446_v53, %v5049_v18  ;;  %v1448_v7 = vpop.f32.mrb[41].mxu0  ;;  %v3549_v15 = vpop.f32.mrb[25].mxu1  ;;  %v1488_v42 = vadd.f32 %v1487_v45, %v5061_v5 }
 0x2bb   :  { %v1449_v48 = vadd.f32 %v1448_v7, %v5052_v47  ;;  %v1450_v10 = vpop.f32.mrb[42].mxu0  ;;  %v1490_v19 = vpop.f32.mrb[26].mxu1  ;;  %v5959_v15 = vld [vmem:[#allocation61_spill] sm:$0xff] }
 0x2bc   :  { %v1575_v6 = vadd.f32 %v1447_v13, %v5956_v0  ;;  %v1451_v52 = vpop.f32.mrb[43].mxu0  ;;  %v3550_v54 = vpop.f32.mrb[27].mxu1  ;;  %v5960_v19 = vld [vmem:[#allocation62_spill] sm:$0xff] }
 0x2bd   :  { %v1582_v55 = vadd.f32 %v1449_v48, %v5957_v62 }
 0x2be   :  { %v3228_v11 = vmul.f32 -1.442695, %v1575_v6 }
 0x2bf   :  { %v3229_v16 = vmul.f32 -1.442695, %v1582_v55 }
 0x2c0   :  { %4018 = vpow2.f32 %v3228_v11 }
 0x2c1   :  { %4020 = vpow2.f32 %v3229_v16 }
 0x2ca   :  { %v4019_v14 = vpop.eup %4018 }
 0x2cb   :  { %v1579_v57 = vadd.f32 1.0, %v4019_v14  ;;  %v4021_v4 = vpop.eup %4020 }
 0x2cc   :  { %v1586_v2 = vadd.f32 1.0, %v4021_v4 }
 0x2cd   :  { %4022 = vrcp.f32 %v1579_v57 }
 0x2ce   :  { %4024 = vrcp.f32 %v1586_v2 }
 0x2d7   :  { %v4023_v17 = vpop.eup %4022 }
 0x2d8   :  { %v1589_v12 = vmul.f32 %v4023_v17, %v1488_v42  ;;  %v4025_v52 = vpop.eup %4024 }
 0x2d9   :  { %v1528_v60 = vpop.f32.mrb[44].mxu0  ;;  %v1569_v23 = vpop.f32.mrb[28].mxu1  ;;  %v1592_v62 = vsub.f32 1.0, %v4025_v52  ;;  %v1594_v16 = vmul.f32 %v4025_v52, %v5081_v51  ;;  %v5404_v51 = vld [vmem:[#allocation11 + $0xa8] ss:$12 sps:$4 sm:$0xff]  }
 0x2da   :  { %v1590_v9 = vadd.f32 %v1589_v12, %v5958_v63  ;;  %v1529_v49 = vadd.f32 %v1528_v60, %v5068_v3  ;;  %v1530_v20 = vpop.f32.mrb[45].mxu0  ;;  %v3569_v59 = vpop.f32.mrb[29].mxu1  ;;  %v5262_v12 = vld [vmem:[#allocation8 + $0x50] ss:$12 sps:$4 sm:$0xff]   ;;  %v5272_v63 = vld [vmem:[#allocation8 + $0x68] ss:$12 sps:$4 sm:$0xff]  }
 0x2db   :  { %v1531_v53 = vadd.f32 %v1530_v20, %v5071_v58  ;;  %v1532_v13 = vpop.f32.mrb[46].mxu0  ;;  %v1572_v7 = vpop.f32.mrb[30].mxu1  ;;  %v5265_v60 = vld [vmem:[#allocation8 + $0x64] ss:$12 sps:$4 sm:$0xff]   ;;  %5965 = vst [vmem:[#allocation22_spill] sm:$0xff] %v5272_v63 }
 0x2dc   :  { %4026 = vtanh.f32 %v1590_v9  ;;  %v1596_v48 = vadd.f32 %v1529_v49, %v5959_v15  ;;  %v1533_v10 = vpop.f32.mrb[47].mxu0  ;;  %v3570_v45 = vpop.f32.mrb[31].mxu1  ;;  %v5275_v9 = vld [vmem:[#allocation8 + $0x7c] ss:$12 sps:$4 sm:$0xff]   ;;  %v5279_v49 = vld [vmem:[#allocation8 + $0x78] ss:$12 sps:$4 sm:$0xff]  }
 0x2dd   :  { %v1603_v0 = vadd.f32 %v1531_v53, %v5960_v19  ;;  %5966 = vst [vmem:[#allocation23_spill] sm:$0xff] %v5275_v9  ;;  %5967 = vst [vmem:[#allocation30_spill] sm:$0xff] %v5279_v49  ;;  %v5282_v20 = vld [vmem:[#allocation8 + $0x80] ss:$12 sps:$4 sm:$0xff]   ;;  %v5289_v53 = vld [vmem:[#allocation8 + $0x90] ss:$12 sps:$4 sm:$0xff]  }
 0x2de   :  { %v3230_v6 = vmul.f32 -1.442695, %v1596_v48  ;;  %5968 = vst [vmem:[#allocation24_spill] sm:$0xff] %v5282_v20  ;;  %v5285_v59 = vld [vmem:[#allocation8 + $0x94] ss:$12 sps:$4 sm:$0xff]   ;;  %5970 = vst [vmem:[#allocation33_spill] sm:$0xff] %v5289_v53 }
 0x2df   :  { %v3231_v54 = vmul.f32 -1.442695, %v1603_v0  ;;  %5969 = vst [vmem:[#allocation25_spill] sm:$0xff] %v5285_v59  ;;  %v5292_v13 = vld [vmem:[#allocation8 + $0x98] ss:$12 sps:$4 sm:$0xff]   ;;  %v2065_v45 = vsel %vm2064_vm12, 1, %v5904_v56 }
 0x2e0   :  { %4028 = vpow2.f32 %v3230_v6  ;;  %5971 = vst [vmem:[#allocation26_spill] sm:$0xff] %v5292_v13  ;;  %v5295_v7 = vld [vmem:[#allocation8 + $0xac] ss:$12 sps:$4 sm:$0xff]   ;;  %v5299_v15 = vld [vmem:[#allocation8 + $0xa8] ss:$12 sps:$4 sm:$0xff]   ;;  %2067 = vperm.xlu1 %3853, %v2065_v45  }
 0x2e1   :  { %4030 = vpow2.f32 %v3231_v54  ;;  %5972 = vst [vmem:[#allocation27_spill] sm:$0xff] %v5295_v7  ;;  %5973 = vst [vmem:[#allocation36_spill] sm:$0xff] %v5299_v15  ;;  %v5302_v48 = vld [vmem:[#allocation8 + $0xb0] ss:$12 sps:$4 sm:$0xff]  }
 0x2e2   :  { %5974 = vst [vmem:[#allocation29_spill] sm:$0xff] %v5302_v48  ;;  %v5305_v10 = vld [vmem:[#allocation11 + $0x4] ss:$12 sps:$4 sm:$0xff]  }
 0x2e3   :  { %5975 = vst [vmem:[#allocation31_spill] sm:$0xff] %v5305_v10  ;;  %v5978_v45 = vld [vmem:[#allocation45_spill] sm:$0xff] }
 0x2e6   :  { %v4027_v55 = vpop.eup %4026 }
 0x2e7   :  { %v1593_v11 = vmul.f32 %v4027_v55, %v1592_v62 }
 0x2e9   :  { %v5178_v14 = vadd.f32 %v1594_v16, %v1593_v11  ;;  %v5976_v16 = vld [vmem:[#allocation42_spill] sm:$0xff] }
 0x2ea   :  { %v4029_v57 = vpop.eup %4028 }
 0x2eb   :  { %5961 = vst [vmem:[#allocation20_spill] sm:$0xff] %v5178_v14  ;;  %v1600_v4 = vadd.f32 1.0, %v4029_v57  ;;  %v1631_v2 = vpack.c.bf16 %v5178_v14, %v5178_v14  ;;  %v4031_v42 = vpop.eup %4030 }
 0x2ed   :  { %4032 = vrcp.f32 %v1600_v4  ;;  %1665 = vmatmul.mubr.bf16.vlgmr.msra.gmra.mrb[48].mxu0 %v1631_v2  ;;  %3588 = vmatmul.mubr.bf16.vlgmr.msra.gmra.mrb[32].mxu1 %v1631_v2 }
 0x2ee   :  { %1715 = vmatpush1.bf16.msra.mxu0 %v4723_v21  ;;  %3592 = vmatpush3.bf16.msra.mxu1 %v4751_v29  ;;  %v1607_v21 = vadd.f32 1.0, %v4031_v42  ;;  %v1570_v29 = vadd.f32 %v1569_v23, %v5090_v26  ;;  %v5269_v23 = vld [vmem:[#allocation8 + $0x60] ss:$12 sps:$4 sm:$0xff]  }
 0x2ef   :  { %1716 = vmatprep.subr.bf16.mxu0 %v4726_v22  ;;  %3593 = vmatprep.subr.bf16.mxu1 %v5934_v8  ;;  %5964 = vst [vmem:[#allocation28_spill] sm:$0xff] %v5269_v23  ;;  %v5977_v42 = vld [vmem:[#allocation43_spill] sm:$0xff] }
 0x2f0   :  { %1746 = vmatprep.mubr.bf16.mxu0 %v5904_v56  ;;  %3607 = vmatprep.mubr.msk.bf16.mxu1 %vm4453_vm0, %v5934_v8  ;;  %4034 = vrcp.f32 %v1607_v21 }
 0x2f2   :  { %1717 = vmatpush1.bf16.msra.mxu0 %v4734_v24  ;;  %3594 = vmatpush3.bf16.msra.mxu1 %v4762_v32  ;;  %v5962_v24 = vld [vmem:[#allocation69_spill] sm:$0xff] }
 0x2f3   :  { %1718 = vmatprep.subr.bf16.mxu0 %v4738_v25  ;;  %3595 = vmatprep.subr.bf16.mxu1 %v5934_v8 }
 0x2f6   :  { %1719 = vmatpush1.bf16.msra.mxu0 %v4745_v27  ;;  %3596 = vmatpush3.bf16.msra.mxu1 %v4774_v35  ;;  %v5222_v35 = vld [vmem:[#allocation8 + $0x4] ss:$12 sps:$4 sm:$0xff]  }
 0x2f7   :  { %v4033_v22 = vpop.eup %4032  ;;  %1720 = vmatprep.subr.bf16.mxu0 %v4748_v28  ;;  %3597 = vmatprep.subr.bf16.mxu1 %v5934_v8 }
 0x2f8   :  { %v1610_v17 = vmul.f32 %v4033_v22, %v1570_v29 }
 0x2fa   :  { %v1611_v32 = vadd.f32 %v1610_v17, %v5962_v24  ;;  %1721 = vmatpush1.bf16.msra.mxu0 %v4755_v30  ;;  %3598 = vmatpush3.bf16.msra.mxu1 %v4784_v38  ;;  %v4035_v25 = vpop.eup %4034  ;;  %v5232_v38 = vld [vmem:[#allocation8 + $0x1c] ss:$12 sps:$4 sm:$0xff]  }
 0x2fb   :  { %1722 = vmatprep.subr.bf16.mxu0 %v4758_v31  ;;  %3599 = vmatprep.subr.bf16.mxu1 %v5934_v8  ;;  %v1613_v27 = vsub.f32 1.0, %v4035_v25  ;;  %v1615_v31 = vmul.f32 %v4035_v25, %v5122_v1  ;;  %v5398_v1 = vld [vmem:[#allocation11 + $0xac] ss:$12 sps:$4 sm:$0xff]  }
 0x2fc   :  { %4036 = vtanh.f32 %v1611_v32 }
 0x2fe   :  { %1723 = vmatpush1.bf16.msra.mxu0 %v4768_v33  ;;  %3600 = vmatpush3.bf16.msra.mxu1 %v4795_v41  ;;  %v5245_v41 = vld [vmem:[#allocation8 + $0x34] ss:$12 sps:$4 sm:$0xff]  }
 0x2ff   :  { %1724 = vmatprep.subr.bf16.mxu0 %v4771_v34  ;;  %3601 = vmatprep.subr.bf16.mxu1 %v5934_v8 }
 0x302   :  { %1725 = vmatpush1.bf16.msra.mxu0 %v4778_v36  ;;  %3602 = vmatpush3.bf16.msra.mxu1 %v4805_v44  ;;  %v5226_v36 = vld [vmem:[#allocation8] ss:$12 sps:$4 sm:$0xff]   ;;  %v5252_v44 = vld [vmem:[#allocation8 + $0x38] ss:$12 sps:$4 sm:$0xff]  }
 0x303   :  { %1726 = vmatprep.subr.bf16.mxu0 %v4781_v37  ;;  %3603 = vmatprep.subr.bf16.mxu1 %v5934_v8  ;;  %v5229_v37 = vld [vmem:[#allocation8 + $0x8] ss:$12 sps:$4 sm:$0xff]  }
 0x306   :  { %v4037_v28 = vpop.eup %4036  ;;  %1727 = vmatpush1.bf16.msra.mxu0 %v4788_v39  ;;  %3604 = vmatpush3.bf16.msra.mxu1 %v4813_v46  ;;  %v5239_v39 = vld [vmem:[#allocation8 + $0x18] ss:$12 sps:$4 sm:$0xff]  }
 0x307   :  { %v1614_v30 = vmul.f32 %v4037_v28, %v1613_v27  ;;  %1728 = vmatprep.subr.bf16.mxu0 %v4791_v40  ;;  %3605 = vmatprep.subr.bf16.mxu1 %v5934_v8  ;;  %v5242_v40 = vld [vmem:[#allocation8 + $0x20] ss:$12 sps:$4 sm:$0xff]  }
 0x308   :  { %v5255_v46 = vld [vmem:[#allocation8 + $0x4c] ss:$12 sps:$4 sm:$0xff]  }
 0x309   :  { %v5216_v33 = vadd.f32 %v1615_v31, %v1614_v30 }
 0x30a   :  { %1729 = vmatpush1.bf16.msra.mxu0 %v4800_v43  ;;  %3606 = vmatpush3.bf16.msra.mxu1 %v4828_v50  ;;  %v5249_v43 = vld [vmem:[#allocation8 + $0x30] ss:$12 sps:$4 sm:$0xff]   ;;  %v5259_v50 = vld [vmem:[#allocation8 + $0x48] ss:$12 sps:$4 sm:$0xff]  }
 0x30b   :  { %5963 = vst [vmem:[#allocation21_spill] sm:$0xff] %v5216_v33  ;;  %v1713_v34 = vpack.c.bf16 %v5216_v33, %v5216_v33  ;;  %1852 = vmatprep.subr.bf16.mxu0 %v5222_v35  ;;  %3611 = vmatprep.subr.bf16.mxu1 %v5934_v8 }
 0x30d   :  { %1747 = vmatmul.mubr.bf16.vlgmr.msra.gmra.mrb[52].mxu0 %v1713_v34  ;;  %3608 = vmatmul.mubr.bf16.vlgmr.msra.gmra.mrb[36].mxu1 %v1713_v34 }
 0x30e   :  { %1853 = vmatpush1.bf16.msra.mxu0 %v5226_v36  ;;  %3612 = vmatpush3.bf16.msra.mxu1 %v5229_v37 }
 0x30f   :  { %1854 = vmatprep.subr.bf16.mxu0 %v5232_v38  ;;  %3613 = vmatprep.subr.bf16.mxu1 %v5934_v8 }
 0x310   :  { %1884 = vmatprep.mubr.bf16.mxu0 %v5904_v56  ;;  %3627 = vmatprep.mubr.msk.bf16.mxu1 %vm4453_vm0, %v5934_v8 }
 0x312   :  { %1855 = vmatpush1.bf16.msra.mxu0 %v5239_v39  ;;  %3614 = vmatpush3.bf16.msra.mxu1 %v5242_v40 }
 0x313   :  { %1856 = vmatprep.subr.bf16.mxu0 %v5245_v41  ;;  %3615 = vmatprep.subr.bf16.mxu1 %v5934_v8 }
 0x316   :  { %1857 = vmatpush1.bf16.msra.mxu0 %v5249_v43  ;;  %3616 = vmatpush3.bf16.msra.mxu1 %v5252_v44 }
 0x317   :  { %1858 = vmatprep.subr.bf16.mxu0 %v5255_v46  ;;  %3617 = vmatprep.subr.bf16.mxu1 %v5934_v8 }
 0x31a   :  { %1859 = vmatpush1.bf16.msra.mxu0 %v5259_v50  ;;  %3618 = vmatpush3.bf16.msra.mxu1 %v5262_v12 }
 0x31b   :  { %1860 = vmatprep.subr.bf16.mxu0 %v5265_v60  ;;  %3619 = vmatprep.subr.bf16.mxu1 %v5934_v8 }
 0x31e   :  { %1861 = vmatpush1.bf16.msra.mxu0 %v5269_v23  ;;  %3620 = vmatpush3.bf16.msra.mxu1 %v5272_v63 }
 0x31f   :  { %1862 = vmatprep.subr.bf16.mxu0 %v5275_v9  ;;  %3621 = vmatprep.subr.bf16.mxu1 %v5934_v8 }
 0x322   :  { %1863 = vmatpush1.bf16.msra.mxu0 %v5279_v49  ;;  %3622 = vmatpush3.bf16.msra.mxu1 %v5282_v20 }
 0x323   :  { %1864 = vmatprep.subr.bf16.mxu0 %v5285_v59  ;;  %3623 = vmatprep.subr.bf16.mxu1 %v5934_v8 }
 0x326   :  { %1865 = vmatpush1.bf16.msra.mxu0 %v5289_v53  ;;  %3624 = vmatpush3.bf16.msra.mxu1 %v5292_v13 }
 0x327   :  { %1866 = vmatprep.subr.bf16.mxu0 %v5295_v7  ;;  %3625 = vmatprep.subr.bf16.mxu1 %v5934_v8 }
 0x32a   :  { %1867 = vmatpush1.bf16.msra.mxu0 %v5299_v15  ;;  %3626 = vmatpush3.bf16.msra.mxu1 %v5302_v48 }
 0x32b   :  { %1934 = vmatprep.subr.bf16.mxu0 %v5305_v10  ;;  %3631 = vmatprep.subr.bf16.mxu1 %v5934_v8 }
 0x3c0   :  { %v1666_v19 = vpop.f32.mrb[48].mxu0  ;;  %v1707_v0 = vpop.f32.mrb[32].mxu1 }
 0x3c1   :  { %v1667_v6 = vadd.f32 %v1666_v19, %v5049_v18  ;;  %v1668_v52 = vpop.f32.mrb[49].mxu0  ;;  %v3589_v54 = vpop.f32.mrb[33].mxu1  ;;  %v1708_v27 = vadd.f32 %v1707_v0, %v5061_v5 }
 0x3c2   :  { %v1669_v62 = vadd.f32 %v1668_v52, %v5052_v47  ;;  %v1670_v55 = vpop.f32.mrb[50].mxu0  ;;  %v1710_v11 = vpop.f32.mrb[34].mxu1 }
 0x3c3   :  { %v1795_v57 = vadd.f32 %v1667_v6, %v5976_v16  ;;  %v1671_v4 = vpop.f32.mrb[51].mxu0  ;;  %v3590_v2 = vpop.f32.mrb[35].mxu1  ;;  %v5979_v16 = vld [vmem:[#allocation63_spill] sm:$0xff] }
 0x3c4   :  { %v1802_v21 = vadd.f32 %v1669_v62, %v5977_v42  ;;  %v5980_v2 = vld [vmem:[#allocation64_spill] sm:$0xff] }
 0x3c5   :  { %v3232_v29 = vmul.f32 -1.442695, %v1795_v57 }
 0x3c6   :  { %v3233_v22 = vmul.f32 -1.442695, %v1802_v21 }
 0x3c7   :  { %4038 = vpow2.f32 %v3232_v29 }
 0x3c8   :  { %4040 = vpow2.f32 %v3233_v22 }
 0x3d1   :  { %v4039_v17 = vpop.eup %4038 }
 0x3d2   :  { %v1799_v24 = vadd.f32 1.0, %v4039_v17  ;;  %v4041_v32 = vpop.eup %4040 }
 0x3d3   :  { %v1806_v25 = vadd.f32 1.0, %v4041_v32 }
 0x3d4   :  { %4042 = vrcp.f32 %v1799_v24 }
 0x3d5   :  { %4044 = vrcp.f32 %v1806_v25 }
 0x3de   :  { %v4043_v28 = vpop.eup %4042 }
 0x3df   :  { %v1809_v30 = vmul.f32 %v4043_v28, %v1708_v27  ;;  %v4045_v29 = vpop.eup %4044 }
 0x3e0   :  { %v1748_v31 = vpop.f32.mrb[52].mxu0  ;;  %v1789_v34 = vpop.f32.mrb[36].mxu1  ;;  %v1812_v17 = vsub.f32 1.0, %v4045_v29  ;;  %v1814_v25 = vmul.f32 %v4045_v29, %v5178_v14 }
 0x3e1   :  { %v1810_v19 = vadd.f32 %v1809_v30, %v5978_v45  ;;  %v1749_v6 = vadd.f32 %v1748_v31, %v5068_v3  ;;  %v1750_v52 = vpop.f32.mrb[53].mxu0  ;;  %v3609_v54 = vpop.f32.mrb[37].mxu1  ;;  %v5326_v45 = vld [vmem:[#allocation11] ss:$12 sps:$4 sm:$0xff]  }
 0x3e2   :  { %v1751_v62 = vadd.f32 %v1750_v52, %v5071_v58  ;;  %v1752_v55 = vpop.f32.mrb[54].mxu0  ;;  %v1792_v11 = vpop.f32.mrb[38].mxu1  ;;  %v5339_v54 = vld [vmem:[#allocation11 + $0x18] ss:$12 sps:$4 sm:$0xff]  }
 0x3e3   :  { %4046 = vtanh.f32 %v1810_v19  ;;  %v1816_v57 = vadd.f32 %v1749_v6, %v5979_v16  ;;  %v1753_v4 = vpop.f32.mrb[55].mxu0  ;;  %v3610_v0 = vpop.f32.mrb[39].mxu1  ;;  %v5329_v19 = vld [vmem:[#allocation11 + $0x8] ss:$12 sps:$4 sm:$0xff]   ;;  %v1790_v16 = vadd.f32 %v1789_v34, %v5090_v26 }
 0x3e4   :  { %v1823_v42 = vadd.f32 %v1751_v62, %v5980_v2  ;;  %v5332_v6 = vld [vmem:[#allocation11 + $0x1c] ss:$12 sps:$4 sm:$0xff]   ;;  %v5342_v62 = vld [vmem:[#allocation11 + $0x20] ss:$12 sps:$4 sm:$0xff]   ;;  %v5353_v4 = vld [vmem:[#allocation11 + $0x38] ss:$12 sps:$4 sm:$0xff]  }
 0x3e5   :  { %v3234_v21 = vmul.f32 -1.442695, %v1816_v57  ;;  %v5345_v55 = vld [vmem:[#allocation11 + $0x34] ss:$12 sps:$4 sm:$0xff]   ;;  %v5350_v57 = vld [vmem:[#allocation11 + $0x30] ss:$12 sps:$4 sm:$0xff]  }
 0x3e6   :  { %v3235_v22 = vmul.f32 -1.442695, %v1823_v42  ;;  %v5356_v2 = vld [vmem:[#allocation11 + $0x4c] ss:$12 sps:$4 sm:$0xff]   ;;  %v5361_v34 = vld [vmem:[#allocation11 + $0x48] ss:$12 sps:$4 sm:$0xff]  }
 0x3e7   :  { %4048 = vpow2.f32 %v3234_v21  ;;  %v5982_v21 = vld [vmem:[#allocation66_spill] sm:$0xff] }
 0x3e8   :  { %4050 = vpow2.f32 %v3235_v22  ;;  %v5364_v22 = vld [vmem:[#allocation11 + $0x50] ss:$12 sps:$4 sm:$0xff]  }
 0x3ed   :  { %v4047_v24 = vpop.eup %4046 }
 0x3ee   :  { %v1813_v32 = vmul.f32 %v4047_v24, %v1812_v17  ;;  %v5367_v17 = vld [vmem:[#allocation11 + $0x64] ss:$12 sps:$4 sm:$0xff]   ;;  %v5371_v24 = vld [vmem:[#allocation11 + $0x60] ss:$12 sps:$4 sm:$0xff]  }
 0x3f0   :  { %v5322_v27 = vadd.f32 %v1814_v25, %v1813_v32  ;;  %v5374_v32 = vld [vmem:[#allocation11 + $0x68] ss:$12 sps:$4 sm:$0xff]  }
 0x3f1   :  { %v4049_v28 = vpop.eup %4048  ;;  %v5377_v25 = vld [vmem:[#allocation11 + $0x7c] ss:$12 sps:$4 sm:$0xff]  }
 0x3f2   :  { %5981 = vst [vmem:[#allocation37_spill] sm:$0xff] %v5322_v27  ;;  %v1820_v30 = vadd.f32 1.0, %v4049_v28  ;;  %v1851_v31 = vpack.c.bf16 %v5322_v27, %v5322_v27  ;;  %v4051_v52 = vpop.eup %4050 }
 0x3f3   :  { %v1827_v11 = vadd.f32 1.0, %v4051_v52  ;;  %v5387_v52 = vld [vmem:[#allocation11 + $0x94] ss:$12 sps:$4 sm:$0xff]  }
 0x3f4   :  { %4052 = vrcp.f32 %v1820_v30  ;;  %1885 = vmatmul.mubr.bf16.vlgmr.msra.gmra.mrb[56].mxu0 %v1851_v31  ;;  %3628 = vmatmul.mubr.bf16.vlgmr.msra.gmra.mrb[40].mxu1 %v1851_v31  ;;  %v5381_v30 = vld [vmem:[#allocation11 + $0x78] ss:$12 sps:$4 sm:$0xff]   ;;  %v5384_v31 = vld [vmem:[#allocation11 + $0x80] ss:$12 sps:$4 sm:$0xff]  }
 0x3f5   :  { %1935 = vmatpush1.bf16.msra.mxu0 %v5326_v45  ;;  %3632 = vmatpush3.bf16.msra.mxu1 %v5329_v19  ;;  %4054 = vrcp.f32 %v1827_v11 }
 0x3f6   :  { %1936 = vmatprep.subr.bf16.mxu0 %v5332_v6  ;;  %3633 = vmatprep.subr.bf16.mxu1 %v5934_v8 }
 0x3f7   :  { %1966 = vmatprep.mubr.bf16.mxu0 %v5904_v56  ;;  %3647 = vmatprep.mubr.msk.bf16.mxu1 %vm4453_vm0, %v5934_v8 }
 0x3f9   :  { %1937 = vmatpush1.bf16.msra.mxu0 %v5339_v54  ;;  %3634 = vmatpush3.bf16.msra.mxu1 %v5342_v62 }
 0x3fa   :  { %1938 = vmatprep.subr.bf16.mxu0 %v5345_v55  ;;  %3635 = vmatprep.subr.bf16.mxu1 %v5934_v8 }
 0x3fd   :  { %1939 = vmatpush1.bf16.msra.mxu0 %v5350_v57  ;;  %3636 = vmatpush3.bf16.msra.mxu1 %v5353_v4 }
 0x3fe   :  { %v4053_v0 = vpop.eup %4052  ;;  %1940 = vmatprep.subr.bf16.mxu0 %v5356_v2  ;;  %3637 = vmatprep.subr.bf16.mxu1 %v5934_v8 }
 0x3ff   :  { %v1830_v42 = vmul.f32 %v4053_v0, %v1790_v16  ;;  %v4055_v28 = vpop.eup %4054  ;;  %v5391_v0 = vld [vmem:[#allocation11 + $0x90] ss:$12 sps:$4 sm:$0xff]  }
 0x400   :  { %v1833_v11 = vsub.f32 1.0, %v4055_v28  ;;  %5983 = vst [vmem:[#allocation32_spill] sm:$0xff] %v5391_v0 }
 0x401   :  { %v1831_v29 = vadd.f32 %v1830_v42, %v5982_v21  ;;  %1941 = vmatpush1.bf16.msra.mxu0 %v5361_v34  ;;  %3638 = vmatpush3.bf16.msra.mxu1 %v5364_v22  ;;  %v5394_v42 = vld [vmem:[#allocation11 + $0x98] ss:$12 sps:$4 sm:$0xff]  }
 0x402   :  { %1942 = vmatprep.subr.bf16.mxu0 %v5367_v17  ;;  %3639 = vmatprep.subr.bf16.mxu1 %v5934_v8 }
 0x403   :  { %4056 = vtanh.f32 %v1831_v29  ;;  %v1835_v29 = vmul.f32 %v4055_v28, %v5216_v33  ;;  %v2285_v28 = vsel %vm2284_vm13, 1, %v5904_v56 }
 0x404   :  { %2287 = vperm.xlu0 %3852, %v2285_v28  }
 0x405   :  { %1943 = vmatpush1.bf16.msra.mxu0 %v5371_v24  ;;  %3640 = vmatpush3.bf16.msra.mxu1 %v5374_v32 }
 0x406   :  { %1944 = vmatprep.subr.bf16.mxu0 %v5377_v25  ;;  %3641 = vmatprep.subr.bf16.mxu1 %v5934_v8 }
 0x409   :  { %1945 = vmatpush1.bf16.msra.mxu0 %v5381_v30  ;;  %3642 = vmatpush3.bf16.msra.mxu1 %v5384_v31 }
 0x40a   :  { %1946 = vmatprep.subr.bf16.mxu0 %v5387_v52  ;;  %3643 = vmatprep.subr.bf16.mxu1 %v5934_v8 }
 0x40d   :  { %v4057_v16 = vpop.eup %4056  ;;  %1947 = vmatpush1.bf16.msra.mxu0 %v5391_v0  ;;  %3644 = vmatpush3.bf16.msra.mxu1 %v5394_v42  ;;  %v5407_v0 = vld [vmem:[#allocation11 + $0xb0] ss:$12 sps:$4 sm:$0xff]  }
 0x40e   :  { %v1834_v21 = vmul.f32 %v4057_v16, %v1833_v11  ;;  %1948 = vmatprep.subr.bf16.mxu0 %v5398_v1  ;;  %3645 = vmatprep.subr.bf16.mxu1 %v5934_v8 }
 0x410   :  { %v5402_v14 = vadd.f32 %v1835_v29, %v1834_v21 }
 0x411   :  { %1949 = vmatpush1.bf16.msra.mxu0 %v5404_v51  ;;  %3646 = vmatpush3.bf16.msra.mxu1 %v5407_v0 }
 0x412   :  { %5984 = vst [vmem:[#allocation34_spill] sm:$0xff] %v5402_v14  ;;  %v1933_v11 = vpack.c.bf16 %v5402_v14, %v5402_v14  ;;  %2072 = vmatprep.subr.bf16.mxu0 %v5222_v35  ;;  %3651 = vmatprep.subr.bf16.mxu1 %v5934_v8 }
 0x414   :  { %1967 = vmatmul.mubr.bf16.vlgmr.msra.gmra.mrb[60].mxu0 %v1933_v11  ;;  %3648 = vmatmul.mubr.bf16.vlgmr.msra.gmra.mrb[44].mxu1 %v1933_v11 }
 0x415   :  { %2073 = vmatpush1.bf16.msra.mxu0 %v5226_v36  ;;  %3652 = vmatpush3.bf16.msra.mxu1 %v5229_v37 }
 0x416   :  { %2074 = vmatprep.subr.bf16.mxu0 %v5232_v38  ;;  %3653 = vmatprep.subr.bf16.mxu1 %v5934_v8 }
 0x417   :  { %2104 = vmatprep.mubr.bf16.mxu0 %v5904_v56  ;;  %3667 = vmatprep.mubr.msk.bf16.mxu1 %vm4453_vm0, %v5934_v8 }
 0x419   :  { %2075 = vmatpush1.bf16.msra.mxu0 %v5239_v39  ;;  %3654 = vmatpush3.bf16.msra.mxu1 %v5242_v40 }
 0x41a   :  { %2076 = vmatprep.subr.bf16.mxu0 %v5245_v41  ;;  %3655 = vmatprep.subr.bf16.mxu1 %v5934_v8 }
 0x41d   :  { %2077 = vmatpush1.bf16.msra.mxu0 %v5249_v43  ;;  %3656 = vmatpush3.bf16.msra.mxu1 %v5252_v44 }
 0x41e   :  { %2078 = vmatprep.subr.bf16.mxu0 %v5255_v46  ;;  %3657 = vmatprep.subr.bf16.mxu1 %v5934_v8 }
 0x421   :  { %2079 = vmatpush1.bf16.msra.mxu0 %v5259_v50  ;;  %3658 = vmatpush3.bf16.msra.mxu1 %v5262_v12 }
 0x422   :  { %2080 = vmatprep.subr.bf16.mxu0 %v5265_v60  ;;  %3659 = vmatprep.subr.bf16.mxu1 %v5934_v8 }
 0x425   :  { %2081 = vmatpush1.bf16.msra.mxu0 %v5269_v23  ;;  %3660 = vmatpush3.bf16.msra.mxu1 %v5272_v63 }
 0x426   :  { %2082 = vmatprep.subr.bf16.mxu0 %v5275_v9  ;;  %3661 = vmatprep.subr.bf16.mxu1 %v5934_v8 }
 0x429   :  { %2083 = vmatpush1.bf16.msra.mxu0 %v5279_v49  ;;  %3662 = vmatpush3.bf16.msra.mxu1 %v5282_v20  ;;  %v5986_v20 = vld [vmem:[#allocation46_spill] sm:$0xff] }
 0x42a   :  { %2084 = vmatprep.subr.bf16.mxu0 %v5285_v59  ;;  %3663 = vmatprep.subr.bf16.mxu1 %v5934_v8 }
 0x42d   :  { %2085 = vmatpush1.bf16.msra.mxu0 %v5289_v53  ;;  %3664 = vmatpush3.bf16.msra.mxu1 %v5292_v13 }
 0x42e   :  { %2086 = vmatprep.subr.bf16.mxu0 %v5295_v7  ;;  %3665 = vmatprep.subr.bf16.mxu1 %v5934_v8 }
 0x431   :  { %2087 = vmatpush1.bf16.msra.mxu0 %v5299_v15  ;;  %3666 = vmatpush3.bf16.msra.mxu1 %v5302_v48  ;;  %v5985_v48 = vld [vmem:[#allocation44_spill] sm:$0xff] }
 0x432   :  { %2154 = vmatprep.subr.bf16.mxu0 %v5305_v10  ;;  %3671 = vmatprep.subr.bf16.mxu1 %v5934_v8 }
 0x4c7   :  { %v1886_v16 = vpop.f32.mrb[56].mxu0  ;;  %v1927_v21 = vpop.f32.mrb[40].mxu1 }
 0x4c8   :  { %v1887_v29 = vadd.f32 %v1886_v16, %v5049_v18  ;;  %v1888_v11 = vpop.f32.mrb[57].mxu0  ;;  %v3629_v33 = vpop.f32.mrb[41].mxu1 }
 0x4c9   :  { %v1889_v7 = vadd.f32 %v1888_v11, %v5052_v47  ;;  %v1890_v15 = vpop.f32.mrb[58].mxu0  ;;  %v1930_v13 = vpop.f32.mrb[42].mxu1  ;;  %v1928_v33 = vadd.f32 %v1927_v21, %v5061_v5 }
 0x4ca   :  { %v2015_v53 = vadd.f32 %v1887_v29, %v5985_v48  ;;  %v1891_v10 = vpop.f32.mrb[59].mxu0  ;;  %v3630_v59 = vpop.f32.mrb[43].mxu1 }
 0x4cb   :  { %v2022_v49 = vadd.f32 %v1889_v7, %v5986_v20  ;;  %v5987_v10 = vld [vmem:[#allocation47_spill] sm:$0xff] }
 0x4cc   :  { %v3236_v61 = vmul.f32 -1.442695, %v2015_v53 }
 0x4cd   :  { %v3237_v9 = vmul.f32 -1.442695, %v2022_v49 }
 0x4ce   :  { %4058 = vpow2.f32 %v3236_v61 }
 0x4cf   :  { %4060 = vpow2.f32 %v3237_v9 }
 0x4d8   :  { %v4059_v28 = vpop.eup %4058 }
 0x4d9   :  { %v2019_v63 = vadd.f32 1.0, %v4059_v28  ;;  %v4061_v16 = vpop.eup %4060 }
 0x4da   :  { %v2026_v18 = vadd.f32 1.0, %v4061_v16  ;;  %v5989_v16 = vld [vmem:[#allocation67_spill] sm:$0xff] }
 0x4db   :  { %4062 = vrcp.f32 %v2019_v63  ;;  %v5988_v63 = vld [vmem:[#allocation65_spill] sm:$0xff] }
 0x4dc   :  { %4064 = vrcp.f32 %v2026_v18 }
 0x4e5   :  { %v4063_v11 = vpop.eup %4062 }
 0x4e6   :  { %v2029_v15 = vmul.f32 %v4063_v11, %v1928_v33  ;;  %v4065_v11 = vpop.eup %4064 }
 0x4e7   :  { %v1968_v13 = vpop.f32.mrb[60].mxu0  ;;  %v2009_v48 = vpop.f32.mrb[44].mxu1 }
 0x4e8   :  { %v2030_v59 = vadd.f32 %v2029_v15, %v5987_v10  ;;  %v1969_v20 = vadd.f32 %v1968_v13, %v5068_v3  ;;  %v1970_v53 = vpop.f32.mrb[61].mxu0  ;;  %v3649_v61 = vpop.f32.mrb[45].mxu1  ;;  %v2032_v15 = vsub.f32 1.0, %v4065_v11 }
 0x4e9   :  { %v1971_v9 = vadd.f32 %v1970_v53, %v5071_v58  ;;  %v1972_v49 = vpop.f32.mrb[62].mxu0  ;;  %v2012_v7 = vpop.f32.mrb[46].mxu1  ;;  %v2034_v61 = vmul.f32 %v4065_v11, %v5322_v27 }
 0x4ea   :  { %4066 = vtanh.f32 %v2030_v59  ;;  %v2036_v29 = vadd.f32 %v1969_v20, %v5988_v63  ;;  %v1973_v28 = vpop.f32.mrb[63].mxu0  ;;  %v3650_v21 = vpop.f32.mrb[47].mxu1  ;;  %v2010_v7 = vadd.f32 %v2009_v48, %v5090_v26 }
 0x4eb   :  { %v2043_v33 = vadd.f32 %v1971_v9, %v5989_v16  ;;  %v5990_v28 = vld [vmem:[#allocation68_spill] sm:$0xff] }
 0x4ec   :  { %v3238_v18 = vmul.f32 -1.442695, %v2036_v29 }
 0x4ed   :  { %v3239_v5 = vmul.f32 -1.442695, %v2043_v33 }
 0x4ee   :  { %4068 = vpow2.f32 %v3238_v18  ;;  %v5991_v18 = vld [vmem:[#allocation32_spill] sm:$0xff] }
 0x4ef   :  { %4070 = vpow2.f32 %v3239_v5 }
 0x4f4   :  { %v4067_v10 = vpop.eup %4066 }
 0x4f5   :  { %v2033_v13 = vmul.f32 %v4067_v10, %v2032_v15 }
 0x4f7   :  { %v5462_v53 = vadd.f32 %v2034_v61, %v2033_v13  ;;  %v5992_v61 = vld [vmem:[#allocation22_spill] sm:$0xff] }
 0x4f8   :  { %v4069_v49 = vpop.eup %4068 }
 0x4f9   :  { %v2040_v59 = vadd.f32 1.0, %v4069_v49  ;;  %v2071_v20 = vpack.c.bf16 %v5462_v53, %v5462_v53  ;;  %v4071_v5 = vpop.eup %4070  ;;  %v5993_v49 = vld [vmem:[#allocation23_spill] sm:$0xff] }
 0x4fa   :  { %v2047_v9 = vadd.f32 1.0, %v4071_v5  ;;  %v5996_v5 = vld [vmem:[#allocation25_spill] sm:$0xff] }
 0x4fb   :  { %4072 = vrcp.f32 %v2040_v59  ;;  %2105 = vmatmul.mubr.bf16.vlgmr.msra.gmra.mrb[64].mxu0 %v2071_v20  ;;  %3668 = vmatmul.mubr.bf16.vlgmr.msra.gmra.mrb[48].mxu1 %v2071_v20  ;;  %v5994_v59 = vld [vmem:[#allocation30_spill] sm:$0xff]  ;;  %v5995_v20 = vld [vmem:[#allocation24_spill] sm:$0xff] }
 0x4fc   :  { %2155 = vmatpush1.bf16.msra.mxu0 %v5326_v45  ;;  %3672 = vmatpush3.bf16.msra.mxu1 %v5329_v19  ;;  %4074 = vrcp.f32 %v2047_v9  ;;  %v5997_v9 = vld [vmem:[#allocation33_spill] sm:$0xff] }
 0x4fd   :  { %2156 = vmatprep.subr.bf16.mxu0 %v5332_v6  ;;  %3673 = vmatprep.subr.bf16.mxu1 %v5934_v8 }
 0x4fe   :  { %2186 = vmatprep.mubr.bf16.mxu0 %v5904_v56  ;;  %3687 = vmatprep.mubr.msk.bf16.mxu1 %vm4453_vm0, %v5934_v8 }
 0x500   :  { %2157 = vmatpush1.bf16.msra.mxu0 %v5339_v54  ;;  %3674 = vmatpush3.bf16.msra.mxu1 %v5342_v62 }
 0x501   :  { %2158 = vmatprep.subr.bf16.mxu0 %v5345_v55  ;;  %3675 = vmatprep.subr.bf16.mxu1 %v5934_v8 }
 0x504   :  { %2159 = vmatpush1.bf16.msra.mxu0 %v5350_v57  ;;  %3676 = vmatpush3.bf16.msra.mxu1 %v5353_v4 }
 0x505   :  { %v4073_v63 = vpop.eup %4072  ;;  %2160 = vmatprep.subr.bf16.mxu0 %v5356_v2  ;;  %3677 = vmatprep.subr.bf16.mxu1 %v5934_v8 }
 0x506   :  { %v2050_v29 = vmul.f32 %v4073_v63, %v2010_v7  ;;  %v4075_v48 = vpop.eup %4074  ;;  %v5998_v7 = vld [vmem:[#allocation26_spill] sm:$0xff]  ;;  %v5999_v63 = vld [vmem:[#allocation27_spill] sm:$0xff] }
 0x507   :  { %v2053_v16 = vsub.f32 1.0, %v4075_v48  ;;  %v2055_v15 = vmul.f32 %v4075_v48, %v5402_v14  ;;  %v6003_v48 = vld [vmem:[#allocation39_spill] sm:$0xff] }
 0x508   :  { %v2051_v21 = vadd.f32 %v2050_v29, %v5990_v28  ;;  %2161 = vmatpush1.bf16.msra.mxu0 %v5361_v34  ;;  %3678 = vmatpush3.bf16.msra.mxu1 %v5364_v22  ;;  %v6000_v29 = vld [vmem:[#allocation36_spill] sm:$0xff]  ;;  %v6001_v28 = vld [vmem:[#allocation29_spill] sm:$0xff]  ;;  %vm2504_vm14 = vcmp.eq.s32.totalorder %v6003_v48, 5 }
 0x509   :  { %2162 = vmatprep.subr.bf16.mxu0 %v5367_v17  ;;  %3679 = vmatprep.subr.bf16.mxu1 %v5934_v8 }
 0x50a   :  { %4076 = vtanh.f32 %v2051_v21  ;;  %v6002_v21 = vld [vmem:[#allocation31_spill] sm:$0xff] }
 0x50c   :  { %2163 = vmatpush1.bf16.msra.mxu0 %v5371_v24  ;;  %3680 = vmatpush3.bf16.msra.mxu1 %v5374_v32 }
 0x50d   :  { %2164 = vmatprep.subr.bf16.mxu0 %v5377_v25  ;;  %3681 = vmatprep.subr.bf16.mxu1 %v5934_v8 }
 0x510   :  { %2165 = vmatpush1.bf16.msra.mxu0 %v5381_v30  ;;  %3682 = vmatpush3.bf16.msra.mxu1 %v5384_v31 }
 0x511   :  { %2166 = vmatprep.subr.bf16.mxu0 %v5387_v52  ;;  %3683 = vmatprep.subr.bf16.mxu1 %v5934_v8 }
 0x514   :  { %v4077_v33 = vpop.eup %4076  ;;  %2167 = vmatpush1.bf16.msra.mxu0 %v5991_v18  ;;  %3684 = vmatpush3.bf16.msra.mxu1 %v5394_v42 }
 0x515   :  { %v2054_v11 = vmul.f32 %v4077_v33, %v2053_v16  ;;  %2168 = vmatprep.subr.bf16.mxu0 %v5398_v1  ;;  %3685 = vmatprep.subr.bf16.mxu1 %v5934_v8  ;;  %v2505_v16 = vsel %vm2504_vm14, 1, %v5904_v56 }
 0x516   :  { %2507 = vperm.xlu1 %3853, %v2505_v16  }
 0x517   :  { %v5500_v10 = vadd.f32 %v2055_v15, %v2054_v11  ;;  %v6004_v15 = vld [vmem:[#allocation82_spill] sm:$0xff] }
 0x518   :  { %2169 = vmatpush1.bf16.msra.mxu0 %v5404_v51  ;;  %3686 = vmatpush3.bf16.msra.mxu1 %v5407_v0 }
 0x519   :  { %v2153_v13 = vpack.c.bf16 %v5500_v10, %v5500_v10  ;;  %2292 = vmatprep.subr.bf16.mxu0 %v5222_v35  ;;  %3691 = vmatprep.subr.bf16.mxu1 %v5934_v8 }
 0x51b   :  { %2187 = vmatmul.mubr.bf16.vlgmr.msra.gmra.mrb[68].mxu0 %v2153_v13  ;;  %3688 = vmatmul.mubr.bf16.vlgmr.msra.gmra.mrb[52].mxu1 %v2153_v13 }
 0x51c   :  { %2293 = vmatpush1.bf16.msra.mxu0 %v5226_v36  ;;  %3692 = vmatpush3.bf16.msra.mxu1 %v5229_v37 }
 0x51d   :  { %2294 = vmatprep.subr.bf16.mxu0 %v5232_v38  ;;  %3693 = vmatprep.subr.bf16.mxu1 %v5934_v8 }
 0x51e   :  { %2324 = vmatprep.mubr.bf16.mxu0 %v5904_v56  ;;  %3707 = vmatprep.mubr.msk.bf16.mxu1 %vm4453_vm0, %v5934_v8 }
 0x520   :  { %2295 = vmatpush1.bf16.msra.mxu0 %v5239_v39  ;;  %3694 = vmatpush3.bf16.msra.mxu1 %v5242_v40 }
 0x521   :  { %2296 = vmatprep.subr.bf16.mxu0 %v5245_v41  ;;  %3695 = vmatprep.subr.bf16.mxu1 %v5934_v8 }
 0x524   :  { %2297 = vmatpush1.bf16.msra.mxu0 %v5249_v43  ;;  %3696 = vmatpush3.bf16.msra.mxu1 %v5252_v44 }
 0x525   :  { %2298 = vmatprep.subr.bf16.mxu0 %v5255_v46  ;;  %3697 = vmatprep.subr.bf16.mxu1 %v5934_v8 }
 0x528   :  { %2299 = vmatpush1.bf16.msra.mxu0 %v5259_v50  ;;  %3698 = vmatpush3.bf16.msra.mxu1 %v5262_v12 }
 0x529   :  { %2300 = vmatprep.subr.bf16.mxu0 %v5265_v60  ;;  %3699 = vmatprep.subr.bf16.mxu1 %v5934_v8 }
 0x52c   :  { %2301 = vmatpush1.bf16.msra.mxu0 %v5269_v23  ;;  %3700 = vmatpush3.bf16.msra.mxu1 %v5992_v61 }
 0x52d   :  { %2302 = vmatprep.subr.bf16.mxu0 %v5993_v49  ;;  %3701 = vmatprep.subr.bf16.mxu1 %v5934_v8 }
 0x530   :  { %2303 = vmatpush1.bf16.msra.mxu0 %v5994_v59  ;;  %3702 = vmatpush3.bf16.msra.mxu1 %v5995_v20  ;;  %v6006_v20 = vld [vmem:[#allocation50_spill] sm:$0xff] }
 0x531   :  { %2304 = vmatprep.subr.bf16.mxu0 %v5996_v5  ;;  %3703 = vmatprep.subr.bf16.mxu1 %v5934_v8 }
 0x534   :  { %2305 = vmatpush1.bf16.msra.mxu0 %v5997_v9  ;;  %3704 = vmatpush3.bf16.msra.mxu1 %v5998_v7 }
 0x535   :  { %2306 = vmatprep.subr.bf16.mxu0 %v5999_v63  ;;  %3705 = vmatprep.subr.bf16.mxu1 %v5934_v8 }
 0x538   :  { %2307 = vmatpush1.bf16.msra.mxu0 %v6000_v29  ;;  %3706 = vmatpush3.bf16.msra.mxu1 %v6001_v28  ;;  %v6005_v28 = vld [vmem:[#allocation49_spill] sm:$0xff] }
 0x539   :  { %2374 = vmatprep.subr.bf16.mxu0 %v6002_v21  ;;  %3711 = vmatprep.subr.bf16.mxu1 %v5934_v8 }
 0x5ce   :  { %v2106_v33 = vpop.f32.mrb[64].mxu0  ;;  %v2147_v11 = vpop.f32.mrb[48].mxu1 }
 0x5cf   :  { %v2107_v13 = vadd.f32 %v2106_v33, %v6004_v15  ;;  %v2108_v14 = vpop.f32.mrb[65].mxu0  ;;  %v3669_v27 = vpop.f32.mrb[49].mxu1 }
 0x5d0   :  { %v2109_v63 = vadd.f32 %v2108_v14, %v5052_v47  ;;  %v2110_v29 = vpop.f32.mrb[66].mxu0  ;;  %v2150_v7 = vpop.f32.mrb[50].mxu1  ;;  %v6007_v27 = vld [vmem:[#allocation83_spill] sm:$0xff] }
 0x5d1   :  { %v2235_v9 = vadd.f32 %v2107_v13, %v6005_v28  ;;  %v2111_v21 = vpop.f32.mrb[67].mxu0  ;;  %v3670_v5 = vpop.f32.mrb[51].mxu1  ;;  %v2148_v23 = vadd.f32 %v2147_v11, %v6007_v27 }
 0x5d2   :  { %v2242_v59 = vadd.f32 %v2109_v63, %v6006_v20  ;;  %v6008_v21 = vld [vmem:[#allocation54_spill] sm:$0xff] }
 0x5d3   :  { %v3240_v48 = vmul.f32 -1.442695, %v2235_v9 }
 0x5d4   :  { %v3241_v49 = vmul.f32 -1.442695, %v2242_v59 }
 0x5d5   :  { %4078 = vpow2.f32 %v3240_v48 }
 0x5d6   :  { %4080 = vpow2.f32 %v3241_v49 }
 0x5df   :  { %v4079_v16 = vpop.eup %4078 }
 0x5e0   :  { %v2239_v61 = vadd.f32 1.0, %v4079_v16  ;;  %v4081_v33 = vpop.eup %4080 }
 0x5e1   :  { %v2246_v15 = vadd.f32 1.0, %v4081_v33  ;;  %v6010_v33 = vld [vmem:[#allocation71_spill] sm:$0xff] }
 0x5e2   :  { %4082 = vrcp.f32 %v2239_v61  ;;  %v6009_v61 = vld [vmem:[#allocation70_spill] sm:$0xff] }
 0x5e3   :  { %4084 = vrcp.f32 %v2246_v15 }
 0x5ec   :  { %v4083_v14 = vpop.eup %4082 }
 0x5ed   :  { %v2249_v29 = vmul.f32 %v4083_v14, %v2148_v23  ;;  %v4085_v14 = vpop.eup %4084 }
 0x5ee   :  { %v2188_v7 = vpop.f32.mrb[68].mxu0  ;;  %v2229_v28 = vpop.f32.mrb[52].mxu1 }
 0x5ef   :  { %v2250_v5 = vadd.f32 %v2249_v29, %v6008_v21  ;;  %v2189_v20 = vadd.f32 %v2188_v7, %v5068_v3  ;;  %v2190_v9 = vpop.f32.mrb[69].mxu0  ;;  %v3689_v63 = vpop.f32.mrb[53].mxu1  ;;  %v2252_v29 = vsub.f32 1.0, %v4085_v14 }
 0x5f0   :  { %v2191_v49 = vadd.f32 %v2190_v9, %v5071_v58  ;;  %v2192_v59 = vpop.f32.mrb[70].mxu0  ;;  %v2232_v48 = vpop.f32.mrb[54].mxu1  ;;  %v2254_v63 = vmul.f32 %v4085_v14, %v5462_v53 }
 0x5f1   :  { %4086 = vtanh.f32 %v2250_v5  ;;  %v2256_v13 = vadd.f32 %v2189_v20, %v6009_v61  ;;  %v2193_v16 = vpop.f32.mrb[71].mxu0  ;;  %v3690_v11 = vpop.f32.mrb[55].mxu1  ;;  %v2230_v48 = vadd.f32 %v2229_v28, %v5090_v26 }
 0x5f2   :  { %v2263_v23 = vadd.f32 %v2191_v49, %v6010_v33  ;;  %v6011_v16 = vld [vmem:[#allocation75_spill] sm:$0xff] }
 0x5f3   :  { %v3242_v15 = vmul.f32 -1.442695, %v2256_v13 }
 0x5f4   :  { %v3243_v27 = vmul.f32 -1.442695, %v2263_v23 }
 0x5f5   :  { %4088 = vpow2.f32 %v3242_v15 }
 0x5f6   :  { %4090 = vpow2.f32 %v3243_v27 }
 0x5fb   :  { %v4087_v21 = vpop.eup %4086 }
 0x5fc   :  { %v2253_v7 = vmul.f32 %v4087_v21, %v2252_v29 }
 0x5fe   :  { %v5556_v9 = vadd.f32 %v2254_v63, %v2253_v7 }
 0x5ff   :  { %v4089_v59 = vpop.eup %4088 }
 0x600   :  { %v2260_v5 = vadd.f32 1.0, %v4089_v59  ;;  %v2291_v20 = vpack.c.bf16 %v5556_v9, %v5556_v9  ;;  %v4091_v27 = vpop.eup %4090 }
 0x601   :  { %v2267_v49 = vadd.f32 1.0, %v4091_v27 }
 0x602   :  { %4092 = vrcp.f32 %v2260_v5  ;;  %2325 = vmatmul.mubr.bf16.vlgmr.msra.gmra.mrb[72].mxu0 %v2291_v20  ;;  %3708 = vmatmul.mubr.bf16.vlgmr.msra.gmra.mrb[56].mxu1 %v2291_v20  ;;  %v6025_v5 = vld [vmem:[#allocation82_spill] sm:$0xff] }
 0x603   :  { %2375 = vmatpush1.bf16.msra.mxu0 %v5326_v45  ;;  %3712 = vmatpush3.bf16.msra.mxu1 %v5329_v19  ;;  %4094 = vrcp.f32 %v2267_v49 }
 0x604   :  { %2376 = vmatprep.subr.bf16.mxu0 %v5332_v6  ;;  %3713 = vmatprep.subr.bf16.mxu1 %v5934_v8 }
 0x605   :  { %2406 = vmatprep.mubr.bf16.mxu0 %v5904_v56  ;;  %3727 = vmatprep.mubr.msk.bf16.mxu1 %vm4453_vm0, %v5934_v8 }
 0x607   :  { %2377 = vmatpush1.bf16.msra.mxu0 %v5339_v54  ;;  %3714 = vmatpush3.bf16.msra.mxu1 %v5342_v62 }
 0x608   :  { %2378 = vmatprep.subr.bf16.mxu0 %v5345_v55  ;;  %3715 = vmatprep.subr.bf16.mxu1 %v5934_v8 }
 0x60b   :  { %2379 = vmatpush1.bf16.msra.mxu0 %v5350_v57  ;;  %3716 = vmatpush3.bf16.msra.mxu1 %v5353_v4 }
 0x60c   :  { %v4093_v61 = vpop.eup %4092  ;;  %2380 = vmatprep.subr.bf16.mxu0 %v5356_v2  ;;  %3717 = vmatprep.subr.bf16.mxu1 %v5934_v8 }
 0x60d   :  { %v2270_v13 = vmul.f32 %v4093_v61, %v2230_v48  ;;  %v4095_v28 = vpop.eup %4094 }
 0x60e   :  { %v2273_v33 = vsub.f32 1.0, %v4095_v28  ;;  %v2275_v14 = vmul.f32 %v4095_v28, %v5500_v10 }
 0x60f   :  { %v2271_v11 = vadd.f32 %v2270_v13, %v6011_v16  ;;  %2381 = vmatpush1.bf16.msra.mxu0 %v5361_v34  ;;  %3718 = vmatpush3.bf16.msra.mxu1 %v5364_v22  ;;  %v6026_v16 = vld [vmem:[#allocation51_spill] sm:$0xff] }
 0x610   :  { %2382 = vmatprep.subr.bf16.mxu0 %v5367_v17  ;;  %3719 = vmatprep.subr.bf16.mxu1 %v5934_v8 }
 0x611   :  { %4096 = vtanh.f32 %v2271_v11 }
 0x613   :  { %2383 = vmatpush1.bf16.msra.mxu0 %v5371_v24  ;;  %3720 = vmatpush3.bf16.msra.mxu1 %v5374_v32 }
 0x614   :  { %2384 = vmatprep.subr.bf16.mxu0 %v5377_v25  ;;  %3721 = vmatprep.subr.bf16.mxu1 %v5934_v8 }
 0x617   :  { %2385 = vmatpush1.bf16.msra.mxu0 %v5381_v30  ;;  %3722 = vmatpush3.bf16.msra.mxu1 %v5384_v31 }
 0x618   :  { %2386 = vmatprep.subr.bf16.mxu0 %v5387_v52  ;;  %3723 = vmatprep.subr.bf16.mxu1 %v5934_v8 }
 0x61b   :  { %v4097_v23 = vpop.eup %4096  ;;  %2387 = vmatpush1.bf16.msra.mxu0 %v5991_v18  ;;  %3724 = vmatpush3.bf16.msra.mxu1 %v5394_v42 }
 0x61c   :  { %v2274_v15 = vmul.f32 %v4097_v23, %v2273_v33  ;;  %2388 = vmatprep.subr.bf16.mxu0 %v5398_v1  ;;  %3725 = vmatprep.subr.bf16.mxu1 %v5934_v8  ;;  %v6027_v23 = vld [vmem:[#allocation53_spill] sm:$0xff] }
 0x61e   :  { %v5594_v29 = vadd.f32 %v2275_v14, %v2274_v15 }
 0x61f   :  { %2389 = vmatpush1.bf16.msra.mxu0 %v5404_v51  ;;  %3726 = vmatpush3.bf16.msra.mxu1 %v5407_v0 }
 0x620   :  { %v2373_v21 = vpack.c.bf16 %v5594_v29, %v5594_v29  ;;  %2512 = vmatprep.subr.bf16.mxu0 %v5222_v35  ;;  %3731 = vmatprep.subr.bf16.mxu1 %v5934_v8  ;;  %v6012_v35 = vld [vmem:[#allocation28_spill] sm:$0xff] }
 0x622   :  { %2407 = vmatmul.mubr.bf16.vlgmr.msra.gmra.mrb[76].mxu0 %v2373_v21  ;;  %3728 = vmatmul.mubr.bf16.vlgmr.msra.gmra.mrb[60].mxu1 %v2373_v21 }
 0x623   :  { %2513 = vmatpush1.bf16.msra.mxu0 %v5226_v36  ;;  %3732 = vmatpush3.bf16.msra.mxu1 %v5229_v37  ;;  %v6013_v36 = vld [vmem:[#allocation22_spill] sm:$0xff]  ;;  %v6014_v37 = vld [vmem:[#allocation23_spill] sm:$0xff] }
 0x624   :  { %2514 = vmatprep.subr.bf16.mxu0 %v5232_v38  ;;  %3733 = vmatprep.subr.bf16.mxu1 %v5934_v8  ;;  %v6015_v38 = vld [vmem:[#allocation30_spill] sm:$0xff] }
 0x625   :  { %2544 = vmatprep.mubr.bf16.mxu0 %v5904_v56  ;;  %3747 = vmatprep.mubr.msk.bf16.mxu1 %vm4453_vm0, %v5934_v8 }
 0x627   :  { %2515 = vmatpush1.bf16.msra.mxu0 %v5239_v39  ;;  %3734 = vmatpush3.bf16.msra.mxu1 %v5242_v40  ;;  %v6016_v39 = vld [vmem:[#allocation24_spill] sm:$0xff]  ;;  %v6017_v40 = vld [vmem:[#allocation25_spill] sm:$0xff] }
 0x628   :  { %2516 = vmatprep.subr.bf16.mxu0 %v5245_v41  ;;  %3735 = vmatprep.subr.bf16.mxu1 %v5934_v8  ;;  %v6018_v41 = vld [vmem:[#allocation33_spill] sm:$0xff] }
 0x62b   :  { %2517 = vmatpush1.bf16.msra.mxu0 %v5249_v43  ;;  %3736 = vmatpush3.bf16.msra.mxu1 %v5252_v44  ;;  %v6019_v43 = vld [vmem:[#allocation26_spill] sm:$0xff]  ;;  %v6020_v44 = vld [vmem:[#allocation27_spill] sm:$0xff] }
 0x62c   :  { %2518 = vmatprep.subr.bf16.mxu0 %v5255_v46  ;;  %3737 = vmatprep.subr.bf16.mxu1 %v5934_v8  ;;  %v6021_v46 = vld [vmem:[#allocation36_spill] sm:$0xff] }
 0x62f   :  { %2519 = vmatpush1.bf16.msra.mxu0 %v5259_v50  ;;  %3738 = vmatpush3.bf16.msra.mxu1 %v5262_v12  ;;  %v6022_v50 = vld [vmem:[#allocation29_spill] sm:$0xff]  ;;  %v6023_v12 = vld [vmem:[#allocation31_spill] sm:$0xff] }
 0x630   :  { %2520 = vmatprep.subr.bf16.mxu0 %v5265_v60  ;;  %3739 = vmatprep.subr.bf16.mxu1 %v5934_v8  ;;  %v6024_v60 = vld [vmem:[#allocation39_spill] sm:$0xff] }
 0x631   :  { %vm2724_vm15 = vcmp.eq.s32.totalorder %v6024_v60, 6  ;;  %vm2944_vm1 = vcmp.eq.s32.totalorder %v6024_v60, 7 }
 0x632   :  { %v2725_v7 = vsel %vm2724_vm15, 1, %v5904_v56 }
 0x633   :  { %2521 = vmatpush1.bf16.msra.mxu0 %v6012_v35  ;;  %3740 = vmatpush3.bf16.msra.mxu1 %v6013_v36 }
 0x634   :  { %2522 = vmatprep.subr.bf16.mxu0 %v6014_v37  ;;  %3741 = vmatprep.subr.bf16.mxu1 %v5934_v8 }
 0x635   :  { %2727 = vperm.xlu0 %3852, %v2725_v7  }
 0x637   :  { %2523 = vmatpush1.bf16.msra.mxu0 %v6015_v38  ;;  %3742 = vmatpush3.bf16.msra.mxu1 %v6016_v39  ;;  %v6028_v39 = vld [vmem:[#allocation83_spill] sm:$0xff] }
 0x638   :  { %2524 = vmatprep.subr.bf16.mxu0 %v6017_v40  ;;  %3743 = vmatprep.subr.bf16.mxu1 %v5934_v8 }
 0x63b   :  { %2525 = vmatpush1.bf16.msra.mxu0 %v6018_v41  ;;  %3744 = vmatpush3.bf16.msra.mxu1 %v6019_v43 }
 0x63c   :  { %2526 = vmatprep.subr.bf16.mxu0 %v6020_v44  ;;  %3745 = vmatprep.subr.bf16.mxu1 %v5934_v8 }
 0x63f   :  { %2527 = vmatpush1.bf16.msra.mxu0 %v6021_v46  ;;  %3746 = vmatpush3.bf16.msra.mxu1 %v6022_v50  ;;  %v6029_v50 = vld [vmem:[#allocation56_spill] sm:$0xff] }
 0x640   :  { %2594 = vmatprep.subr.bf16.mxu0 %v6023_v12  ;;  %3751 = vmatprep.subr.bf16.mxu1 %v5934_v8 }
 0x6d5   :  { %v2326_v63 = vpop.f32.mrb[72].mxu0  ;;  %v2367_v59 = vpop.f32.mrb[56].mxu1 }
 0x6d6   :  { %v2327_v20 = vadd.f32 %v2326_v63, %v6025_v5  ;;  %v2328_v27 = vpop.f32.mrb[73].mxu0  ;;  %v3709_v49 = vpop.f32.mrb[57].mxu1  ;;  %v2368_v40 = vadd.f32 %v2367_v59, %v6028_v39 }
 0x6d7   :  { %v2329_v48 = vadd.f32 %v2328_v27, %v5052_v47  ;;  %v2330_v61 = vpop.f32.mrb[74].mxu0  ;;  %v2370_v13 = vpop.f32.mrb[58].mxu1 }
 0x6d8   :  { %v2455_v11 = vadd.f32 %v2327_v20, %v6026_v16  ;;  %v2331_v28 = vpop.f32.mrb[75].mxu0  ;;  %v3710_v33 = vpop.f32.mrb[59].mxu1  ;;  %v6030_v61 = vld [vmem:[#allocation72_spill] sm:$0xff] }
 0x6d9   :  { %v2462_v15 = vadd.f32 %v2329_v48, %v6027_v23 }
 0x6da   :  { %v3244_v14 = vmul.f32 -1.442695, %v2455_v11  ;;  %v6031_v11 = vld [vmem:[#allocation74_spill] sm:$0xff] }
 0x6db   :  { %v3245_v21 = vmul.f32 -1.442695, %v2462_v15 }
 0x6dc   :  { %4098 = vpow2.f32 %v3244_v14 }
 0x6dd   :  { %4100 = vpow2.f32 %v3245_v21 }
 0x6e6   :  { %v4099_v35 = vpop.eup %4098 }
 0x6e7   :  { %v2459_v36 = vadd.f32 1.0, %v4099_v35  ;;  %v4101_v37 = vpop.eup %4100 }
 0x6e8   :  { %v2466_v38 = vadd.f32 1.0, %v4101_v37 }
 0x6e9   :  { %4102 = vrcp.f32 %v2459_v36 }
 0x6ea   :  { %4104 = vrcp.f32 %v2466_v38 }
 0x6f3   :  { %v4103_v41 = vpop.eup %4102 }
 0x6f4   :  { %v2469_v43 = vmul.f32 %v4103_v41, %v2368_v40  ;;  %v4105_v23 = vpop.eup %4104 }
 0x6f5   :  { %v2408_v44 = vpop.f32.mrb[76].mxu0  ;;  %v2449_v46 = vpop.f32.mrb[60].mxu1  ;;  %v2472_v14 = vsub.f32 1.0, %v4105_v23  ;;  %v2474_v36 = vmul.f32 %v4105_v23, %v5556_v9 }
 0x6f6   :  { %v2470_v12 = vadd.f32 %v2469_v43, %v6029_v50  ;;  %v2409_v7 = vadd.f32 %v2408_v44, %v5068_v3  ;;  %v2410_v63 = vpop.f32.mrb[77].mxu0  ;;  %v3729_v20 = vpop.f32.mrb[61].mxu1  ;;  %v4218_v50 = vld [vmem:[#allocation8 + $0x64] ss:$12 sps:$4 sm:$0xff]  }
 0x6f7   :  { %v2411_v27 = vadd.f32 %v2410_v63, %v5071_v58  ;;  %v2412_v49 = vpop.f32.mrb[78].mxu0  ;;  %v2452_v48 = vpop.f32.mrb[62].mxu1  ;;  %v4221_v63 = vld [vmem:[#allocation8 + $0x7c] ss:$12 sps:$4 sm:$0xff]   ;;  %v4222_v20 = vld [vmem:[#allocation8 + $0x78] ss:$12 sps:$4 sm:$0xff]  }
 0x6f8   :  { %4106 = vtanh.f32 %v2470_v12  ;;  %v2476_v13 = vadd.f32 %v2409_v7, %v6030_v61  ;;  %v2413_v16 = vpop.f32.mrb[79].mxu0  ;;  %v3730_v59 = vpop.f32.mrb[63].mxu1  ;;  %v4219_v12 = vld [vmem:[#allocation8 + $0x60] ss:$12 sps:$4 sm:$0xff]   ;;  %v4220_v7 = vld [vmem:[#allocation8 + $0x68] ss:$12 sps:$4 sm:$0xff]  }
 0x6f9   :  { %v2483_v28 = vadd.f32 %v2411_v27, %v6031_v11  ;;  %v4223_v27 = vld [vmem:[#allocation8 + $0x80] ss:$12 sps:$4 sm:$0xff]   ;;  %v4225_v48 = vld [vmem:[#allocation8 + $0x90] ss:$12 sps:$4 sm:$0xff]   ;;  %v4226_v61 = vld [vmem:[#allocation8 + $0x98] ss:$12 sps:$4 sm:$0xff]  }
 0x6fa   :  { %v3246_v33 = vmul.f32 -1.442695, %v2476_v13  ;;  %v4224_v49 = vld [vmem:[#allocation8 + $0x94] ss:$12 sps:$4 sm:$0xff]   ;;  %v4227_v13 = vld [vmem:[#allocation8 + $0xac] ss:$12 sps:$4 sm:$0xff]  }
 0x6fb   :  { %v3247_v15 = vmul.f32 -1.442695, %v2483_v28  ;;  %v4228_v16 = vld [vmem:[#allocation8 + $0xa8] ss:$12 sps:$4 sm:$0xff]   ;;  %v4229_v59 = vld [vmem:[#allocation8 + $0xb0] ss:$12 sps:$4 sm:$0xff]  }
 0x6fc   :  { %4108 = vpow2.f32 %v3246_v33  ;;  %v4230_v11 = vld [vmem:[#allocation11 + $0x4] ss:$12 sps:$4 sm:$0xff]   ;;  %v2945_v28 = vsel %vm2944_vm1, 1, %v5904_v56 }
 0x6fd   :  { %4110 = vpow2.f32 %v3247_v15  ;;  %2947 = vperm.xlu1 %3853, %v2945_v28  }
 0x702   :  { %v4107_v21 = vpop.eup %4106 }
 0x703   :  { %v2473_v35 = vmul.f32 %v4107_v21, %v2472_v14 }
 0x705   :  { %v5650_v37 = vadd.f32 %v2474_v36, %v2473_v35 }
 0x706   :  { %v4109_v38 = vpop.eup %4108 }
 0x707   :  { %v2480_v40 = vadd.f32 1.0, %v4109_v38  ;;  %v2511_v41 = vpack.c.bf16 %v5650_v37, %v5650_v37  ;;  %v4111_v43 = vpop.eup %4110 }
 0x709   :  { %4112 = vrcp.f32 %v2480_v40  ;;  %2545 = vmatmul.mubr.bf16.vlgmr.msra.gmra.mrb[80].mxu0 %v2511_v41  ;;  %3748 = vmatmul.mubr.bf16.vlgmr.msra.gmra.mrb[64].mxu1 %v2511_v41  ;;  %v6033_v40 = vld [vmem:[#allocation57_spill] sm:$0xff] }
 0x70a   :  { %2595 = vmatpush1.bf16.msra.mxu0 %v5326_v45  ;;  %3752 = vmatpush3.bf16.msra.mxu1 %v5329_v19  ;;  %v2487_v45 = vadd.f32 1.0, %v4111_v43  ;;  %v2450_v19 = vadd.f32 %v2449_v46, %v5090_v26  ;;  %v4217_v46 = vld [vmem:[#allocation8 + $0x50] ss:$12 sps:$4 sm:$0xff]  }
 0x70b   :  { %2596 = vmatprep.subr.bf16.mxu0 %v5332_v6  ;;  %3753 = vmatprep.subr.bf16.mxu1 %v5934_v8 }
 0x70c   :  { %2626 = vmatprep.mubr.bf16.mxu0 %v5904_v56  ;;  %3767 = vmatprep.mubr.msk.bf16.mxu1 %vm4453_vm0, %v5934_v8  ;;  %4114 = vrcp.f32 %v2487_v45 }
 0x70e   :  { %2597 = vmatpush1.bf16.msra.mxu0 %v5339_v54  ;;  %3754 = vmatpush3.bf16.msra.mxu1 %v5342_v62  ;;  %v6032_v54 = vld [vmem:[#allocation77_spill] sm:$0xff] }
 0x70f   :  { %2598 = vmatprep.subr.bf16.mxu0 %v5345_v55  ;;  %3755 = vmatprep.subr.bf16.mxu1 %v5934_v8 }
 0x712   :  { %2599 = vmatpush1.bf16.msra.mxu0 %v5350_v57  ;;  %3756 = vmatpush3.bf16.msra.mxu1 %v5353_v4 }
 0x713   :  { %v4113_v6 = vpop.eup %4112  ;;  %2600 = vmatprep.subr.bf16.mxu0 %v5356_v2  ;;  %3757 = vmatprep.subr.bf16.mxu1 %v5934_v8 }
 0x714   :  { %v2490_v44 = vmul.f32 %v4113_v6, %v2450_v19  ;;  %v6034_v19 = vld [vmem:[#allocation58_spill] sm:$0xff] }
 0x716   :  { %v2491_v62 = vadd.f32 %v2490_v44, %v6032_v54  ;;  %2601 = vmatpush1.bf16.msra.mxu0 %v5361_v34  ;;  %3758 = vmatpush3.bf16.msra.mxu1 %v5364_v22  ;;  %v4115_v55 = vpop.eup %4114 }
 0x717   :  { %2602 = vmatprep.subr.bf16.mxu0 %v5367_v17  ;;  %3759 = vmatprep.subr.bf16.mxu1 %v5934_v8  ;;  %v2493_v57 = vsub.f32 1.0, %v4115_v55  ;;  %v2495_v34 = vmul.f32 %v4115_v55, %v5594_v29 }
 0x718   :  { %4116 = vtanh.f32 %v2491_v62 }
 0x71a   :  { %2603 = vmatpush1.bf16.msra.mxu0 %v5371_v24  ;;  %3760 = vmatpush3.bf16.msra.mxu1 %v5374_v32  ;;  %v4206_v24 = vld [vmem:[#allocation8 + $0x4] ss:$12 sps:$4 sm:$0xff]   ;;  %v4207_v32 = vld [vmem:[#allocation8] ss:$12 sps:$4 sm:$0xff]  }
 0x71b   :  { %2604 = vmatprep.subr.bf16.mxu0 %v5377_v25  ;;  %3761 = vmatprep.subr.bf16.mxu1 %v5934_v8  ;;  %v4209_v25 = vld [vmem:[#allocation8 + $0x1c] ss:$12 sps:$4 sm:$0xff]  }
 0x71e   :  { %2605 = vmatpush1.bf16.msra.mxu0 %v5381_v30  ;;  %3762 = vmatpush3.bf16.msra.mxu1 %v5384_v31  ;;  %v4211_v30 = vld [vmem:[#allocation8 + $0x20] ss:$12 sps:$4 sm:$0xff]  }
 0x71f   :  { %2606 = vmatprep.subr.bf16.mxu0 %v5387_v52  ;;  %3763 = vmatprep.subr.bf16.mxu1 %v5934_v8  ;;  %v4212_v31 = vld [vmem:[#allocation8 + $0x34] ss:$12 sps:$4 sm:$0xff]   ;;  %v4213_v52 = vld [vmem:[#allocation8 + $0x30] ss:$12 sps:$4 sm:$0xff]  }
 0x722   :  { %v4117_v4 = vpop.eup %4116  ;;  %2607 = vmatpush1.bf16.msra.mxu0 %v5991_v18  ;;  %3764 = vmatpush3.bf16.msra.mxu1 %v5394_v42  ;;  %v4215_v42 = vld [vmem:[#allocation8 + $0x4c] ss:$12 sps:$4 sm:$0xff]   ;;  %v4216_v18 = vld [vmem:[#allocation8 + $0x48] ss:$12 sps:$4 sm:$0xff]  }
 0x723   :  { %v2494_v2 = vmul.f32 %v4117_v4, %v2493_v57  ;;  %2608 = vmatprep.subr.bf16.mxu0 %v5398_v1  ;;  %3765 = vmatprep.subr.bf16.mxu1 %v5934_v8  ;;  %v4208_v1 = vld [vmem:[#allocation8 + $0x8] ss:$12 sps:$4 sm:$0xff]  }
 0x725   :  { %v5688_v22 = vadd.f32 %v2495_v34, %v2494_v2 }
 0x726   :  { %2609 = vmatpush1.bf16.msra.mxu0 %v5404_v51  ;;  %3766 = vmatpush3.bf16.msra.mxu1 %v5407_v0  ;;  %v4210_v51 = vld [vmem:[#allocation8 + $0x18] ss:$12 sps:$4 sm:$0xff]  }
 0x727   :  { %v2593_v17 = vpack.c.bf16 %v5688_v22, %v5688_v22  ;;  %2732 = vmatprep.subr.bf16.mxu0 %v4206_v24  ;;  %3771 = vmatprep.subr.bf16.mxu1 %v5934_v8  ;;  %v4214_v0 = vld [vmem:[#allocation8 + $0x38] ss:$12 sps:$4 sm:$0xff]  }
 0x729   :  { %2627 = vmatmul.mubr.bf16.vlgmr.msra.gmra.mrb[84].mxu0 %v2593_v17  ;;  %3768 = vmatmul.mubr.bf16.vlgmr.msra.gmra.mrb[68].mxu1 %v2593_v17 }
 0x72a   :  { %2733 = vmatpush1.bf16.msra.mxu0 %v4207_v32  ;;  %3772 = vmatpush3.bf16.msra.mxu1 %v4208_v1  ;;  %v6035_v32 = vld [vmem:[#allocation52_spill] sm:$0xff] }
 0x72b   :  { %2734 = vmatprep.subr.bf16.mxu0 %v4209_v25  ;;  %3773 = vmatprep.subr.bf16.mxu1 %v5934_v8 }
 0x72c   :  { %2764 = vmatprep.mubr.bf16.mxu0 %v5904_v56  ;;  %3787 = vmatprep.mubr.msk.bf16.mxu1 %vm4453_vm0, %v5934_v8 }
 0x72e   :  { %2735 = vmatpush1.bf16.msra.mxu0 %v4210_v51  ;;  %3774 = vmatpush3.bf16.msra.mxu1 %v4211_v30 }
 0x72f   :  { %2736 = vmatprep.subr.bf16.mxu0 %v4212_v31  ;;  %3775 = vmatprep.subr.bf16.mxu1 %v5934_v8 }
 0x732   :  { %2737 = vmatpush1.bf16.msra.mxu0 %v4213_v52  ;;  %3776 = vmatpush3.bf16.msra.mxu1 %v4214_v0 }
 0x733   :  { %2738 = vmatprep.subr.bf16.mxu0 %v4215_v42  ;;  %3777 = vmatprep.subr.bf16.mxu1 %v5934_v8  ;;  %v6036_v42 = vld [vmem:[#allocation78_spill] sm:$0xff] }
 0x736   :  { %2739 = vmatpush1.bf16.msra.mxu0 %v4216_v18  ;;  %3778 = vmatpush3.bf16.msra.mxu1 %v4217_v46 }
 0x737   :  { %2740 = vmatprep.subr.bf16.mxu0 %v4218_v50  ;;  %3779 = vmatprep.subr.bf16.mxu1 %v5934_v8 }
 0x73a   :  { %2741 = vmatpush1.bf16.msra.mxu0 %v4219_v12  ;;  %3780 = vmatpush3.bf16.msra.mxu1 %v4220_v7  ;;  %v6037_v12 = vld [vmem:[#allocation79_spill] sm:$0xff] }
 0x73b   :  { %2742 = vmatprep.subr.bf16.mxu0 %v4221_v63  ;;  %3781 = vmatprep.subr.bf16.mxu1 %v5934_v8 }
 0x73e   :  { %2743 = vmatpush1.bf16.msra.mxu0 %v4222_v20  ;;  %3782 = vmatpush3.bf16.msra.mxu1 %v4223_v27 }
 0x73f   :  { %2744 = vmatprep.subr.bf16.mxu0 %v4224_v49  ;;  %3783 = vmatprep.subr.bf16.mxu1 %v5934_v8 }
 0x742   :  { %2745 = vmatpush1.bf16.msra.mxu0 %v4225_v48  ;;  %3784 = vmatpush3.bf16.msra.mxu1 %v4226_v61 }
 0x743   :  { %2746 = vmatprep.subr.bf16.mxu0 %v4227_v13  ;;  %3785 = vmatprep.subr.bf16.mxu1 %v5934_v8 }
 0x746   :  { %2747 = vmatpush1.bf16.msra.mxu0 %v4228_v16  ;;  %3786 = vmatpush3.bf16.msra.mxu1 %v4229_v59 }
 0x747   :  { %2814 = vmatprep.subr.bf16.mxu0 %v4230_v11  ;;  %3791 = vmatprep.subr.bf16.mxu1 %v5934_v8 }
 0x7dc   :  { %v2546_v33 = vpop.f32.mrb[80].mxu0  ;;  %v2587_v23 = vpop.f32.mrb[64].mxu1 }
 0x7dd   :  { %v2547_v15 = vadd.f32 %v2546_v33, %v6025_v5  ;;  %v2548_v14 = vpop.f32.mrb[81].mxu0  ;;  %v3749_v21 = vpop.f32.mrb[65].mxu1  ;;  %v2588_v4 = vadd.f32 %v2587_v23, %v6028_v39  ;;  %v4231_v33 = vld [vmem:[#allocation11] ss:$12 sps:$4 sm:$0xff]   ;;  %v4232_v23 = vld [vmem:[#allocation11 + $0x8] ss:$12 sps:$4 sm:$0xff]  }
 0x7de   :  { %v2549_v35 = vadd.f32 %v2548_v14, %v5052_v47  ;;  %v2550_v36 = vpop.f32.mrb[82].mxu0  ;;  %v2590_v38 = vpop.f32.mrb[66].mxu1  ;;  %v4234_v21 = vld [vmem:[#allocation11 + $0x18] ss:$12 sps:$4 sm:$0xff]  }
 0x7df   :  { %v2675_v41 = vadd.f32 %v2547_v15, %v6033_v40  ;;  %v2551_v43 = vpop.f32.mrb[83].mxu0  ;;  %v3750_v45 = vpop.f32.mrb[67].mxu1  ;;  %v4233_v15 = vld [vmem:[#allocation11 + $0x1c] ss:$12 sps:$4 sm:$0xff]   ;;  %v4236_v36 = vld [vmem:[#allocation11 + $0x34] ss:$12 sps:$4 sm:$0xff]  }
 0x7e0   :  { %v2682_v6 = vadd.f32 %v2549_v35, %v6034_v19  ;;  %v4235_v35 = vld [vmem:[#allocation11 + $0x20] ss:$12 sps:$4 sm:$0xff]   ;;  %v4238_v43 = vld [vmem:[#allocation11 + $0x38] ss:$12 sps:$4 sm:$0xff]  }
 0x7e1   :  { %v3248_v60 = vmul.f32 -1.442695, %v2675_v41  ;;  %v4237_v41 = vld [vmem:[#allocation11 + $0x30] ss:$12 sps:$4 sm:$0xff]   ;;  %v4239_v45 = vld [vmem:[#allocation11 + $0x4c] ss:$12 sps:$4 sm:$0xff]  }
 0x7e2   :  { %v3249_v44 = vmul.f32 -1.442695, %v2682_v6  ;;  %v6038_v6 = vld [vmem:[#allocation73_spill] sm:$0xff] }
 0x7e3   :  { %4118 = vpow2.f32 %v3248_v60 }
 0x7e4   :  { %4120 = vpow2.f32 %v3249_v44  ;;  %v4240_v44 = vld [vmem:[#allocation11 + $0x48] ss:$12 sps:$4 sm:$0xff]  }
 0x7ed   :  { %v4119_v54 = vpop.eup %4118 }
 0x7ee   :  { %v2679_v62 = vadd.f32 1.0, %v4119_v54  ;;  %v4121_v55 = vpop.eup %4120  ;;  %v4241_v54 = vld [vmem:[#allocation11 + $0x50] ss:$12 sps:$4 sm:$0xff]  }
 0x7ef   :  { %v2686_v57 = vadd.f32 1.0, %v4121_v55  ;;  %v4243_v55 = vld [vmem:[#allocation11 + $0x60] ss:$12 sps:$4 sm:$0xff]  }
 0x7f0   :  { %4122 = vrcp.f32 %v2679_v62  ;;  %v4242_v62 = vld [vmem:[#allocation11 + $0x64] ss:$12 sps:$4 sm:$0xff]  }
 0x7f1   :  { %4124 = vrcp.f32 %v2686_v57  ;;  %v4244_v57 = vld [vmem:[#allocation11 + $0x68] ss:$12 sps:$4 sm:$0xff]  }
 0x7fa   :  { %v4123_v2 = vpop.eup %4122 }
 0x7fb   :  { %v2689_v34 = vmul.f32 %v4123_v2, %v2588_v4  ;;  %v4125_v20 = vpop.eup %4124  ;;  %v4245_v4 = vld [vmem:[#allocation11 + $0x7c] ss:$12 sps:$4 sm:$0xff]  }
 0x7fc   :  { %v2628_v17 = vpop.f32.mrb[84].mxu0  ;;  %v2669_v24 = vpop.f32.mrb[68].mxu1  ;;  %v2692_v49 = vsub.f32 1.0, %v4125_v20  ;;  %v2694_v13 = vmul.f32 %v4125_v20, %v5650_v37  ;;  %v3994_v20 = vld [vmem:[#allocation13 + $0x20] sm:$0xff]  }
 0x7fd   :  { %v2690_v1 = vadd.f32 %v2689_v34, %v6035_v32  ;;  %v2629_v25 = vadd.f32 %v2628_v17, %v5068_v3  ;;  %v2630_v51 = vpop.f32.mrb[85].mxu0  ;;  %v3769_v30 = vpop.f32.mrb[69].mxu1  ;;  %v2670_v40 = vadd.f32 %v2669_v24, %v5090_v26  ;;  %v4246_v34 = vld [vmem:[#allocation11 + $0x78] ss:$12 sps:$4 sm:$0xff]   ;;  %v4247_v17 = vld [vmem:[#allocation11 + $0x80] ss:$12 sps:$4 sm:$0xff]  }
 0x7fe   :  { %v2631_v31 = vadd.f32 %v2630_v51, %v5071_v58  ;;  %v2632_v52 = vpop.f32.mrb[86].mxu0  ;;  %v2672_v0 = vpop.f32.mrb[70].mxu1  ;;  %v4248_v24 = vld [vmem:[#allocation11 + $0x94] ss:$12 sps:$4 sm:$0xff]   ;;  %v4250_v51 = vld [vmem:[#allocation11 + $0x98] ss:$12 sps:$4 sm:$0xff]  }
 0x7ff   :  { %4126 = vtanh.f32 %v2690_v1  ;;  %v2696_v18 = vadd.f32 %v2629_v25, %v6036_v42  ;;  %v2633_v46 = vpop.f32.mrb[87].mxu0  ;;  %v3770_v50 = vpop.f32.mrb[71].mxu1  ;;  %v4249_v25 = vld [vmem:[#allocation11 + $0x90] ss:$12 sps:$4 sm:$0xff]   ;;  %v4251_v52 = vld [vmem:[#allocation11 + $0xac] ss:$12 sps:$4 sm:$0xff]  }
 0x800   :  { %v2703_v7 = vadd.f32 %v2631_v31, %v6037_v12  ;;  %v4252_v42 = vld [vmem:[#allocation11 + $0xa8] ss:$12 sps:$4 sm:$0xff]   ;;  %v3990_v50 = vld [vmem:[#allocation13] sm:$0xff]  }
 0x801   :  { %v3250_v63 = vmul.f32 -1.442695, %v2696_v18  ;;  %v4253_v18 = vld [vmem:[#allocation11 + $0xb0] ss:$12 sps:$4 sm:$0xff]   ;;  %v3991_v12 = vld [vmem:[#allocation13 + $0x8] sm:$0xff]  }
 0x802   :  { %v3251_v27 = vmul.f32 -1.442695, %v2703_v7  ;;  %v3992_v7 = vld [vmem:[#allocation13 + $0x10] sm:$0xff]  }
 0x803   :  { %4128 = vpow2.f32 %v3250_v63  ;;  %v3993_v63 = vld [vmem:[#allocation13 + $0x18] sm:$0xff]  }
 0x804   :  { %4130 = vpow2.f32 %v3251_v27  ;;  %v3995_v27 = vld [vmem:[#allocation13 + $0x28] sm:$0xff]  }
 0x809   :  { %v4127_v48 = vpop.eup %4126 }
 0x80a   :  { %v2693_v61 = vmul.f32 %v4127_v48, %v2692_v49  ;;  %v3996_v49 = vld [vmem:[#allocation13 + $0x30] sm:$0xff]   ;;  %v3997_v48 = vld [vmem:[#allocation13 + $0x38] sm:$0xff]  }
 0x80c   :  { %v5719_v16 = vadd.f32 %v2694_v13, %v2693_v61 }
 0x80d   :  { %v4129_v59 = vpop.eup %4128 }
 0x80e   :  { %v2700_v11 = vadd.f32 1.0, %v4129_v59  ;;  %v2731_v28 = vpack.c.bf16 %v5719_v16, %v5719_v16  ;;  %v4131_v14 = vpop.eup %4130 }
 0x80f   :  { %v2707_v38 = vadd.f32 1.0, %v4131_v14  ;;  %v6039_v14 = vld [vmem:[#allocation59_spill] sm:$0xff] }
 0x810   :  { %4132 = vrcp.f32 %v2700_v11  ;;  %2765 = vmatmul.mubr.bf16.vlgmr.msra.gmra.mrb[88].mxu0 %v2731_v28  ;;  %3788 = vmatmul.mubr.bf16.vlgmr.msra.gmra.mrb[72].mxu1 %v2731_v28 }
 0x811   :  { %2815 = vmatpush1.bf16.msra.mxu0 %v4231_v33  ;;  %3792 = vmatpush3.bf16.msra.mxu1 %v4232_v23  ;;  %4134 = vrcp.f32 %v2707_v38  ;;  %v6040_v38 = vld [vmem:[#allocation60_spill] sm:$0xff] }
 0x812   :  { %2816 = vmatprep.subr.bf16.mxu0 %v4233_v15  ;;  %3793 = vmatprep.subr.bf16.mxu1 %v5934_v8 }
 0x813   :  { %2846 = vmatprep.mubr.bf16.mxu0 %v5904_v56  ;;  %3807 = vmatprep.mubr.msk.bf16.mxu1 %vm4453_vm0, %v5934_v8 }
 0x815   :  { %2817 = vmatpush1.bf16.msra.mxu0 %v4234_v21  ;;  %3794 = vmatpush3.bf16.msra.mxu1 %v4235_v35 }
 0x816   :  { %2818 = vmatprep.subr.bf16.mxu0 %v4236_v36  ;;  %3795 = vmatprep.subr.bf16.mxu1 %v5934_v8 }
 0x819   :  { %2819 = vmatpush1.bf16.msra.mxu0 %v4237_v41  ;;  %3796 = vmatpush3.bf16.msra.mxu1 %v4238_v43 }
 0x81a   :  { %v4133_v56 = vpop.eup %4132  ;;  %2820 = vmatprep.subr.bf16.mxu0 %v4239_v45  ;;  %3797 = vmatprep.subr.bf16.mxu1 %v5934_v8  ;;  %v1401_v45 = vpop.permute.xlu0 %1400 }
 0x81b   :  { %v2710_v19 = vmul.f32 %v4133_v56, %v2670_v40  ;;  %v4135_v2 = vpop.eup %4134 }
 0x81c   :  { %v2713_v32 = vsub.f32 1.0, %v4135_v2  ;;  %v2715_v31 = vmul.f32 %v4135_v2, %v5688_v22 }
 0x81d   :  { %v2711_v60 = vadd.f32 %v2710_v19, %v6038_v6  ;;  %2821 = vmatpush1.bf16.msra.mxu0 %v4240_v44  ;;  %3798 = vmatpush3.bf16.msra.mxu1 %v4241_v54 }
 0x81e   :  { %2822 = vmatprep.subr.bf16.mxu0 %v4242_v62  ;;  %3799 = vmatprep.subr.bf16.mxu1 %v5934_v8  ;;  %v1621_v44 = vpop.permute.xlu0 %1620 }
 0x81f   :  { %4136 = vtanh.f32 %v2711_v60  ;;  %v1841_v60 = vpop.permute.xlu1 %1840  ;;  %vm1622_vm2 = vcmp.eq.s32.totalorder %v1621_v44, 1  ;;  %v6048_v44 = vld [vmem:[#allocation85_spill] sm:$0xff] }
 0x820   :  { %vm1842_vm3 = vcmp.eq.s32.totalorder %v1841_v60, 1 }
 0x821   :  { %2823 = vmatpush1.bf16.msra.mxu0 %v4243_v55  ;;  %3800 = vmatpush3.bf16.msra.mxu1 %v4244_v57  ;;  %v6041_v57 = vld [vmem:[#allocation55_spill] sm:$0xff] }
 0x822   :  { %2824 = vmatprep.subr.bf16.mxu0 %v4245_v4  ;;  %3801 = vmatprep.subr.bf16.mxu1 %v5934_v8 }
 0x825   :  { %2825 = vmatpush1.bf16.msra.mxu0 %v4246_v34  ;;  %3802 = vmatpush3.bf16.msra.mxu1 %v4247_v17 }
 0x826   :  { %2826 = vmatprep.subr.bf16.mxu0 %v4248_v24  ;;  %3803 = vmatprep.subr.bf16.mxu1 %v5934_v8 }
 0x829   :  { %v4137_v1 = vpop.eup %4136  ;;  %2827 = vmatpush1.bf16.msra.mxu0 %v4249_v25  ;;  %3804 = vmatpush3.bf16.msra.mxu1 %v4250_v51  ;;  %v6042_v25 = vld [vmem:[#allocation80_spill] sm:$0xff] }
 0x82a   :  { %v2714_v30 = vmul.f32 %v4137_v1, %v2713_v32  ;;  %2828 = vmatprep.subr.bf16.mxu0 %v4251_v52  ;;  %3805 = vmatprep.subr.bf16.mxu1 %v5934_v8  ;;  %v6043_v52 = vld [vmem:[#allocation81_spill] sm:$0xff] }
 0x82c   :  { %v5736_v0 = vadd.f32 %v2715_v31, %v2714_v30  ;;  %v2061_v31 = vpop.permute.xlu1 %2060 }
 0x82d   :  { %2829 = vmatpush1.bf16.msra.mxu0 %v4252_v42  ;;  %3806 = vmatpush3.bf16.msra.mxu1 %v4253_v18  ;;  %vm2062_vm4 = vcmp.eq.s32.totalorder %v2061_v31, 1 }
 0x82e   :  { %v2813_v46 = vpack.c.bf16 %v5736_v0, %v5736_v0  ;;  %3811 = vmatprep.subr.bf16.mxu0 %v5934_v8  ;;  %3831 = vmatprep.subr.bf16.mxu1 %v5934_v8 }
 0x830   :  { %2847 = vmatmul.mubr.bf16.vlgmr.msra.gmra.mrb[92].mxu0 %v2813_v46  ;;  %3808 = vmatmul.mubr.bf16.vlgmr.msra.gmra.mrb[76].mxu1 %v2813_v46  ;;  %v2281_v46 = vpop.permute.xlu0 %2280 }
 0x831   :  { %3827 = vmatprep.mubr.msk.bf16.mxu0 %vm4453_vm0, %v5934_v8  ;;  %3833 = vmatprep.mubr.msk.bf16.mxu1 %vm4453_vm0, %v5934_v8  ;;  %vm1402_vm0 = vcmp.eq.s32.totalorder %v1401_v45, 1  ;;  %vm2282_vm5 = vcmp.eq.s32.totalorder %v2281_v46, 1 }
 0x832   :  { %3812 = vmatpush3.bf16.msra.mxu0 %v3990_v50 }
 0x833   :  { %3813 = vmatprep.subr.bf16.mxu0 %v5934_v8 }
 0x836   :  { %3814 = vmatpush3.bf16.msra.mxu0 %v3991_v12 }
 0x837   :  { %3815 = vmatprep.subr.bf16.mxu0 %v5934_v8 }
 0x83a   :  { %3816 = vmatpush3.bf16.msra.mxu0 %v3992_v7 }
 0x83b   :  { %3817 = vmatprep.subr.bf16.mxu0 %v5934_v8 }
 0x83e   :  { %3818 = vmatpush3.bf16.msra.mxu0 %v3993_v63  ;;  %v2721_v63 = vpop.permute.xlu0 %2720 }
 0x83f   :  { %3819 = vmatprep.subr.bf16.mxu0 %v5934_v8  ;;  %vm2722_vm6 = vcmp.eq.s32.totalorder %v2721_v63, 1 }
 0x842   :  { %3820 = vmatpush3.bf16.msra.mxu0 %v3994_v20  ;;  %v6045_v20 = vld [vmem:[#allocation20_spill] sm:$0xff] }
 0x843   :  { %3821 = vmatprep.subr.bf16.mxu0 %v5934_v8 }
 0x846   :  { %3822 = vmatpush3.bf16.msra.mxu0 %v3995_v27 }
 0x847   :  { %3823 = vmatprep.subr.bf16.mxu0 %v5934_v8 }
 0x84a   :  { %3824 = vmatpush3.bf16.msra.mxu0 %v3996_v49 }
 0x84b   :  { %3825 = vmatprep.subr.bf16.mxu0 %v5934_v8 }
 0x84e   :  { %3826 = vmatpush3.bf16.msra.mxu0 %v3997_v48 }
 0x8e3   :  { %v2766_v61 = vpop.f32.mrb[88].mxu0  ;;  %v2807_v13 = vpop.f32.mrb[72].mxu1 }
 0x8e4   :  { %v2767_v59 = vadd.f32 %v2766_v61, %v6025_v5  ;;  %v2768_v11 = vpop.f32.mrb[89].mxu0  ;;  %v3789_v28 = vpop.f32.mrb[73].mxu1  ;;  %v6046_v61 = vld [vmem:[#allocation37_spill] sm:$0xff] }
 0x8e5   :  { %v2769_v33 = vadd.f32 %v2768_v11, %v5052_v47  ;;  %v2770_v23 = vpop.f32.mrb[90].mxu0  ;;  %v2810_v15 = vpop.f32.mrb[74].mxu1  ;;  %v2808_v47 = vadd.f32 %v2807_v13, %v6028_v39 }
 0x8e6   :  { %v2895_v21 = vadd.f32 %v2767_v59, %v6039_v14  ;;  %v2771_v35 = vpop.f32.mrb[91].mxu0  ;;  %v3790_v36 = vpop.f32.mrb[75].mxu1 }
 0x8e7   :  { %v2902_v40 = vadd.f32 %v2769_v33, %v6040_v38 }
 0x8e8   :  { %v3252_v41 = vmul.f32 -1.442695, %v2895_v21 }
 0x8e9   :  { %v3253_v8 = vmul.f32 -1.442695, %v2902_v40 }
 0x8ea   :  { %4138 = vpow2.f32 %v3252_v41 }
 0x8eb   :  { %4140 = vpow2.f32 %v3253_v8 }
 0x8f4   :  { %v4139_v43 = vpop.eup %4138 }
 0x8f5   :  { %v2899_v56 = vadd.f32 1.0, %v4139_v43  ;;  %v4141_v5 = vpop.eup %4140 }
 0x8f6   :  { %v2906_v19 = vadd.f32 1.0, %v4141_v5  ;;  %v6047_v5 = vld [vmem:[#allocation76_spill] sm:$0xff] }
 0x8f7   :  { %4142 = vrcp.f32 %v2899_v56  ;;  %v1408_v56 = vpop.permute.xlu0 %1407 }
 0x8f8   :  { %4144 = vrcp.f32 %v2906_v19  ;;  %vm1409_vm9 = vcmp.eq.s32.totalorder %v1408_v56, 1 }
 0x8fb   :  { %v1848_v19 = vpop.permute.xlu0 %1847 }
 0x8fc   :  { %vm1849_vm11 = vcmp.eq.s32.totalorder %v1848_v19, 1 }
 0x901   :  { %v4143_v6 = vpop.eup %4142 }
 0x902   :  { %v2909_v54 = vmul.f32 %v4143_v6, %v2808_v47  ;;  %v4145_v50 = vpop.eup %4144 }
 0x903   :  { %v2848_v62 = vpop.f32.mrb[92].mxu0  ;;  %v2889_v55 = vpop.f32.mrb[76].mxu1  ;;  %v2912_v49 = vsub.f32 1.0, %v4145_v50  ;;  %v2914_v28 = vmul.f32 %v4145_v50, %v5719_v16 }
 0x904   :  { %v2910_v4 = vadd.f32 %v2909_v54, %v6041_v57  ;;  %v2849_v2 = vadd.f32 %v2848_v62, %v5068_v3  ;;  %v2850_v34 = vpop.f32.mrb[93].mxu0  ;;  %v3809_v17 = vpop.f32.mrb[77].mxu1  ;;  %v2890_v8 = vadd.f32 %v2889_v55, %v5090_v26  ;;  %v1410_v54 = vsel %vm1409_vm9, %v6048_v44, 0.0  ;;  %v6049_v62 = vld [vmem:[#allocation21_spill] sm:$0xff] }
 0x905   :  { %v2851_v24 = vadd.f32 %v2850_v34, %v5071_v58  ;;  %v2852_v32 = vpop.f32.mrb[94].mxu0  ;;  %v2892_v1 = vpop.f32.mrb[78].mxu1  ;;  %v6044_v58 = vld [vmem:[#allocation84_spill] sm:$0xff] }
 0x906   :  { %4146 = vtanh.f32 %v2910_v4  ;;  %v2916_v39 = vadd.f32 %v2849_v2, %v6042_v25  ;;  %v2853_v51 = vpop.f32.mrb[95].mxu0  ;;  %v3810_v30 = vpop.f32.mrb[79].mxu1  ;;  %v1403_v7 = vsel %vm1402_vm0, %v6044_v58, 0.0  ;;  %v6050_v2 = vld [vmem:[#allocation34_spill] sm:$0xff]  ;;  %vm3098_vm0 = vcmask 64512  }
 0x907   :  { %v2923_v42 = vadd.f32 %v2851_v24, %v6043_v52  ;;  %v2501_v3 = vpop.permute.xlu1 %2500  ;;  %v1623_v27 = vsel %vm1622_vm2, %v6045_v20, %v1403_v7 }
 0x908   :  { %v3254_v18 = vmul.f32 -1.442695, %v2916_v39  ;;  %vm2502_vm7 = vcmp.eq.s32.totalorder %v2501_v3, 1  ;;  %v1843_v13 = vsel %vm1842_vm3, %v6046_v61, %v1623_v27 }
 0x909   :  { %v3255_v12 = vmul.f32 -1.442695, %v2923_v42  ;;  %v2063_v59 = vsel %vm2062_vm4, %v5462_v53, %v1843_v13 }
 0x90a   :  { %4148 = vpow2.f32 %v3254_v18  ;;  %v2283_v33 = vsel %vm2282_vm5, %v5556_v9, %v2063_v59 }
 0x90b   :  { %4150 = vpow2.f32 %v3255_v12  ;;  %v2941_v23 = vpop.permute.xlu1 %2940  ;;  %v2503_v15 = vsel %vm2502_vm7, %v5650_v37, %v2283_v33 }
 0x90c   :  { %vm2942_vm8 = vcmp.eq.s32.totalorder %v2941_v23, 1  ;;  %v2723_v35 = vsel %vm2722_vm6, %v5719_v16, %v2503_v15  ;;  %v2288_v16 = vpop.permute.xlu0 %2287 }
 0x90d   :  { %vm2289_vm13 = vcmp.eq.s32.totalorder %v2288_v16, 1 }
 0x90f   :  { %v1628_v45 = vpop.permute.xlu1 %1627 }
 0x910   :  { %v4147_v48 = vpop.eup %4146  ;;  %vm1629_vm10 = vcmp.eq.s32.totalorder %v1628_v45, 1  ;;  %v2728_v26 = vpop.permute.xlu0 %2727 }
 0x911   :  { %v2913_v11 = vmul.f32 %v4147_v48, %v2912_v49  ;;  %v1630_v55 = vsel %vm1629_vm10, %v6049_v62, %v1410_v54  ;;  %vm2729_vm15 = vcmp.eq.s32.totalorder %v2728_v26, 1 }
 0x912   :  { %v1850_v34 = vsel %vm1849_vm11, %v6050_v2, %v1630_v55 }
 0x913   :  { %v2915_v14 = vadd.f32 %v2914_v28, %v2913_v11  ;;  %v2068_v47 = vpop.permute.xlu1 %2067 }
 0x914   :  { %v4149_v21 = vpop.eup %4148  ;;  %vm2069_vm12 = vcmp.eq.s32.totalorder %v2068_v47, 1 }
 0x915   :  { %v2920_v36 = vadd.f32 1.0, %v4149_v21  ;;  %v2943_v38 = vsel %vm2942_vm8, %v2915_v14, %v2723_v35  ;;  %v4151_v53 = vpop.eup %4150  ;;  %v2070_v17 = vsel %vm2069_vm12, %v5500_v10, %v1850_v34 }
 0x916   :  { %v2951_v40 = vpack.c.bf16 %v2943_v38, %v2943_v38  ;;  %v2927_v41 = vadd.f32 1.0, %v4151_v53  ;;  %v2290_v25 = vsel %vm2289_vm13, %v5594_v29, %v2070_v17 }
 0x917   :  { %4152 = vrcp.f32 %v2920_v36  ;;  %v2508_v60 = vpop.permute.xlu1 %2507 }
 0x918   :  { %3828 = vmatmul.mubr.bf16.vlgmr.msra.gmra.mrb[96].mxu0 %v2951_v40  ;;  %4154 = vrcp.f32 %v2927_v41  ;;  %vm2509_vm14 = vcmp.eq.s32.totalorder %v2508_v60, 1 }
 0x919   :  { %v2510_v39 = vsel %vm2509_vm14, %v5688_v22, %v2290_v25 }
 0x91a   :  { %v2730_v30 = vsel %vm2729_vm15, %v5736_v0, %v2510_v39 }
 0x91b   :  { %v2948_v24 = vpop.permute.xlu1 %2947 }
 0x91c   :  { %vm2949_vm1 = vcmp.eq.s32.totalorder %v2948_v24, 1 }
 0x921   :  { %v4153_v43 = vpop.eup %4152 }
 0x922   :  { %v2930_v9 = vmul.f32 %v4153_v43, %v2890_v8  ;;  %v4155_v6 = vpop.eup %4154 }
 0x923   :  { %v2933_v57 = vsub.f32 1.0, %v4155_v6  ;;  %v2935_v1 = vmul.f32 %v4155_v6, %v5736_v0 }
 0x924   :  { %v2931_v37 = vadd.f32 %v2930_v9, %v6047_v5 }
 0x926   :  { %4156 = vtanh.f32 %v2931_v37 }
 0x930   :  { %v4157_v4 = vpop.eup %4156 }
 0x931   :  { %v2934_v32 = vmul.f32 %v4157_v4, %v2933_v57 }
 0x933   :  { %v2936_v51 = vadd.f32 %v2935_v1, %v2934_v32 }
 0x935   :  { %v2950_v31 = vsel %vm2949_vm1, %v2936_v51, %v2730_v30 }
 0x936   :  { %v3057_v52 = vpack.c.bf16 %v2950_v31, %v2950_v31 }
 0x938   :  { %3832 = vmatpush3.bf16.xpose.msra.mxu1 %v3057_v52 }
 0x9eb   :  { %v3050_v42 = vpop.f32.mrb[96].mxu0 }
 0x9ec   :  { %v3056_v18 = vpack.c.bf16 %v3050_v42, %v3050_v42  ;;  %v3829_v46 = vpop.f32.mrb[97].mxu0 }
 0x9ed   :  { %v3053_v10 = vpop.f32.mrb[98].mxu0 }
 0x9ee   :  { %v3830_v50 = vpop.f32.mrb[99].mxu0  ;;  %3834 = vmatmul.mubr.bf16.vlgmr.msra.gmra.mrb[80].mxu1 %v3056_v18 }
 0xac1   :  { %v3092_v29 = vpop.f32.mrb[80].mxu1 }
 0xac2   :  { %v3835_v3 = vpop.f32.mrb[81].mxu1  ;;  %3099 = vst.msk [vmem:[#allocation14] sm:$0xff] %vm3098_vm0, %v3092_v29 }
 0xac3   :  { %v3095_v22 = vpop.f32.mrb[82].mxu1 }
 0xac4   :  { %4419 = shalt.err (!%p4416_p4)
}
 0xac5   :  { %s4420_s4 = scalar_lea.hbm %s5806_s13, 128 }
 0xac6   :  { %p4421_p5 = scmp.ne.s32.totalorder %s5806_s13, %s4420_s4  ;;  %p4424_p6 = scmp.lt.u32.totalorder %s4420_s4, %s5806_s13 }
 0xac8   :  { %p4426_p7 = pnand %p4424_p6, %p4421_p5 }
 0xaca   :  { %4429 = shalt.err (!%p4426_p7)
}
 0xacb   :  { %3109 = dma.vmem_to_hbm [thread:$0]  %s3107_s23, 128, %s5806_s13, [#allocation4]   ;;  %v3836_v0 = vpop.f32.mrb[83].mxu1 }
 0xacc   :  { %4438 = dma.done.wait [#allocation4], 128  }
 0xacd   :  { %4439 = vsyncadd [#allocation4], 4294967168 }
 0xace   :  { %3113 = vsyncpa [#allocation3], 1 }
 0xacf   :  { %3114 = vsyncpa [#allocation6], 1 }
 0xad0   :  { %3115 = vsyncpa [#allocation9], 1 }
 0xad1   :  { %3116 = vsyncpa [#allocation12], 1 }
 0xad2   :  { %3117 = vsyncpa [#allocation4], 1 }

</bundles_post_ra>
